<compile_context>
chip_gen: v6e
topology: v6e:2x2x1
jax: 0.10.0
libtpu: 0.0.40
codegen_flags: <defaults>
</compile_context>

<pallas_src>
import functools

import jax
import jax.numpy as jnp
from jax import lax
from jax.experimental import pallas as pl
from jax.experimental.pallas import tpu as pltpu

# ---------------- synthetic model config ----------------
VOCAB = 256
HIDDEN = 128
N_HEADS = 2
HEAD_DIM = HIDDEN // N_HEADS
FFN = 4 * HIDDEN
N_LAYERS = 1
PAD_TOKEN_ID = 0
EMBED_TOKEN_ID = 253          # '<EMBED>' special token id
NUM_COMPRESS_TOKEN = 1
NEG_INF = -1e9
LN_EPS = 1e-5
PARAM_DTYPE = jnp.bfloat16    # bfloat16=True in the reference module


# ---------------- shared in-kernel building blocks ----------------
def _layernorm(z, g_ref, b_ref):
    mu = jnp.mean(z, axis=-1, keepdims=True)
    var = jnp.mean(jnp.square(z - mu), axis=-1, keepdims=True)
    zn = (z - mu) * lax.rsqrt(var + LN_EPS)
    return (zn * g_ref[...].astype(jnp.float32)
            + b_ref[...].astype(jnp.float32))


def _layer_body(x, mask_ref,
                ln1_g_ref, ln1_b_ref, w_qkv_ref, b_qkv_ref, wo_ref, bo_ref,
                ln2_g_ref, ln2_b_ref, w_up_ref, b_up_ref, w_down_ref,
                b_down_ref, *, causal):
    """One pre-LN transformer block on a [S, H] bf16 tile -> f32 [S, H]."""
    S, H = x.shape
    xf = x.astype(jnp.float32)

    # ---- ln1 + fused QKV projection (bf16 MXU operands, f32 accumulate) ----
    h = _layernorm(xf, ln1_g_ref, ln1_b_ref).astype(x.dtype)
    qkv = jnp.dot(h, w_qkv_ref[...], preferred_element_type=jnp.float32)
    qkv = qkv + b_qkv_ref[...].astype(jnp.float32)            # [S, 3H] f32

    # ---- additive attention mask built in-kernel (no HBM bias tensor) ----
    key_ok = mask_ref[0] > 0                                  # [1, S] bool
    allowed = jnp.broadcast_to(key_ok, (S, S))
    if causal:
        q_idx = lax.broadcasted_iota(jnp.int32, (S, S), 0)
        k_idx = lax.broadcasted_iota(jnp.int32, (S, S), 1)
        allowed = jnp.logical_and(allowed, k_idx <= q_idx)
    bias = jnp.where(allowed, 0.0, NEG_INF).astype(jnp.float32)

    # ---- multi-head attention, lane-dense [S, H] result ----
    scale = 1.0 / (HEAD_DIM ** 0.5)
    head_outs = []
    for hh in range(N_HEADS):
        lo = hh * HEAD_DIM
        qh = qkv[:, lo:lo + HEAD_DIM].astype(x.dtype)             # [S, Dh]
        kh = qkv[:, H + lo:H + lo + HEAD_DIM].astype(x.dtype)     # [S, Dh]
        vh = qkv[:, 2 * H + lo:2 * H + lo + HEAD_DIM].astype(x.dtype)
        # contract on head_dim directly (no materialized transpose)
        s = lax.dot_general(qh, kh, (((1,), (1,)), ((), ())),
                            preferred_element_type=jnp.float32) * scale
        s = s + bias
        m = jnp.max(s, axis=-1, keepdims=True)
        p = jnp.exp(s - m)
        p = p * pl.reciprocal(jnp.sum(p, axis=-1, keepdims=True), approx=True)
        head_outs.append(jnp.dot(p.astype(x.dtype), vh,
                                 preferred_element_type=jnp.float32))
    attn = jnp.concatenate(head_outs, axis=-1)                # [S, H] f32

    # ---- output projection + residual ----
    attn = jnp.dot(attn.astype(x.dtype), wo_ref[...],
                   preferred_element_type=jnp.float32)
    attn = attn + bo_ref[...].astype(jnp.float32)
    x1 = xf + attn

    # ---- ln2 + MLP + residual ----
    h2 = _layernorm(x1, ln2_g_ref, ln2_b_ref).astype(x.dtype)
    up = jnp.dot(h2, w_up_ref[...], preferred_element_type=jnp.float32)
    up = jax.nn.gelu(up + b_up_ref[...].astype(jnp.float32))
    down = jnp.dot(up.astype(x.dtype), w_down_ref[...],
                   preferred_element_type=jnp.float32)
    return x1 + down + b_down_ref[...].astype(jnp.float32)


# ---------------- fused transformer-layer kernel ----------------
def _layer_kernel(x_ref, mask_ref,
                  ln1_g_ref, ln1_b_ref, w_qkv_ref, b_qkv_ref, wo_ref, bo_ref,
                  ln2_g_ref, ln2_b_ref, w_up_ref, b_up_ref, w_down_ref,
                  b_down_ref, lnf_g_ref, lnf_b_ref, o_ref,
                  *, causal, final_ln):
    x2 = _layer_body(x_ref[0], mask_ref,
                     ln1_g_ref, ln1_b_ref, w_qkv_ref, b_qkv_ref, wo_ref,
                     bo_ref, ln2_g_ref, ln2_b_ref, w_up_ref, b_up_ref,
                     w_down_ref, b_down_ref, causal=causal)
    if final_ln:
        x2 = _layernorm(x2, lnf_g_ref, lnf_b_ref)
    o_ref[0] = x2.astype(o_ref.dtype)


def transformer_layer(x, attention_mask, p, lnf_g, lnf_b, *,
                      causal=True, final_ln=False):
    B, S, H = x.shape
    mask3d = attention_mask[:, None, :].astype(jnp.int32)     # [B, 1, S]

    def xmap(b):
        return (b, 0, 0)

    def wmap(b):
        return (0, 0)

    return pl.pallas_call(
        functools.partial(_layer_kernel, causal=causal, final_ln=final_ln),
        out_shape=jax.ShapeDtypeStruct((B, S, H), x.dtype),
        grid=(B,),
        in_specs=[
            pl.BlockSpec((1, S, H), xmap),                    # x
            pl.BlockSpec((1, 1, S), xmap),                    # attention mask
            pl.BlockSpec((1, H), wmap),                       # ln1_g
            pl.BlockSpec((1, H), wmap),                       # ln1_b
            pl.BlockSpec((H, 3 * H), wmap),                   # w_qkv
            pl.BlockSpec((1, 3 * H), wmap),                   # b_qkv
            pl.BlockSpec((H, H), wmap),                       # wo
            pl.BlockSpec((1, H), wmap),                       # bo
            pl.BlockSpec((1, H), wmap),                       # ln2_g
            pl.BlockSpec((1, H), wmap),                       # ln2_b
            pl.BlockSpec((H, FFN), wmap),                     # w_up
            pl.BlockSpec((1, FFN), wmap),                     # b_up
            pl.BlockSpec((FFN, H), wmap),                     # w_down
            pl.BlockSpec((1, H), wmap),                       # b_down
            pl.BlockSpec((1, H), wmap),                       # lnf_g
            pl.BlockSpec((1, H), wmap),                       # lnf_b
        ],
        out_specs=pl.BlockSpec((1, S, H), xmap),
        compiler_params=pltpu.CompilerParams(
            dimension_semantics=("parallel",)),
    )(x, mask3d, p["ln1_g"], p["ln1_b"], p["w_qkv"], p["b_qkv"],
      p["wo"], p["bo"], p["ln2_g"], p["ln2_b"],
      p["w_up"], p["b_up"], p["w_down"], p["b_down"], lnf_g, lnf_b)


# -------- fused: last decoder layer + final LN + LM head + shifted CE --------
def _layer_head_loss_kernel(x_ref, mask_ref, labels_ref,
                            ln1_g_ref, ln1_b_ref, w_qkv_ref, b_qkv_ref,
                            wo_ref, bo_ref, ln2_g_ref, ln2_b_ref,
                            w_up_ref, b_up_ref, w_down_ref, b_down_ref,
                            lnf_g_ref, lnf_b_ref, lm_w_ref, lm_b_ref,
                            logits_ref, stats_ref, *, causal):
    x2 = _layer_body(x_ref[0], mask_ref,
                     ln1_g_ref, ln1_b_ref, w_qkv_ref, b_qkv_ref, wo_ref,
                     bo_ref, ln2_g_ref, ln2_b_ref, w_up_ref, b_up_ref,
                     w_down_ref, b_down_ref, causal=causal)

    # ---- final layernorm + LM head (logits stay in f32 for the loss) ----
    h = _layernorm(x2, lnf_g_ref, lnf_b_ref)
    y = jnp.dot(h.astype(lm_w_ref.dtype), lm_w_ref[...],
                preferred_element_type=jnp.float32)
    y = y + lm_b_ref[...].astype(jnp.float32)                 # [S, V] f32
    logits_ref[0] = y.astype(logits_ref.dtype)

    # ---- shifted cross-entropy partial sums (labels pre-shifted, -100 pad) --
    labels = labels_ref[0]                                    # [S, 1] int32
    m = jnp.max(y, axis=-1, keepdims=True)
    lse = m + jnp.log(jnp.sum(jnp.exp(y - m), axis=-1, keepdims=True))
    col = lax.broadcasted_iota(jnp.int32, y.shape, 1)
    picked = jnp.sum(jnp.where(col == labels, y, 0.0),
                     axis=-1, keepdims=True)
    valid = (labels != -100).astype(jnp.float32)
    nll_sum = jnp.sum((lse - picked) * valid)
    cnt = jnp.sum(valid)
    lane = lax.broadcasted_iota(jnp.int32, (1, 128), 1)
    stats_ref[0] = jnp.where(lane == 0, nll_sum,
                             jnp.where(lane == 1, cnt, 0.0)
                             ).astype(jnp.float32)


def decoder_layer_head_loss(x, attention_mask, shift_labels, lp,
                            lnf_g, lnf_b, lm_w, lm_b):
    B, S, H = x.shape
    V = lm_w.shape[1]
    mask3d = attention_mask[:, None, :].astype(jnp.int32)       # [B, 1, S]
    labels3d = shift_labels.reshape(B, S, 1).astype(jnp.int32)  # [B, S, 1]

    def xmap(b):
        return (b, 0, 0)

    def wmap(b):
        return (0, 0)

    logits, stats = pl.pallas_call(
        functools.partial(_layer_head_loss_kernel, causal=True),
        out_shape=(jax.ShapeDtypeStruct((B, S, V), x.dtype),
                   jax.ShapeDtypeStruct((B, 1, 128), jnp.float32)),
        grid=(B,),
        in_specs=[
            pl.BlockSpec((1, S, H), xmap),                    # x
            pl.BlockSpec((1, 1, S), xmap),                    # attention mask
            pl.BlockSpec((1, S, 1), xmap),                    # shifted labels
            pl.BlockSpec((1, H), wmap),                       # ln1_g
            pl.BlockSpec((1, H), wmap),                       # ln1_b
            pl.BlockSpec((H, 3 * H), wmap),                   # w_qkv
            pl.BlockSpec((1, 3 * H), wmap),                   # b_qkv
            pl.BlockSpec((H, H), wmap),                       # wo
            pl.BlockSpec((1, H), wmap),                       # bo
            pl.BlockSpec((1, H), wmap),                       # ln2_g
            pl.BlockSpec((1, H), wmap),                       # ln2_b
            pl.BlockSpec((H, FFN), wmap),                     # w_up
            pl.BlockSpec((1, FFN), wmap),                     # b_up
            pl.BlockSpec((FFN, H), wmap),                     # w_down
            pl.BlockSpec((1, H), wmap),                       # b_down
            pl.BlockSpec((1, H), wmap),                       # lnf_g
            pl.BlockSpec((1, H), wmap),                       # lnf_b
            pl.BlockSpec((H, V), wmap),                       # lm_head_w
            pl.BlockSpec((1, V), wmap),                       # lm_head_b
        ],
        out_specs=(pl.BlockSpec((1, S, V), xmap),
                   pl.BlockSpec((1, 1, 128), xmap)),
        compiler_params=pltpu.CompilerParams(
            dimension_semantics=("parallel",)),
    )(x, mask3d, labels3d,
      lp["ln1_g"], lp["ln1_b"], lp["w_qkv"], lp["b_qkv"], lp["wo"], lp["bo"],
      lp["ln2_g"], lp["ln2_b"], lp["w_up"], lp["b_up"], lp["w_down"],
      lp["b_down"], lnf_g, lnf_b, lm_w, lm_b)
    return logits, stats


# ---------------- transformer towers built on the fused kernels ----------------
def encoder_forward(params, input_ids, attention_mask):
    x = jnp.take(params["embed"], input_ids, axis=0)          # [B, S, H]
    n = len(params["layers"])
    for li, lp in enumerate(params["layers"]):
        x = transformer_layer(x, attention_mask, lp,
                              params["lnf_g"], params["lnf_b"],
                              causal=True, final_ln=(li == n - 1))
    return x                                                   # last_hidden_state


def decoder_forward(params, inputs_embeds, attention_mask, shift_labels):
    x = inputs_embeds
    layers = params["layers"]
    for lp in layers[:-1]:
        x = transformer_layer(x, attention_mask, lp,
                              params["lnf_g"], params["lnf_b"],
                              causal=True, final_ln=False)
    logits, stats = decoder_layer_head_loss(
        x, attention_mask, shift_labels, layers[-1],
        params["lnf_g"], params["lnf_b"],
        params["lm_head_w"], params["lm_head_b"])
    return logits, stats


# ---------------- CompressModel forward semantics ----------------
def _compress(enc_params, input_ids, attention_mask):
    B, S = input_ids.shape
    lengths = attention_mask.sum(axis=1)
    embedding_ids = jnp.concatenate(
        [input_ids,
         jnp.full((B, NUM_COMPRESS_TOKEN), PAD_TOKEN_ID, dtype=input_ids.dtype)],
        axis=1)
    embedding_attention_mask = jnp.concatenate(
        [attention_mask,
         jnp.zeros((B, NUM_COMPRESS_TOKEN), dtype=attention_mask.dtype)],
        axis=1)
    insert_indices = lengths[:, None] + jnp.arange(
        NUM_COMPRESS_TOKEN, dtype=lengths.dtype)[None, :]
    batch_idx = jnp.arange(B)[:, None]
    embedding_ids = embedding_ids.at[batch_idx, insert_indices].set(
        EMBED_TOKEN_ID)
    embedding_attention_mask = embedding_attention_mask.at[
        batch_idx, insert_indices].set(1)

    last_hidden = encoder_forward(enc_params, embedding_ids,
                                  embedding_attention_mask)
    compress_embedding = last_hidden[batch_idx, insert_indices]   # [B, T, H]
    compress_attention_mask = jnp.ones(
        (B, NUM_COMPRESS_TOKEN), dtype=attention_mask.dtype)
    return compress_embedding, compress_attention_mask


def compress_model_forward(params, input_ids, attention_mask,
                           target_ids, target_attention_mask, labels=None):
    compress_embedding, compress_attention_mask = _compress(
        params["encoder"], input_ids, attention_mask)

    target_embeddings = jnp.take(params["decoder"]["embed"], target_ids, axis=0)
    decoder_embeddings = jnp.concatenate(
        [compress_embedding, target_embeddings], axis=1)
    decoder_attention_mask = jnp.concatenate(
        [compress_attention_mask, target_attention_mask], axis=1)

    B, S_dec = decoder_attention_mask.shape
    if labels is not None:
        # shift_labels[b, j] = labels[b, j+1] for j < S-1, else ignore(-100);
        # row S-1 being ignored reproduces logits[:, :-1] vs labels[:, 1:].
        shift_labels = jnp.concatenate(
            [labels[:, 1:],
             jnp.full((B, 1), -100, dtype=labels.dtype)], axis=1)
    else:
        shift_labels = jnp.full((B, S_dec), -100, dtype=jnp.int32)

    logits, stats = decoder_forward(params["decoder"], decoder_embeddings,
                                    decoder_attention_mask, shift_labels)

    loss = None
    if labels is not None:
        nll_total = jnp.sum(stats[:, 0, 0])
        cnt_total = jnp.sum(stats[:, 0, 1])
        loss = nll_total / jnp.maximum(cnt_total, 1.0)
    return loss, logits


# ---------------- deterministic parameter init ----------------
def _normal(key, shape, scale=0.02):
    return (scale * jax.random.normal(key, shape, dtype=jnp.float32)
            ).astype(PARAM_DTYPE)


def _init_layer(key):
    ks = jax.random.split(key, 4)
    zeros = lambda *s: jnp.zeros(s, PARAM_DTYPE)
    ones = lambda *s: jnp.ones(s, PARAM_DTYPE)
    return {
        "ln1_g": ones(1, HIDDEN), "ln1_b": zeros(1, HIDDEN),
        "w_qkv": _normal(ks[0], (HIDDEN, 3 * HIDDEN)),
        "b_qkv": zeros(1, 3 * HIDDEN),
        "wo": _normal(ks[1], (HIDDEN, HIDDEN)), "bo": zeros(1, HIDDEN),
        "ln2_g": ones(1, HIDDEN), "ln2_b": zeros(1, HIDDEN),
        "w_up": _normal(ks[2], (HIDDEN, FFN)), "b_up": zeros(1, FFN),
        "w_down": _normal(ks[3], (FFN, HIDDEN)), "b_down": zeros(1, HIDDEN),
    }


def init_params(key):
    ke, kd = jax.random.split(key, 2)

    def init_tower(k, with_lm_head):
        ks = jax.random.split(k, N_LAYERS + 2)
        p = {
            "embed": _normal(ks[0], (VOCAB, HIDDEN)),
            "layers": [_init_layer(ks[1 + i]) for i in range(N_LAYERS)],
            "lnf_g": jnp.ones((1, HIDDEN), PARAM_DTYPE),
            "lnf_b": jnp.zeros((1, HIDDEN), PARAM_DTYPE),
        }
        if with_lm_head:
            p["lm_head_w"] = _normal(ks[-1], (HIDDEN, VOCAB))
            p["lm_head_b"] = jnp.zeros((1, VOCAB), PARAM_DTYPE)
        return p

    return {"encoder": init_tower(ke, False), "decoder": init_tower(kd, True)}


# ---------------- main ----------------
if __name__ == "__main__":
    B, S_IN, S_TGT = 2, 8, 8

    key = jax.random.PRNGKey(0)
    kp, k1, k2 = jax.random.split(key, 3)
    params = init_params(kp)

    input_ids = jax.random.randint(k1, (B, S_IN), 1, 200, dtype=jnp.int32)
    in_lengths = jnp.array([5, 7], dtype=jnp.int32)
    attention_mask = (jnp.arange(S_IN)[None, :] < in_lengths[:, None]
                      ).astype(jnp.int32)
    input_ids = jnp.where(attention_mask > 0, input_ids, PAD_TOKEN_ID)

    target_ids = jax.random.randint(k2, (B, S_TGT), 1, 200, dtype=jnp.int32)
    tgt_lengths = jnp.array([8, 6], dtype=jnp.int32)
    target_attention_mask = (jnp.arange(S_TGT)[None, :] < tgt_lengths[:, None]
                             ).astype(jnp.int32)
    target_ids = jnp.where(target_attention_mask > 0, target_ids, PAD_TOKEN_ID)

    labels = jnp.concatenate(
        [jnp.full((B, NUM_COMPRESS_TOKEN), -100, dtype=jnp.int32),
         jnp.where(target_attention_mask > 0, target_ids, -100)], axis=1)

    loss, logits = jax.jit(compress_model_forward)(
        params, input_ids, attention_mask, target_ids,
        target_attention_mask, labels)
    jax.block_until_ready((loss, logits))

    assert logits.shape == (B, NUM_COMPRESS_TOKEN + S_TGT, VOCAB)
    assert bool(jnp.isfinite(loss))
    print("KERNEL_OK")
</pallas_src>

<mosaic_0001>
module attributes {stable_mosaic.version = 11 : i64} {
  func.func @_layer_kernel(%arg0: i32, %arg1: memref<1x9x128xbf16, #tpu.memory_space<vmem>>, %arg2: memref<1x1x9xi32, #tpu.memory_space<vmem>>, %arg3: memref<1x128xbf16, #tpu.memory_space<vmem>>, %arg4: memref<1x128xbf16, #tpu.memory_space<vmem>>, %arg5: memref<128x384xbf16, #tpu.memory_space<vmem>>, %arg6: memref<1x384xbf16, #tpu.memory_space<vmem>>, %arg7: memref<128x128xbf16, #tpu.memory_space<vmem>>, %arg8: memref<1x128xbf16, #tpu.memory_space<vmem>>, %arg9: memref<1x128xbf16, #tpu.memory_space<vmem>>, %arg10: memref<1x128xbf16, #tpu.memory_space<vmem>>, %arg11: memref<128x512xbf16, #tpu.memory_space<vmem>>, %arg12: memref<1x512xbf16, #tpu.memory_space<vmem>>, %arg13: memref<512x128xbf16, #tpu.memory_space<vmem>>, %arg14: memref<1x128xbf16, #tpu.memory_space<vmem>>, %arg15: memref<1x128xbf16, #tpu.memory_space<vmem>>, %arg16: memref<1x128xbf16, #tpu.memory_space<vmem>>, %arg17: memref<1x9x128xbf16, #tpu.memory_space<vmem>>) attributes {dimension_semantics = [#tpu.dimension_semantics<parallel>], iteration_bounds = array<i64: 2>, scalar_prefetch = 0 : i64, scratch_operands = 0 : i64, tpu.core_type = #tpu.core_type<tc>, window_params = [{transform_indices = @transform_0, window_bounds = array<i64: 1, 9, 128>}, {transform_indices = @transform_1, window_bounds = array<i64: 1, 1, 9>}, {pipeline_mode = #tpu.pipeline_mode<synchronous>, transform_indices = @transform_2, window_bounds = array<i64: 1, 128>}, {pipeline_mode = #tpu.pipeline_mode<synchronous>, transform_indices = @transform_3, window_bounds = array<i64: 1, 128>}, {pipeline_mode = #tpu.pipeline_mode<synchronous>, transform_indices = @transform_4, window_bounds = array<i64: 128, 384>}, {pipeline_mode = #tpu.pipeline_mode<synchronous>, transform_indices = @transform_5, window_bounds = array<i64: 1, 384>}, {pipeline_mode = #tpu.pipeline_mode<synchronous>, transform_indices = @transform_6, window_bounds = array<i64: 128, 128>}, {pipeline_mode = #tpu.pipeline_mode<synchronous>, transform_indices = @transform_7, window_bounds = array<i64: 1, 128>}, {pipeline_mode = #tpu.pipeline_mode<synchronous>, transform_indices = @transform_8, window_bounds = array<i64: 1, 128>}, {pipeline_mode = #tpu.pipeline_mode<synchronous>, transform_indices = @transform_9, window_bounds = array<i64: 1, 128>}, {pipeline_mode = #tpu.pipeline_mode<synchronous>, transform_indices = @transform_10, window_bounds = array<i64: 128, 512>}, {pipeline_mode = #tpu.pipeline_mode<synchronous>, transform_indices = @transform_11, window_bounds = array<i64: 1, 512>}, {pipeline_mode = #tpu.pipeline_mode<synchronous>, transform_indices = @transform_12, window_bounds = array<i64: 512, 128>}, {pipeline_mode = #tpu.pipeline_mode<synchronous>, transform_indices = @transform_13, window_bounds = array<i64: 1, 128>}, {pipeline_mode = #tpu.pipeline_mode<synchronous>, transform_indices = @transform_14, window_bounds = array<i64: 1, 128>}, {pipeline_mode = #tpu.pipeline_mode<synchronous>, transform_indices = @transform_15, window_bounds = array<i64: 1, 128>}, {transform_indices = @transform_16, window_bounds = array<i64: 1, 9, 128>}]} {
    %c0 = arith.constant 0 : index
    %c0_0 = arith.constant 0 : index
    %c0_1 = arith.constant 0 : index
    %0 = vector.load %arg1[%c0, %c0_0, %c0_1] : memref<1x9x128xbf16, #tpu.memory_space<vmem>>, vector<1x9x128xbf16>
    %1 = vector.shape_cast %0 : vector<1x9x128xbf16> to vector<9x128xbf16>
    %2 = arith.extf %1 : vector<9x128xbf16> to vector<9x128xf32>
    %cst = arith.constant dense<0.000000e+00> : vector<9xf32>
    %3 = vector.multi_reduction <add>, %2, %cst [1] : vector<9x128xf32> to vector<9xf32>
    %4 = vector.shape_cast %3 : vector<9xf32> to vector<9x1xf32>
    %cst_2 = arith.constant 1.280000e+02 : f32
    %5 = vector.broadcast %cst_2 : f32 to vector<9x1xf32>
    %6 = arith.divf %4, %5 : vector<9x1xf32>
    %7 = vector.broadcast %6 : vector<9x1xf32> to vector<9x128xf32>
    %8 = arith.subf %2, %7 : vector<9x128xf32>
    %9 = arith.mulf %8, %8 : vector<9x128xf32>
    %cst_3 = arith.constant dense<0.000000e+00> : vector<9xf32>
    %10 = vector.multi_reduction <add>, %9, %cst_3 [1] : vector<9x128xf32> to vector<9xf32>
    %11 = vector.shape_cast %10 : vector<9xf32> to vector<9x1xf32>
    %cst_4 = arith.constant 1.280000e+02 : f32
    %12 = vector.broadcast %cst_4 : f32 to vector<9x1xf32>
    %13 = arith.divf %11, %12 : vector<9x1xf32>
    %14 = vector.broadcast %6 : vector<9x1xf32> to vector<9x128xf32>
    %15 = arith.subf %2, %14 : vector<9x128xf32>
    %cst_5 = arith.constant 9.99999974E-6 : f32
    %16 = vector.broadcast %cst_5 : f32 to vector<9x1xf32>
    %17 = arith.addf %13, %16 : vector<9x1xf32>
    %18 = math.rsqrt %17 : vector<9x1xf32>
    %19 = vector.broadcast %18 : vector<9x1xf32> to vector<9x128xf32>
    %20 = arith.mulf %15, %19 : vector<9x128xf32>
    %c0_6 = arith.constant 0 : index
    %c0_7 = arith.constant 0 : index
    %21 = vector.load %arg3[%c0_6, %c0_7] : memref<1x128xbf16, #tpu.memory_space<vmem>>, vector<1x128xbf16>
    %22 = arith.extf %21 : vector<1x128xbf16> to vector<1x128xf32>
    %23 = vector.broadcast %22 : vector<1x128xf32> to vector<9x128xf32>
    %24 = arith.mulf %20, %23 : vector<9x128xf32>
    %c0_8 = arith.constant 0 : index
    %c0_9 = arith.constant 0 : index
    %25 = vector.load %arg4[%c0_8, %c0_9] : memref<1x128xbf16, #tpu.memory_space<vmem>>, vector<1x128xbf16>
    %26 = arith.extf %25 : vector<1x128xbf16> to vector<1x128xf32>
    %27 = vector.broadcast %26 : vector<1x128xf32> to vector<9x128xf32>
    %28 = arith.addf %24, %27 : vector<9x128xf32>
    %29 = arith.truncf %28 : vector<9x128xf32> to vector<9x128xbf16>
    %c0_10 = arith.constant 0 : index
    %c0_11 = arith.constant 0 : index
    %30 = vector.load %arg5[%c0_10, %c0_11] : memref<128x384xbf16, #tpu.memory_space<vmem>>, vector<128x384xbf16>
    %cst_12 = arith.constant dense<0.000000e+00> : vector<9x384xf32>
    %31 = tpu.matmul %29, %30, %cst_12 {dimension_numbers = #tpu.dot_dimension_numbers<[1], [0], [0], [1], [0, 0, 1, 1], [], []>} : vector<9x128xbf16>, vector<128x384xbf16>, vector<9x384xf32> -> vector<9x384xf32>
    %c0_13 = arith.constant 0 : index
    %c0_14 = arith.constant 0 : index
    %32 = vector.load %arg6[%c0_13, %c0_14] : memref<1x384xbf16, #tpu.memory_space<vmem>>, vector<1x384xbf16>
    %33 = arith.extf %32 : vector<1x384xbf16> to vector<1x384xf32>
    %34 = vector.broadcast %33 : vector<1x384xf32> to vector<9x384xf32>
    %35 = arith.addf %31, %34 : vector<9x384xf32>
    %c0_15 = arith.constant 0 : index
    %c0_16 = arith.constant 0 : index
    %c0_17 = arith.constant 0 : index
    %36 = vector.load %arg2[%c0_15, %c0_16, %c0_17] : memref<1x1x9xi32, #tpu.memory_space<vmem>>, vector<1x1x9xi32>
    %37 = vector.shape_cast %36 : vector<1x1x9xi32> to vector<1x9xi32>
    %c0_i32 = arith.constant 0 : i32
    %38 = vector.broadcast %c0_i32 : i32 to vector<1x9xi32>
    %39 = arith.cmpi sgt, %37, %38 : vector<1x9xi32>
    %40 = vector.shape_cast %39 : vector<1x9xi1> to vector<1x9xi1>
    %41 = vector.broadcast %40 : vector<1x9xi1> to vector<9x9xi1>
    %42 = tpu.iota {dimensions = array<i32: 0>} : vector<9x9xi32>
    %43 = tpu.iota {dimensions = array<i32: 1>} : vector<9x9xi32>
    %44 = arith.cmpi sle, %43, %42 : vector<9x9xi32>
    %45 = arith.andi %41, %44 : vector<9x9xi1>
    %cst_18 = arith.constant 0.000000e+00 : f32
    %cst_19 = arith.constant -1.000000e+09 : f32
    %46 = vector.broadcast %cst_18 : f32 to vector<9x9xf32>
    %47 = vector.broadcast %cst_19 : f32 to vector<9x9xf32>
    %48 = arith.select %45, %46, %47 : vector<9x9xi1>, vector<9x9xf32>
    %49 = vector.extract_strided_slice %35 {offsets = [0, 0], sizes = [9, 64], strides = [1, 1]} : vector<9x384xf32> to vector<9x64xf32>
    %50 = arith.truncf %49 : vector<9x64xf32> to vector<9x64xbf16>
    %51 = vector.extract_strided_slice %35 {offsets = [0, 128], sizes = [9, 64], strides = [1, 1]} : vector<9x384xf32> to vector<9x64xf32>
    %52 = arith.truncf %51 : vector<9x64xf32> to vector<9x64xbf16>
    %53 = vector.extract_strided_slice %35 {offsets = [0, 256], sizes = [9, 64], strides = [1, 1]} : vector<9x384xf32> to vector<9x64xf32>
    %54 = arith.truncf %53 : vector<9x64xf32> to vector<9x64xbf16>
    %cst_20 = arith.constant dense<0.000000e+00> : vector<9x9xf32>
    %55 = tpu.matmul %50, %52, %cst_20 {dimension_numbers = #tpu.dot_dimension_numbers<[1], [1], [0], [0], [0, 0, 1, 0], [], []>} : vector<9x64xbf16>, vector<9x64xbf16>, vector<9x9xf32> -> vector<9x9xf32>
    %cst_21 = arith.constant 1.250000e-01 : f32
    %56 = vector.broadcast %cst_21 : f32 to vector<9x9xf32>
    %57 = arith.mulf %55, %56 : vector<9x9xf32>
    %58 = arith.addf %57, %48 : vector<9x9xf32>
    %cst_22 = arith.constant dense<0xFF800000> : vector<9xf32>
    %59 = vector.multi_reduction <maximumf>, %58, %cst_22 [1] : vector<9x9xf32> to vector<9xf32>
    %60 = vector.shape_cast %59 : vector<9xf32> to vector<9x1xf32>
    %61 = vector.broadcast %60 : vector<9x1xf32> to vector<9x9xf32>
    %62 = arith.subf %58, %61 : vector<9x9xf32>
    %63 = math.exp %62 : vector<9x9xf32>
    %cst_23 = arith.constant dense<0.000000e+00> : vector<9xf32>
    %64 = vector.multi_reduction <add>, %63, %cst_23 [1] : vector<9x9xf32> to vector<9xf32>
    %65 = vector.shape_cast %64 : vector<9xf32> to vector<9x1xf32>
    %66 = tpu.reciprocal %65 {approx = true} : vector<9x1xf32> -> vector<9x1xf32>
    %67 = vector.broadcast %66 : vector<9x1xf32> to vector<9x9xf32>
    %68 = arith.mulf %63, %67 : vector<9x9xf32>
    %69 = arith.truncf %68 : vector<9x9xf32> to vector<9x9xbf16>
    %cst_24 = arith.constant dense<0.000000e+00> : vector<9x64xf32>
    %70 = tpu.matmul %69, %54, %cst_24 {dimension_numbers = #tpu.dot_dimension_numbers<[1], [0], [0], [1], [0, 0, 1, 1], [], []>} : vector<9x9xbf16>, vector<9x64xbf16>, vector<9x64xf32> -> vector<9x64xf32>
    %71 = vector.extract_strided_slice %35 {offsets = [0, 64], sizes = [9, 64], strides = [1, 1]} : vector<9x384xf32> to vector<9x64xf32>
    %72 = arith.truncf %71 : vector<9x64xf32> to vector<9x64xbf16>
    %73 = vector.extract_strided_slice %35 {offsets = [0, 192], sizes = [9, 64], strides = [1, 1]} : vector<9x384xf32> to vector<9x64xf32>
    %74 = arith.truncf %73 : vector<9x64xf32> to vector<9x64xbf16>
    %75 = vector.extract_strided_slice %35 {offsets = [0, 320], sizes = [9, 64], strides = [1, 1]} : vector<9x384xf32> to vector<9x64xf32>
    %76 = arith.truncf %75 : vector<9x64xf32> to vector<9x64xbf16>
    %cst_25 = arith.constant dense<0.000000e+00> : vector<9x9xf32>
    %77 = tpu.matmul %72, %74, %cst_25 {dimension_numbers = #tpu.dot_dimension_numbers<[1], [1], [0], [0], [0, 0, 1, 0], [], []>} : vector<9x64xbf16>, vector<9x64xbf16>, vector<9x9xf32> -> vector<9x9xf32>
    %cst_26 = arith.constant 1.250000e-01 : f32
    %78 = vector.broadcast %cst_26 : f32 to vector<9x9xf32>
    %79 = arith.mulf %77, %78 : vector<9x9xf32>
    %80 = arith.addf %79, %48 : vector<9x9xf32>
    %cst_27 = arith.constant dense<0xFF800000> : vector<9xf32>
    %81 = vector.multi_reduction <maximumf>, %80, %cst_27 [1] : vector<9x9xf32> to vector<9xf32>
    %82 = vector.shape_cast %81 : vector<9xf32> to vector<9x1xf32>
    %83 = vector.broadcast %82 : vector<9x1xf32> to vector<9x9xf32>
    %84 = arith.subf %80, %83 : vector<9x9xf32>
    %85 = math.exp %84 : vector<9x9xf32>
    %cst_28 = arith.constant dense<0.000000e+00> : vector<9xf32>
    %86 = vector.multi_reduction <add>, %85, %cst_28 [1] : vector<9x9xf32> to vector<9xf32>
    %87 = vector.shape_cast %86 : vector<9xf32> to vector<9x1xf32>
    %88 = tpu.reciprocal %87 {approx = true} : vector<9x1xf32> -> vector<9x1xf32>
    %89 = vector.broadcast %88 : vector<9x1xf32> to vector<9x9xf32>
    %90 = arith.mulf %85, %89 : vector<9x9xf32>
    %91 = arith.truncf %90 : vector<9x9xf32> to vector<9x9xbf16>
    %cst_29 = arith.constant dense<0.000000e+00> : vector<9x64xf32>
    %92 = tpu.matmul %91, %76, %cst_29 {dimension_numbers = #tpu.dot_dimension_numbers<[1], [0], [0], [1], [0, 0, 1, 1], [], []>} : vector<9x9xbf16>, vector<9x64xbf16>, vector<9x64xf32> -> vector<9x64xf32>
    %93 = tpu.concatenate %70, %92 in 1 : vector<9x64xf32>, vector<9x64xf32> -> vector<9x128xf32>
    %94 = arith.truncf %93 : vector<9x128xf32> to vector<9x128xbf16>
    %c0_30 = arith.constant 0 : index
    %c0_31 = arith.constant 0 : index
    %95 = vector.load %arg7[%c0_30, %c0_31] : memref<128x128xbf16, #tpu.memory_space<vmem>>, vector<128x128xbf16>
    %cst_32 = arith.constant dense<0.000000e+00> : vector<9x128xf32>
    %96 = tpu.matmul %94, %95, %cst_32 {dimension_numbers = #tpu.dot_dimension_numbers<[1], [0], [0], [1], [0, 0, 1, 1], [], []>} : vector<9x128xbf16>, vector<128x128xbf16>, vector<9x128xf32> -> vector<9x128xf32>
    %c0_33 = arith.constant 0 : index
    %c0_34 = arith.constant 0 : index
    %97 = vector.load %arg8[%c0_33, %c0_34] : memref<1x128xbf16, #tpu.memory_space<vmem>>, vector<1x128xbf16>
    %98 = arith.extf %97 : vector<1x128xbf16> to vector<1x128xf32>
    %99 = vector.broadcast %98 : vector<1x128xf32> to vector<9x128xf32>
    %100 = arith.addf %96, %99 : vector<9x128xf32>
    %101 = arith.addf %2, %100 : vector<9x128xf32>
    %cst_35 = arith.constant dense<0.000000e+00> : vector<9xf32>
    %102 = vector.multi_reduction <add>, %101, %cst_35 [1] : vector<9x128xf32> to vector<9xf32>
    %103 = vector.shape_cast %102 : vector<9xf32> to vector<9x1xf32>
    %cst_36 = arith.constant 1.280000e+02 : f32
    %104 = vector.broadcast %cst_36 : f32 to vector<9x1xf32>
    %105 = arith.divf %103, %104 : vector<9x1xf32>
    %106 = vector.broadcast %105 : vector<9x1xf32> to vector<9x128xf32>
    %107 = arith.subf %101, %106 : vector<9x128xf32>
    %108 = arith.mulf %107, %107 : vector<9x128xf32>
    %cst_37 = arith.constant dense<0.000000e+00> : vector<9xf32>
    %109 = vector.multi_reduction <add>, %108, %cst_37 [1] : vector<9x128xf32> to vector<9xf32>
    %110 = vector.shape_cast %109 : vector<9xf32> to vector<9x1xf32>
    %cst_38 = arith.constant 1.280000e+02 : f32
    %111 = vector.broadcast %cst_38 : f32 to vector<9x1xf32>
    %112 = arith.divf %110, %111 : vector<9x1xf32>
    %113 = vector.broadcast %105 : vector<9x1xf32> to vector<9x128xf32>
    %114 = arith.subf %101, %113 : vector<9x128xf32>
    %cst_39 = arith.constant 9.99999974E-6 : f32
    %115 = vector.broadcast %cst_39 : f32 to vector<9x1xf32>
    %116 = arith.addf %112, %115 : vector<9x1xf32>
    %117 = math.rsqrt %116 : vector<9x1xf32>
    %118 = vector.broadcast %117 : vector<9x1xf32> to vector<9x128xf32>
    %119 = arith.mulf %114, %118 : vector<9x128xf32>
    %c0_40 = arith.constant 0 : index
    %c0_41 = arith.constant 0 : index
    %120 = vector.load %arg9[%c0_40, %c0_41] : memref<1x128xbf16, #tpu.memory_space<vmem>>, vector<1x128xbf16>
    %121 = arith.extf %120 : vector<1x128xbf16> to vector<1x128xf32>
    %122 = vector.broadcast %121 : vector<1x128xf32> to vector<9x128xf32>
    %123 = arith.mulf %119, %122 : vector<9x128xf32>
    %c0_42 = arith.constant 0 : index
    %c0_43 = arith.constant 0 : index
    %124 = vector.load %arg10[%c0_42, %c0_43] : memref<1x128xbf16, #tpu.memory_space<vmem>>, vector<1x128xbf16>
    %125 = arith.extf %124 : vector<1x128xbf16> to vector<1x128xf32>
    %126 = vector.broadcast %125 : vector<1x128xf32> to vector<9x128xf32>
    %127 = arith.addf %123, %126 : vector<9x128xf32>
    %128 = arith.truncf %127 : vector<9x128xf32> to vector<9x128xbf16>
    %c0_44 = arith.constant 0 : index
    %c0_45 = arith.constant 0 : index
    %129 = vector.load %arg11[%c0_44, %c0_45] : memref<128x512xbf16, #tpu.memory_space<vmem>>, vector<128x512xbf16>
    %cst_46 = arith.constant dense<0.000000e+00> : vector<9x512xf32>
    %130 = tpu.matmul %128, %129, %cst_46 {dimension_numbers = #tpu.dot_dimension_numbers<[1], [0], [0], [1], [0, 0, 1, 1], [], []>} : vector<9x128xbf16>, vector<128x512xbf16>, vector<9x512xf32> -> vector<9x512xf32>
    %c0_47 = arith.constant 0 : index
    %c0_48 = arith.constant 0 : index
    %131 = vector.load %arg12[%c0_47, %c0_48] : memref<1x512xbf16, #tpu.memory_space<vmem>>, vector<1x512xbf16>
    %132 = arith.extf %131 : vector<1x512xbf16> to vector<1x512xf32>
    %133 = vector.broadcast %132 : vector<1x512xf32> to vector<9x512xf32>
    %134 = arith.addf %130, %133 : vector<9x512xf32>
    %135 = arith.mulf %134, %134 : vector<9x512xf32>
    %136 = arith.mulf %134, %135 : vector<9x512xf32>
    %cst_49 = arith.constant 4.471500e-02 : f32
    %137 = vector.broadcast %cst_49 : f32 to vector<9x512xf32>
    %138 = arith.mulf %137, %136 : vector<9x512xf32>
    %139 = arith.addf %134, %138 : vector<9x512xf32>
    %cst_50 = arith.constant 0.797884583 : f32
    %140 = vector.broadcast %cst_50 : f32 to vector<9x512xf32>
    %141 = arith.mulf %140, %139 : vector<9x512xf32>
    %142 = math.tanh %141 : vector<9x512xf32>
    %cst_51 = arith.constant 1.000000e+00 : f32
    %143 = vector.broadcast %cst_51 : f32 to vector<9x512xf32>
    %144 = arith.addf %143, %142 : vector<9x512xf32>
    %cst_52 = arith.constant 5.000000e-01 : f32
    %145 = vector.broadcast %cst_52 : f32 to vector<9x512xf32>
    %146 = arith.mulf %145, %144 : vector<9x512xf32>
    %147 = arith.mulf %134, %146 : vector<9x512xf32>
    %148 = arith.truncf %147 : vector<9x512xf32> to vector<9x512xbf16>
    %c0_53 = arith.constant 0 : index
    %c0_54 = arith.constant 0 : index
    %149 = vector.load %arg13[%c0_53, %c0_54] : memref<512x128xbf16, #tpu.memory_space<vmem>>, vector<512x128xbf16>
    %cst_55 = arith.constant dense<0.000000e+00> : vector<9x128xf32>
    %150 = tpu.matmul %148, %149, %cst_55 {dimension_numbers = #tpu.dot_dimension_numbers<[1], [0], [0], [1], [0, 0, 1, 1], [], []>} : vector<9x512xbf16>, vector<512x128xbf16>, vector<9x128xf32> -> vector<9x128xf32>
    %151 = arith.addf %101, %150 : vector<9x128xf32>
    %c0_56 = arith.constant 0 : index
    %c0_57 = arith.constant 0 : index
    %152 = vector.load %arg14[%c0_56, %c0_57] : memref<1x128xbf16, #tpu.memory_space<vmem>>, vector<1x128xbf16>
    %153 = arith.extf %152 : vector<1x128xbf16> to vector<1x128xf32>
    %154 = vector.broadcast %153 : vector<1x128xf32> to vector<9x128xf32>
    %155 = arith.addf %151, %154 : vector<9x128xf32>
    %cst_58 = arith.constant dense<0.000000e+00> : vector<9xf32>
    %156 = vector.multi_reduction <add>, %155, %cst_58 [1] : vector<9x128xf32> to vector<9xf32>
    %157 = vector.shape_cast %156 : vector<9xf32> to vector<9x1xf32>
    %cst_59 = arith.constant 1.280000e+02 : f32
    %158 = vector.broadcast %cst_59 : f32 to vector<9x1xf32>
    %159 = arith.divf %157, %158 : vector<9x1xf32>
    %160 = vector.broadcast %159 : vector<9x1xf32> to vector<9x128xf32>
    %161 = arith.subf %155, %160 : vector<9x128xf32>
    %162 = arith.mulf %161, %161 : vector<9x128xf32>
    %cst_60 = arith.constant dense<0.000000e+00> : vector<9xf32>
    %163 = vector.multi_reduction <add>, %162, %cst_60 [1] : vector<9x128xf32> to vector<9xf32>
    %164 = vector.shape_cast %163 : vector<9xf32> to vector<9x1xf32>
    %cst_61 = arith.constant 1.280000e+02 : f32
    %165 = vector.broadcast %cst_61 : f32 to vector<9x1xf32>
    %166 = arith.divf %164, %165 : vector<9x1xf32>
    %167 = vector.broadcast %159 : vector<9x1xf32> to vector<9x128xf32>
    %168 = arith.subf %155, %167 : vector<9x128xf32>
    %cst_62 = arith.constant 9.99999974E-6 : f32
    %169 = vector.broadcast %cst_62 : f32 to vector<9x1xf32>
    %170 = arith.addf %166, %169 : vector<9x1xf32>
    %171 = math.rsqrt %170 : vector<9x1xf32>
    %172 = vector.broadcast %171 : vector<9x1xf32> to vector<9x128xf32>
    %173 = arith.mulf %168, %172 : vector<9x128xf32>
    %c0_63 = arith.constant 0 : index
    %c0_64 = arith.constant 0 : index
    %174 = vector.load %arg15[%c0_63, %c0_64] : memref<1x128xbf16, #tpu.memory_space<vmem>>, vector<1x128xbf16>
    %175 = arith.extf %174 : vector<1x128xbf16> to vector<1x128xf32>
    %176 = vector.broadcast %175 : vector<1x128xf32> to vector<9x128xf32>
    %177 = arith.mulf %173, %176 : vector<9x128xf32>
    %c0_65 = arith.constant 0 : index
    %c0_66 = arith.constant 0 : index
    %178 = vector.load %arg16[%c0_65, %c0_66] : memref<1x128xbf16, #tpu.memory_space<vmem>>, vector<1x128xbf16>
    %179 = arith.extf %178 : vector<1x128xbf16> to vector<1x128xf32>
    %180 = vector.broadcast %179 : vector<1x128xf32> to vector<9x128xf32>
    %181 = arith.addf %177, %180 : vector<9x128xf32>
    %182 = arith.truncf %181 : vector<9x128xf32> to vector<9x128xbf16>
    %c0_67 = arith.constant 0 : index
    %c0_68 = arith.constant 0 : index
    %c0_69 = arith.constant 0 : index
    %183 = vector.load %arg17[%c0_67, %c0_68, %c0_69] : memref<1x9x128xbf16, #tpu.memory_space<vmem>>, vector<1x9x128xbf16>
    %184 = vector.shape_cast %183 : vector<1x9x128xbf16> to vector<9x128xbf16>
    %185 = vector.shape_cast %182 : vector<9x128xbf16> to vector<1x9x128xbf16>
    tpu.vector_store %arg17[%c0_67, %c0_68, %c0_69], %185 {strides = array<i32>} : memref<1x9x128xbf16, #tpu.memory_space<vmem>>, vector<1x9x128xbf16>,
    return
  }
  func.func @transform_0(%arg0: i32) -> (i32, i32, i32) {
    %c0_i32 = arith.constant 0 : i32
    %c0_i32_0 = arith.constant 0 : i32
    %c0_i32_1 = arith.constant 0 : i32
    return %arg0, %c0_i32, %c0_i32_0 : i32, i32, i32
  }
  func.func @transform_1(%arg0: i32) -> (i32, i32, i32) {
    %c0_i32 = arith.constant 0 : i32
    %c0_i32_0 = arith.constant 0 : i32
    %c0_i32_1 = arith.constant 0 : i32
    return %arg0, %c0_i32, %c0_i32_0 : i32, i32, i32
  }
  func.func @transform_2(%arg0: i32) -> (i32, i32) {
    %c0_i32 = arith.constant 0 : i32
    %c0_i32_0 = arith.constant 0 : i32
    %c0_i32_1 = arith.constant 0 : i32
    return %c0_i32, %c0_i32_0 : i32, i32
  }
  func.func @transform_3(%arg0: i32) -> (i32, i32) {
    %c0_i32 = arith.constant 0 : i32
    %c0_i32_0 = arith.constant 0 : i32
    %c0_i32_1 = arith.constant 0 : i32
    return %c0_i32, %c0_i32_0 : i32, i32
  }
  func.func @transform_4(%arg0: i32) -> (i32, i32) {
    %c0_i32 = arith.constant 0 : i32
    %c0_i32_0 = arith.constant 0 : i32
    %c0_i32_1 = arith.constant 0 : i32
    return %c0_i32, %c0_i32_0 : i32, i32
  }
  func.func @transform_5(%arg0: i32) -> (i32, i32) {
    %c0_i32 = arith.constant 0 : i32
    %c0_i32_0 = arith.constant 0 : i32
    %c0_i32_1 = arith.constant 0 : i32
    return %c0_i32, %c0_i32_0 : i32, i32
  }
  func.func @transform_6(%arg0: i32) -> (i32, i32) {
    %c0_i32 = arith.constant 0 : i32
    %c0_i32_0 = arith.constant 0 : i32
    %c0_i32_1 = arith.constant 0 : i32
    return %c0_i32, %c0_i32_0 : i32, i32
  }
  func.func @transform_7(%arg0: i32) -> (i32, i32) {
    %c0_i32 = arith.constant 0 : i32
    %c0_i32_0 = arith.constant 0 : i32
    %c0_i32_1 = arith.constant 0 : i32
    return %c0_i32, %c0_i32_0 : i32, i32
  }
  func.func @transform_8(%arg0: i32) -> (i32, i32) {
    %c0_i32 = arith.constant 0 : i32
    %c0_i32_0 = arith.constant 0 : i32
    %c0_i32_1 = arith.constant 0 : i32
    return %c0_i32, %c0_i32_0 : i32, i32
  }
  func.func @transform_9(%arg0: i32) -> (i32, i32) {
    %c0_i32 = arith.constant 0 : i32
    %c0_i32_0 = arith.constant 0 : i32
    %c0_i32_1 = arith.constant 0 : i32
    return %c0_i32, %c0_i32_0 : i32, i32
  }
  func.func @transform_10(%arg0: i32) -> (i32, i32) {
    %c0_i32 = arith.constant 0 : i32
    %c0_i32_0 = arith.constant 0 : i32
    %c0_i32_1 = arith.constant 0 : i32
    return %c0_i32, %c0_i32_0 : i32, i32
  }
  func.func @transform_11(%arg0: i32) -> (i32, i32) {
    %c0_i32 = arith.constant 0 : i32
    %c0_i32_0 = arith.constant 0 : i32
    %c0_i32_1 = arith.constant 0 : i32
    return %c0_i32, %c0_i32_0 : i32, i32
  }
  func.func @transform_12(%arg0: i32) -> (i32, i32) {
    %c0_i32 = arith.constant 0 : i32
    %c0_i32_0 = arith.constant 0 : i32
    %c0_i32_1 = arith.constant 0 : i32
    return %c0_i32, %c0_i32_0 : i32, i32
  }
  func.func @transform_13(%arg0: i32) -> (i32, i32) {
    %c0_i32 = arith.constant 0 : i32
    %c0_i32_0 = arith.constant 0 : i32
    %c0_i32_1 = arith.constant 0 : i32
    return %c0_i32, %c0_i32_0 : i32, i32
  }
  func.func @transform_14(%arg0: i32) -> (i32, i32) {
    %c0_i32 = arith.constant 0 : i32
    %c0_i32_0 = arith.constant 0 : i32
    %c0_i32_1 = arith.constant 0 : i32
    return %c0_i32, %c0_i32_0 : i32, i32
  }
  func.func @transform_15(%arg0: i32) -> (i32, i32) {
    %c0_i32 = arith.constant 0 : i32
    %c0_i32_0 = arith.constant 0 : i32
    %c0_i32_1 = arith.constant 0 : i32
    return %c0_i32, %c0_i32_0 : i32, i32
  }
  func.func @transform_16(%arg0: i32) -> (i32, i32, i32) {
    %c0_i32 = arith.constant 0 : i32
    %c0_i32_0 = arith.constant 0 : i32
    %c0_i32_1 = arith.constant 0 : i32
    return %arg0, %c0_i32, %c0_i32_0 : i32, i32, i32
  }
}

module attributes {stable_mosaic.version = 11 : i64} {
  func.func @_layer_head_loss_kernel(%arg0: i32, %arg1: memref<1x9x128xbf16, #tpu.memory_space<vmem>>, %arg2: memref<1x1x9xi32, #tpu.memory_space<vmem>>, %arg3: memref<1x9x1xi32, #tpu.memory_space<vmem>>, %arg4: memref<1x128xbf16, #tpu.memory_space<vmem>>, %arg5: memref<1x128xbf16, #tpu.memory_space<vmem>>, %arg6: memref<128x384xbf16, #tpu.memory_space<vmem>>, %arg7: memref<1x384xbf16, #tpu.memory_space<vmem>>, %arg8: memref<128x128xbf16, #tpu.memory_space<vmem>>, %arg9: memref<1x128xbf16, #tpu.memory_space<vmem>>, %arg10: memref<1x128xbf16, #tpu.memory_space<vmem>>, %arg11: memref<1x128xbf16, #tpu.memory_space<vmem>>, %arg12: memref<128x512xbf16, #tpu.memory_space<vmem>>, %arg13: memref<1x512xbf16, #tpu.memory_space<vmem>>, %arg14: memref<512x128xbf16, #tpu.memory_space<vmem>>, %arg15: memref<1x128xbf16, #tpu.memory_space<vmem>>, %arg16: memref<1x128xbf16, #tpu.memory_space<vmem>>, %arg17: memref<1x128xbf16, #tpu.memory_space<vmem>>, %arg18: memref<128x256xbf16, #tpu.memory_space<vmem>>, %arg19: memref<1x256xbf16, #tpu.memory_space<vmem>>, %arg20: memref<1x9x256xbf16, #tpu.memory_space<vmem>>, %arg21: memref<1x1x128xf32, #tpu.memory_space<vmem>>) attributes {dimension_semantics = [#tpu.dimension_semantics<parallel>], iteration_bounds = array<i64: 2>, scalar_prefetch = 0 : i64, scratch_operands = 0 : i64, tpu.core_type = #tpu.core_type<tc>, window_params = [{transform_indices = @transform_0, window_bounds = array<i64: 1, 9, 128>}, {transform_indices = @transform_1, window_bounds = array<i64: 1, 1, 9>}, {transform_indices = @transform_2, window_bounds = array<i64: 1, 9, 1>}, {pipeline_mode = #tpu.pipeline_mode<synchronous>, transform_indices = @transform_3, window_bounds = array<i64: 1, 128>}, {pipeline_mode = #tpu.pipeline_mode<synchronous>, transform_indices = @transform_4, window_bounds = array<i64: 1, 128>}, {pipeline_mode = #tpu.pipeline_mode<synchronous>, transform_indices = @transform_5, window_bounds = array<i64: 128, 384>}, {pipeline_mode = #tpu.pipeline_mode<synchronous>, transform_indices = @transform_6, window_bounds = array<i64: 1, 384>}, {pipeline_mode = #tpu.pipeline_mode<synchronous>, transform_indices = @transform_7, window_bounds = array<i64: 128, 128>}, {pipeline_mode = #tpu.pipeline_mode<synchronous>, transform_indices = @transform_8, window_bounds = array<i64: 1, 128>}, {pipeline_mode = #tpu.pipeline_mode<synchronous>, transform_indices = @transform_9, window_bounds = array<i64: 1, 128>}, {pipeline_mode = #tpu.pipeline_mode<synchronous>, transform_indices = @transform_10, window_bounds = array<i64: 1, 128>}, {pipeline_mode = #tpu.pipeline_mode<synchronous>, transform_indices = @transform_11, window_bounds = array<i64: 128, 512>}, {pipeline_mode = #tpu.pipeline_mode<synchronous>, transform_indices = @transform_12, window_bounds = array<i64: 1, 512>}, {pipeline_mode = #tpu.pipeline_mode<synchronous>, transform_indices = @transform_13, window_bounds = array<i64: 512, 128>}, {pipeline_mode = #tpu.pipeline_mode<synchronous>, transform_indices = @transform_14, window_bounds = array<i64: 1, 128>}, {pipeline_mode = #tpu.pipeline_mode<synchronous>, transform_indices = @transform_15, window_bounds = array<i64: 1, 128>}, {pipeline_mode = #tpu.pipeline_mode<synchronous>, transform_indices = @transform_16, window_bounds = array<i64: 1, 128>}, {pipeline_mode = #tpu.pipeline_mode<synchronous>, transform_indices = @transform_17, window_bounds = array<i64: 128, 256>}, {pipeline_mode = #tpu.pipeline_mode<synchronous>, transform_indices = @transform_18, window_bounds = array<i64: 1, 256>}, {transform_indices = @transform_19, window_bounds = array<i64: 1, 9, 256>}, {transform_indices = @transform_20, window_bounds = array<i64: 1, 1, 128>}]} {
    %c0 = arith.constant 0 : index
    %c0_0 = arith.constant 0 : index
    %c0_1 = arith.constant 0 : index
    %0 = vector.load %arg1[%c0, %c0_0, %c0_1] : memref<1x9x128xbf16, #tpu.memory_space<vmem>>, vector<1x9x128xbf16>
    %1 = vector.shape_cast %0 : vector<1x9x128xbf16> to vector<9x128xbf16>
    %2 = arith.extf %1 : vector<9x128xbf16> to vector<9x128xf32>
    %cst = arith.constant dense<0.000000e+00> : vector<9xf32>
    %3 = vector.multi_reduction <add>, %2, %cst [1] : vector<9x128xf32> to vector<9xf32>
    %4 = vector.shape_cast %3 : vector<9xf32> to vector<9x1xf32>
    %cst_2 = arith.constant 1.280000e+02 : f32
    %5 = vector.broadcast %cst_2 : f32 to vector<9x1xf32>
    %6 = arith.divf %4, %5 : vector<9x1xf32>
    %7 = vector.broadcast %6 : vector<9x1xf32> to vector<9x128xf32>
    %8 = arith.subf %2, %7 : vector<9x128xf32>
    %9 = arith.mulf %8, %8 : vector<9x128xf32>
    %cst_3 = arith.constant dense<0.000000e+00> : vector<9xf32>
    %10 = vector.multi_reduction <add>, %9, %cst_3 [1] : vector<9x128xf32> to vector<9xf32>
    %11 = vector.shape_cast %10 : vector<9xf32> to vector<9x1xf32>
    %cst_4 = arith.constant 1.280000e+02 : f32
    %12 = vector.broadcast %cst_4 : f32 to vector<9x1xf32>
    %13 = arith.divf %11, %12 : vector<9x1xf32>
    %14 = vector.broadcast %6 : vector<9x1xf32> to vector<9x128xf32>
    %15 = arith.subf %2, %14 : vector<9x128xf32>
    %cst_5 = arith.constant 9.99999974E-6 : f32
    %16 = vector.broadcast %cst_5 : f32 to vector<9x1xf32>
    %17 = arith.addf %13, %16 : vector<9x1xf32>
    %18 = math.rsqrt %17 : vector<9x1xf32>
    %19 = vector.broadcast %18 : vector<9x1xf32> to vector<9x128xf32>
    %20 = arith.mulf %15, %19 : vector<9x128xf32>
    %c0_6 = arith.constant 0 : index
    %c0_7 = arith.constant 0 : index
    %21 = vector.load %arg4[%c0_6, %c0_7] : memref<1x128xbf16, #tpu.memory_space<vmem>>, vector<1x128xbf16>
    %22 = arith.extf %21 : vector<1x128xbf16> to vector<1x128xf32>
    %23 = vector.broadcast %22 : vector<1x128xf32> to vector<9x128xf32>
    %24 = arith.mulf %20, %23 : vector<9x128xf32>
    %c0_8 = arith.constant 0 : index
    %c0_9 = arith.constant 0 : index
    %25 = vector.load %arg5[%c0_8, %c0_9] : memref<1x128xbf16, #tpu.memory_space<vmem>>, vector<1x128xbf16>
    %26 = arith.extf %25 : vector<1x128xbf16> to vector<1x128xf32>
    %27 = vector.broadcast %26 : vector<1x128xf32> to vector<9x128xf32>
    %28 = arith.addf %24, %27 : vector<9x128xf32>
    %29 = arith.truncf %28 : vector<9x128xf32> to vector<9x128xbf16>
    %c0_10 = arith.constant 0 : index
    %c0_11 = arith.constant 0 : index
    %30 = vector.load %arg6[%c0_10, %c0_11] : memref<128x384xbf16, #tpu.memory_space<vmem>>, vector<128x384xbf16>
    %cst_12 = arith.constant dense<0.000000e+00> : vector<9x384xf32>
    %31 = tpu.matmul %29, %30, %cst_12 {dimension_numbers = #tpu.dot_dimension_numbers<[1], [0], [0], [1], [0, 0, 1, 1], [], []>} : vector<9x128xbf16>, vector<128x384xbf16>, vector<9x384xf32> -> vector<9x384xf32>
    %c0_13 = arith.constant 0 : index
    %c0_14 = arith.constant 0 : index
    %32 = vector.load %arg7[%c0_13, %c0_14] : memref<1x384xbf16, #tpu.memory_space<vmem>>, vector<1x384xbf16>
    %33 = arith.extf %32 : vector<1x384xbf16> to vector<1x384xf32>
    %34 = vector.broadcast %33 : vector<1x384xf32> to vector<9x384xf32>
    %35 = arith.addf %31, %34 : vector<9x384xf32>
    %c0_15 = arith.constant 0 : index
    %c0_16 = arith.constant 0 : index
    %c0_17 = arith.constant 0 : index
    %36 = vector.load %arg2[%c0_15, %c0_16, %c0_17] : memref<1x1x9xi32, #tpu.memory_space<vmem>>, vector<1x1x9xi32>
    %37 = vector.shape_cast %36 : vector<1x1x9xi32> to vector<1x9xi32>
    %c0_i32 = arith.constant 0 : i32
    %38 = vector.broadcast %c0_i32 : i32 to vector<1x9xi32>
    %39 = arith.cmpi sgt, %37, %38 : vector<1x9xi32>
    %40 = vector.shape_cast %39 : vector<1x9xi1> to vector<1x9xi1>
    %41 = vector.broadcast %40 : vector<1x9xi1> to vector<9x9xi1>
    %42 = tpu.iota {dimensions = array<i32: 0>} : vector<9x9xi32>
    %43 = tpu.iota {dimensions = array<i32: 1>} : vector<9x9xi32>
    %44 = arith.cmpi sle, %43, %42 : vector<9x9xi32>
    %45 = arith.andi %41, %44 : vector<9x9xi1>
    %cst_18 = arith.constant 0.000000e+00 : f32
    %cst_19 = arith.constant -1.000000e+09 : f32
    %46 = vector.broadcast %cst_18 : f32 to vector<9x9xf32>
    %47 = vector.broadcast %cst_19 : f32 to vector<9x9xf32>
    %48 = arith.select %45, %46, %47 : vector<9x9xi1>, vector<9x9xf32>
    %49 = vector.extract_strided_slice %35 {offsets = [0, 0], sizes = [9, 64], strides = [1, 1]} : vector<9x384xf32> to vector<9x64xf32>
    %50 = arith.truncf %49 : vector<9x64xf32> to vector<9x64xbf16>
    %51 = vector.extract_strided_slice %35 {offsets = [0, 128], sizes = [9, 64], strides = [1, 1]} : vector<9x384xf32> to vector<9x64xf32>
    %52 = arith.truncf %51 : vector<9x64xf32> to vector<9x64xbf16>
    %53 = vector.extract_strided_slice %35 {offsets = [0, 256], sizes = [9, 64], strides = [1, 1]} : vector<9x384xf32> to vector<9x64xf32>
    %54 = arith.truncf %53 : vector<9x64xf32> to vector<9x64xbf16>
    %cst_20 = arith.constant dense<0.000000e+00> : vector<9x9xf32>
    %55 = tpu.matmul %50, %52, %cst_20 {dimension_numbers = #tpu.dot_dimension_numbers<[1], [1], [0], [0], [0, 0, 1, 0], [], []>} : vector<9x64xbf16>, vector<9x64xbf16>, vector<9x9xf32> -> vector<9x9xf32>
    %cst_21 = arith.constant 1.250000e-01 : f32
    %56 = vector.broadcast %cst_21 : f32 to vector<9x9xf32>
    %57 = arith.mulf %55, %56 : vector<9x9xf32>
    %58 = arith.addf %57, %48 : vector<9x9xf32>
    %cst_22 = arith.constant dense<0xFF800000> : vector<9xf32>
    %59 = vector.multi_reduction <maximumf>, %58, %cst_22 [1] : vector<9x9xf32> to vector<9xf32>
    %60 = vector.shape_cast %59 : vector<9xf32> to vector<9x1xf32>
    %61 = vector.broadcast %60 : vector<9x1xf32> to vector<9x9xf32>
    %62 = arith.subf %58, %61 : vector<9x9xf32>
    %63 = math.exp %62 : vector<9x9xf32>
    %cst_23 = arith.constant dense<0.000000e+00> : vector<9xf32>
    %64 = vector.multi_reduction <add>, %63, %cst_23 [1] : vector<9x9xf32> to vector<9xf32>
    %65 = vector.shape_cast %64 : vector<9xf32> to vector<9x1xf32>
    %66 = tpu.reciprocal %65 {approx = true} : vector<9x1xf32> -> vector<9x1xf32>
    %67 = vector.broadcast %66 : vector<9x1xf32> to vector<9x9xf32>
    %68 = arith.mulf %63, %67 : vector<9x9xf32>
    %69 = arith.truncf %68 : vector<9x9xf32> to vector<9x9xbf16>
    %cst_24 = arith.constant dense<0.000000e+00> : vector<9x64xf32>
    %70 = tpu.matmul %69, %54, %cst_24 {dimension_numbers = #tpu.dot_dimension_numbers<[1], [0], [0], [1], [0, 0, 1, 1], [], []>} : vector<9x9xbf16>, vector<9x64xbf16>, vector<9x64xf32> -> vector<9x64xf32>
    %71 = vector.extract_strided_slice %35 {offsets = [0, 64], sizes = [9, 64], strides = [1, 1]} : vector<9x384xf32> to vector<9x64xf32>
    %72 = arith.truncf %71 : vector<9x64xf32> to vector<9x64xbf16>
    %73 = vector.extract_strided_slice %35 {offsets = [0, 192], sizes = [9, 64], strides = [1, 1]} : vector<9x384xf32> to vector<9x64xf32>
    %74 = arith.truncf %73 : vector<9x64xf32> to vector<9x64xbf16>
    %75 = vector.extract_strided_slice %35 {offsets = [0, 320], sizes = [9, 64], strides = [1, 1]} : vector<9x384xf32> to vector<9x64xf32>
    %76 = arith.truncf %75 : vector<9x64xf32> to vector<9x64xbf16>
    %cst_25 = arith.constant dense<0.000000e+00> : vector<9x9xf32>
    %77 = tpu.matmul %72, %74, %cst_25 {dimension_numbers = #tpu.dot_dimension_numbers<[1], [1], [0], [0], [0, 0, 1, 0], [], []>} : vector<9x64xbf16>, vector<9x64xbf16>, vector<9x9xf32> -> vector<9x9xf32>
    %cst_26 = arith.constant 1.250000e-01 : f32
    %78 = vector.broadcast %cst_26 : f32 to vector<9x9xf32>
    %79 = arith.mulf %77, %78 : vector<9x9xf32>
    %80 = arith.addf %79, %48 : vector<9x9xf32>
    %cst_27 = arith.constant dense<0xFF800000> : vector<9xf32>
    %81 = vector.multi_reduction <maximumf>, %80, %cst_27 [1] : vector<9x9xf32> to vector<9xf32>
    %82 = vector.shape_cast %81 : vector<9xf32> to vector<9x1xf32>
    %83 = vector.broadcast %82 : vector<9x1xf32> to vector<9x9xf32>
    %84 = arith.subf %80, %83 : vector<9x9xf32>
    %85 = math.exp %84 : vector<9x9xf32>
    %cst_28 = arith.constant dense<0.000000e+00> : vector<9xf32>
    %86 = vector.multi_reduction <add>, %85, %cst_28 [1] : vector<9x9xf32> to vector<9xf32>
    %87 = vector.shape_cast %86 : vector<9xf32> to vector<9x1xf32>
    %88 = tpu.reciprocal %87 {approx = true} : vector<9x1xf32> -> vector<9x1xf32>
    %89 = vector.broadcast %88 : vector<9x1xf32> to vector<9x9xf32>
    %90 = arith.mulf %85, %89 : vector<9x9xf32>
    %91 = arith.truncf %90 : vector<9x9xf32> to vector<9x9xbf16>
    %cst_29 = arith.constant dense<0.000000e+00> : vector<9x64xf32>
    %92 = tpu.matmul %91, %76, %cst_29 {dimension_numbers = #tpu.dot_dimension_numbers<[1], [0], [0], [1], [0, 0, 1, 1], [], []>} : vector<9x9xbf16>, vector<9x64xbf16>, vector<9x64xf32> -> vector<9x64xf32>
    %93 = tpu.concatenate %70, %92 in 1 : vector<9x64xf32>, vector<9x64xf32> -> vector<9x128xf32>
    %94 = arith.truncf %93 : vector<9x128xf32> to vector<9x128xbf16>
    %c0_30 = arith.constant 0 : index
    %c0_31 = arith.constant 0 : index
    %95 = vector.load %arg8[%c0_30, %c0_31] : memref<128x128xbf16, #tpu.memory_space<vmem>>, vector<128x128xbf16>
    %cst_32 = arith.constant dense<0.000000e+00> : vector<9x128xf32>
    %96 = tpu.matmul %94, %95, %cst_32 {dimension_numbers = #tpu.dot_dimension_numbers<[1], [0], [0], [1], [0, 0, 1, 1], [], []>} : vector<9x128xbf16>, vector<128x128xbf16>, vector<9x128xf32> -> vector<9x128xf32>
    %c0_33 = arith.constant 0 : index
    %c0_34 = arith.constant 0 : index
    %97 = vector.load %arg9[%c0_33, %c0_34] : memref<1x128xbf16, #tpu.memory_space<vmem>>, vector<1x128xbf16>
    %98 = arith.extf %97 : vector<1x128xbf16> to vector<1x128xf32>
    %99 = vector.broadcast %98 : vector<1x128xf32> to vector<9x128xf32>
    %100 = arith.addf %96, %99 : vector<9x128xf32>
    %101 = arith.addf %2, %100 : vector<9x128xf32>
    %cst_35 = arith.constant dense<0.000000e+00> : vector<9xf32>
    %102 = vector.multi_reduction <add>, %101, %cst_35 [1] : vector<9x128xf32> to vector<9xf32>
    %103 = vector.shape_cast %102 : vector<9xf32> to vector<9x1xf32>
    %cst_36 = arith.constant 1.280000e+02 : f32
    %104 = vector.broadcast %cst_36 : f32 to vector<9x1xf32>
    %105 = arith.divf %103, %104 : vector<9x1xf32>
    %106 = vector.broadcast %105 : vector<9x1xf32> to vector<9x128xf32>
    %107 = arith.subf %101, %106 : vector<9x128xf32>
    %108 = arith.mulf %107, %107 : vector<9x128xf32>
    %cst_37 = arith.constant dense<0.000000e+00> : vector<9xf32>
    %109 = vector.multi_reduction <add>, %108, %cst_37 [1] : vector<9x128xf32> to vector<9xf32>
    %110 = vector.shape_cast %109 : vector<9xf32> to vector<9x1xf32>
    %cst_38 = arith.constant 1.280000e+02 : f32
    %111 = vector.broadcast %cst_38 : f32 to vector<9x1xf32>
    %112 = arith.divf %110, %111 : vector<9x1xf32>
    %113 = vector.broadcast %105 : vector<9x1xf32> to vector<9x128xf32>
    %114 = arith.subf %101, %113 : vector<9x128xf32>
    %cst_39 = arith.constant 9.99999974E-6 : f32
    %115 = vector.broadcast %cst_39 : f32 to vector<9x1xf32>
    %116 = arith.addf %112, %115 : vector<9x1xf32>
    %117 = math.rsqrt %116 : vector<9x1xf32>
    %118 = vector.broadcast %117 : vector<9x1xf32> to vector<9x128xf32>
    %119 = arith.mulf %114, %118 : vector<9x128xf32>
    %c0_40 = arith.constant 0 : index
    %c0_41 = arith.constant 0 : index
    %120 = vector.load %arg10[%c0_40, %c0_41] : memref<1x128xbf16, #tpu.memory_space<vmem>>, vector<1x128xbf16>
    %121 = arith.extf %120 : vector<1x128xbf16> to vector<1x128xf32>
    %122 = vector.broadcast %121 : vector<1x128xf32> to vector<9x128xf32>
    %123 = arith.mulf %119, %122 : vector<9x128xf32>
    %c0_42 = arith.constant 0 : index
    %c0_43 = arith.constant 0 : index
    %124 = vector.load %arg11[%c0_42, %c0_43] : memref<1x128xbf16, #tpu.memory_space<vmem>>, vector<1x128xbf16>
    %125 = arith.extf %124 : vector<1x128xbf16> to vector<1x128xf32>
    %126 = vector.broadcast %125 : vector<1x128xf32> to vector<9x128xf32>
    %127 = arith.addf %123, %126 : vector<9x128xf32>
    %128 = arith.truncf %127 : vector<9x128xf32> to vector<9x128xbf16>
    %c0_44 = arith.constant 0 : index
    %c0_45 = arith.constant 0 : index
    %129 = vector.load %arg12[%c0_44, %c0_45] : memref<128x512xbf16, #tpu.memory_space<vmem>>, vector<128x512xbf16>
    %cst_46 = arith.constant dense<0.000000e+00> : vector<9x512xf32>
    %130 = tpu.matmul %128, %129, %cst_46 {dimension_numbers = #tpu.dot_dimension_numbers<[1], [0], [0], [1], [0, 0, 1, 1], [], []>} : vector<9x128xbf16>, vector<128x512xbf16>, vector<9x512xf32> -> vector<9x512xf32>
    %c0_47 = arith.constant 0 : index
    %c0_48 = arith.constant 0 : index
    %131 = vector.load %arg13[%c0_47, %c0_48] : memref<1x512xbf16, #tpu.memory_space<vmem>>, vector<1x512xbf16>
    %132 = arith.extf %131 : vector<1x512xbf16> to vector<1x512xf32>
    %133 = vector.broadcast %132 : vector<1x512xf32> to vector<9x512xf32>
    %134 = arith.addf %130, %133 : vector<9x512xf32>
    %135 = arith.mulf %134, %134 : vector<9x512xf32>
    %136 = arith.mulf %134, %135 : vector<9x512xf32>
    %cst_49 = arith.constant 4.471500e-02 : f32
    %137 = vector.broadcast %cst_49 : f32 to vector<9x512xf32>
    %138 = arith.mulf %137, %136 : vector<9x512xf32>
    %139 = arith.addf %134, %138 : vector<9x512xf32>
    %cst_50 = arith.constant 0.797884583 : f32
    %140 = vector.broadcast %cst_50 : f32 to vector<9x512xf32>
    %141 = arith.mulf %140, %139 : vector<9x512xf32>
    %142 = math.tanh %141 : vector<9x512xf32>
    %cst_51 = arith.constant 1.000000e+00 : f32
    %143 = vector.broadcast %cst_51 : f32 to vector<9x512xf32>
    %144 = arith.addf %143, %142 : vector<9x512xf32>
    %cst_52 = arith.constant 5.000000e-01 : f32
    %145 = vector.broadcast %cst_52 : f32 to vector<9x512xf32>
    %146 = arith.mulf %145, %144 : vector<9x512xf32>
    %147 = arith.mulf %134, %146 : vector<9x512xf32>
    %148 = arith.truncf %147 : vector<9x512xf32> to vector<9x512xbf16>
    %c0_53 = arith.constant 0 : index
    %c0_54 = arith.constant 0 : index
    %149 = vector.load %arg14[%c0_53, %c0_54] : memref<512x128xbf16, #tpu.memory_space<vmem>>, vector<512x128xbf16>
    %cst_55 = arith.constant dense<0.000000e+00> : vector<9x128xf32>
    %150 = tpu.matmul %148, %149, %cst_55 {dimension_numbers = #tpu.dot_dimension_numbers<[1], [0], [0], [1], [0, 0, 1, 1], [], []>} : vector<9x512xbf16>, vector<512x128xbf16>, vector<9x128xf32> -> vector<9x128xf32>
    %151 = arith.addf %101, %150 : vector<9x128xf32>
    %c0_56 = arith.constant 0 : index
    %c0_57 = arith.constant 0 : index
    %152 = vector.load %arg15[%c0_56, %c0_57] : memref<1x128xbf16, #tpu.memory_space<vmem>>, vector<1x128xbf16>
    %153 = arith.extf %152 : vector<1x128xbf16> to vector<1x128xf32>
    %154 = vector.broadcast %153 : vector<1x128xf32> to vector<9x128xf32>
    %155 = arith.addf %151, %154 : vector<9x128xf32>
    %cst_58 = arith.constant dense<0.000000e+00> : vector<9xf32>
    %156 = vector.multi_reduction <add>, %155, %cst_58 [1] : vector<9x128xf32> to vector<9xf32>
    %157 = vector.shape_cast %156 : vector<9xf32> to vector<9x1xf32>
    %cst_59 = arith.constant 1.280000e+02 : f32
    %158 = vector.broadcast %cst_59 : f32 to vector<9x1xf32>
    %159 = arith.divf %157, %158 : vector<9x1xf32>
    %160 = vector.broadcast %159 : vector<9x1xf32> to vector<9x128xf32>
    %161 = arith.subf %155, %160 : vector<9x128xf32>
    %162 = arith.mulf %161, %161 : vector<9x128xf32>
    %cst_60 = arith.constant dense<0.000000e+00> : vector<9xf32>
    %163 = vector.multi_reduction <add>, %162, %cst_60 [1] : vector<9x128xf32> to vector<9xf32>
    %164 = vector.shape_cast %163 : vector<9xf32> to vector<9x1xf32>
    %cst_61 = arith.constant 1.280000e+02 : f32
    %165 = vector.broadcast %cst_61 : f32 to vector<9x1xf32>
    %166 = arith.divf %164, %165 : vector<9x1xf32>
    %167 = vector.broadcast %159 : vector<9x1xf32> to vector<9x128xf32>
    %168 = arith.subf %155, %167 : vector<9x128xf32>
    %cst_62 = arith.constant 9.99999974E-6 : f32
    %169 = vector.broadcast %cst_62 : f32 to vector<9x1xf32>
    %170 = arith.addf %166, %169 : vector<9x1xf32>
    %171 = math.rsqrt %170 : vector<9x1xf32>
    %172 = vector.broadcast %171 : vector<9x1xf32> to vector<9x128xf32>
    %173 = arith.mulf %168, %172 : vector<9x128xf32>
    %c0_63 = arith.constant 0 : index
    %c0_64 = arith.constant 0 : index
    %174 = vector.load %arg16[%c0_63, %c0_64] : memref<1x128xbf16, #tpu.memory_space<vmem>>, vector<1x128xbf16>
    %175 = arith.extf %174 : vector<1x128xbf16> to vector<1x128xf32>
    %176 = vector.broadcast %175 : vector<1x128xf32> to vector<9x128xf32>
    %177 = arith.mulf %173, %176 : vector<9x128xf32>
    %c0_65 = arith.constant 0 : index
    %c0_66 = arith.constant 0 : index
    %178 = vector.load %arg17[%c0_65, %c0_66] : memref<1x128xbf16, #tpu.memory_space<vmem>>, vector<1x128xbf16>
    %179 = arith.extf %178 : vector<1x128xbf16> to vector<1x128xf32>
    %180 = vector.broadcast %179 : vector<1x128xf32> to vector<9x128xf32>
    %181 = arith.addf %177, %180 : vector<9x128xf32>
    %182 = arith.truncf %181 : vector<9x128xf32> to vector<9x128xbf16>
    %c0_67 = arith.constant 0 : index
    %c0_68 = arith.constant 0 : index
    %183 = vector.load %arg18[%c0_67, %c0_68] : memref<128x256xbf16, #tpu.memory_space<vmem>>, vector<128x256xbf16>
    %cst_69 = arith.constant dense<0.000000e+00> : vector<9x256xf32>
    %184 = tpu.matmul %182, %183, %cst_69 {dimension_numbers = #tpu.dot_dimension_numbers<[1], [0], [0], [1], [0, 0, 1, 1], [], []>} : vector<9x128xbf16>, vector<128x256xbf16>, vector<9x256xf32> -> vector<9x256xf32>
    %c0_70 = arith.constant 0 : index
    %c0_71 = arith.constant 0 : index
    %185 = vector.load %arg19[%c0_70, %c0_71] : memref<1x256xbf16, #tpu.memory_space<vmem>>, vector<1x256xbf16>
    %186 = arith.extf %185 : vector<1x256xbf16> to vector<1x256xf32>
    %187 = vector.broadcast %186 : vector<1x256xf32> to vector<9x256xf32>
    %188 = arith.addf %184, %187 : vector<9x256xf32>
    %189 = arith.truncf %188 : vector<9x256xf32> to vector<9x256xbf16>
    %c0_72 = arith.constant 0 : index
    %c0_73 = arith.constant 0 : index
    %c0_74 = arith.constant 0 : index
    %190 = vector.load %arg20[%c0_72, %c0_73, %c0_74] : memref<1x9x256xbf16, #tpu.memory_space<vmem>>, vector<1x9x256xbf16>
    %191 = vector.shape_cast %190 : vector<1x9x256xbf16> to vector<9x256xbf16>
    %192 = vector.shape_cast %189 : vector<9x256xbf16> to vector<1x9x256xbf16>
    tpu.vector_store %arg20[%c0_72, %c0_73, %c0_74], %192 {strides = array<i32>} : memref<1x9x256xbf16, #tpu.memory_space<vmem>>, vector<1x9x256xbf16>,
    %c0_75 = arith.constant 0 : index
    %c0_76 = arith.constant 0 : index
    %c0_77 = arith.constant 0 : index
    %193 = vector.load %arg3[%c0_75, %c0_76, %c0_77] : memref<1x9x1xi32, #tpu.memory_space<vmem>>, vector<1x9x1xi32>
    %194 = vector.shape_cast %193 : vector<1x9x1xi32> to vector<9x1xi32>
    %cst_78 = arith.constant dense<0xFF800000> : vector<9xf32>
    %195 = vector.multi_reduction <maximumf>, %188, %cst_78 [1] : vector<9x256xf32> to vector<9xf32>
    %196 = vector.shape_cast %195 : vector<9xf32> to vector<9x1xf32>
    %197 = vector.broadcast %196 : vector<9x1xf32> to vector<9x256xf32>
    %198 = arith.subf %188, %197 : vector<9x256xf32>
    %199 = math.exp %198 : vector<9x256xf32>
    %cst_79 = arith.constant dense<0.000000e+00> : vector<9xf32>
    %200 = vector.multi_reduction <add>, %199, %cst_79 [1] : vector<9x256xf32> to vector<9xf32>
    %201 = vector.shape_cast %200 : vector<9xf32> to vector<9x1xf32>
    %202 = math.log %201 : vector<9x1xf32>
    %203 = arith.addf %196, %202 : vector<9x1xf32>
    %204 = tpu.iota {dimensions = array<i32: 1>} : vector<9x256xi32>
    %205 = vector.broadcast %194 : vector<9x1xi32> to vector<9x256xi32>
    %206 = arith.cmpi eq, %204, %205 : vector<9x256xi32>
    %cst_80 = arith.constant 0.000000e+00 : f32
    %207 = vector.broadcast %cst_80 : f32 to vector<9x256xf32>
    %208 = arith.select %206, %188, %207 : vector<9x256xi1>, vector<9x256xf32>
    %cst_81 = arith.constant dense<0.000000e+00> : vector<9xf32>
    %209 = vector.multi_reduction <add>, %208, %cst_81 [1] : vector<9x256xf32> to vector<9xf32>
    %210 = vector.shape_cast %209 : vector<9xf32> to vector<9x1xf32>
    %c-100_i32 = arith.constant -100 : i32
    %211 = vector.broadcast %c-100_i32 : i32 to vector<9x1xi32>
    %212 = arith.cmpi ne, %194, %211 : vector<9x1xi32>
    %213 = arith.extui %212 : vector<9x1xi1> to vector<9x1xi32>
    %214 = arith.sitofp %213 : vector<9x1xi32> to vector<9x1xf32>
    %215 = arith.subf %203, %210 : vector<9x1xf32>
    %216 = arith.mulf %215, %214 : vector<9x1xf32>
    %217 = vector.shape_cast %216 : vector<9x1xf32> to vector<1x9x1xf32>
    %cst_82 = arith.constant dense<0.000000e+00> : vector<1xf32>
    %218 = vector.multi_reduction <add>, %217, %cst_82 [1, 2] : vector<1x9x1xf32> to vector<1xf32>
    %219 = vector.shape_cast %218 : vector<1xf32> to vector<1x1x1xf32>
    %220 = vector.extract %219[0, 0, 0] : f32 from vector<1x1x1xf32>
    %221 = vector.shape_cast %214 : vector<9x1xf32> to vector<1x9x1xf32>
    %cst_83 = arith.constant dense<0.000000e+00> : vector<1xf32>
    %222 = vector.multi_reduction <add>, %221, %cst_83 [1, 2] : vector<1x9x1xf32> to vector<1xf32>
    %223 = vector.shape_cast %222 : vector<1xf32> to vector<1x1x1xf32>
    %224 = vector.extract %223[0, 0, 0] : f32 from vector<1x1x1xf32>
    %225 = tpu.iota {dimensions = array<i32: 1>} : vector<1x128xi32>
    %c0_i32_84 = arith.constant 0 : i32
    %226 = vector.broadcast %c0_i32_84 : i32 to vector<1x128xi32>
    %227 = arith.cmpi eq, %225, %226 : vector<1x128xi32>
    %c1_i32 = arith.constant 1 : i32
    %228 = vector.broadcast %c1_i32 : i32 to vector<1x128xi32>
    %229 = arith.cmpi eq, %225, %228 : vector<1x128xi32>
    %cst_85 = arith.constant 0.000000e+00 : f32
    %230 = vector.broadcast %224 : f32 to vector<1x128xf32>
    %231 = vector.broadcast %cst_85 : f32 to vector<1x128xf32>
    %232 = arith.select %229, %230, %231 : vector<1x128xi1>, vector<1x128xf32>
    %233 = vector.broadcast %220 : f32 to vector<1x128xf32>
    %234 = arith.select %227, %233, %232 : vector<1x128xi1>, vector<1x128xf32>
    %c0_86 = arith.constant 0 : index
    %c0_87 = arith.constant 0 : index
    %c0_88 = arith.constant 0 : index
    %235 = vector.load %arg21[%c0_86, %c0_87, %c0_88] : memref<1x1x128xf32, #tpu.memory_space<vmem>>, vector<1x1x128xf32>
    %236 = vector.shape_cast %235 : vector<1x1x128xf32> to vector<1x128xf32>
    %237 = vector.shape_cast %234 : vector<1x128xf32> to vector<1x1x128xf32>
    tpu.vector_store %arg21[%c0_86, %c0_87, %c0_88], %237 {strides = array<i32>} : memref<1x1x128xf32, #tpu.memory_space<vmem>>, vector<1x1x128xf32>,
    return
  }
  func.func @transform_0(%arg0: i32) -> (i32, i32, i32) {
    %c0_i32 = arith.constant 0 : i32
    %c0_i32_0 = arith.constant 0 : i32
    %c0_i32_1 = arith.constant 0 : i32
    return %arg0, %c0_i32, %c0_i32_0 : i32, i32, i32
  }
  func.func @transform_1(%arg0: i32) -> (i32, i32, i32) {
    %c0_i32 = arith.constant 0 : i32
    %c0_i32_0 = arith.constant 0 : i32
    %c0_i32_1 = arith.constant 0 : i32
    return %arg0, %c0_i32, %c0_i32_0 : i32, i32, i32
  }
  func.func @transform_2(%arg0: i32) -> (i32, i32, i32) {
    %c0_i32 = arith.constant 0 : i32
    %c0_i32_0 = arith.constant 0 : i32
    %c0_i32_1 = arith.constant 0 : i32
    return %arg0, %c0_i32, %c0_i32_0 : i32, i32, i32
  }
  func.func @transform_3(%arg0: i32) -> (i32, i32) {
    %c0_i32 = arith.constant 0 : i32
    %c0_i32_0 = arith.constant 0 : i32
    %c0_i32_1 = arith.constant 0 : i32
    return %c0_i32, %c0_i32_0 : i32, i32
  }
  func.func @transform_4(%arg0: i32) -> (i32, i32) {
    %c0_i32 = arith.constant 0 : i32
    %c0_i32_0 = arith.constant 0 : i32
    %c0_i32_1 = arith.constant 0 : i32
    return %c0_i32, %c0_i32_0 : i32, i32
  }
  func.func @transform_5(%arg0: i32) -> (i32, i32) {
    %c0_i32 = arith.constant 0 : i32
    %c0_i32_0 = arith.constant 0 : i32
    %c0_i32_1 = arith.constant 0 : i32
    return %c0_i32, %c0_i32_0 : i32, i32
  }
  func.func @transform_6(%arg0: i32) -> (i32, i32) {
    %c0_i32 = arith.constant 0 : i32
    %c0_i32_0 = arith.constant 0 : i32
    %c0_i32_1 = arith.constant 0 : i32
    return %c0_i32, %c0_i32_0 : i32, i32
  }
  func.func @transform_7(%arg0: i32) -> (i32, i32) {
    %c0_i32 = arith.constant 0 : i32
    %c0_i32_0 = arith.constant 0 : i32
    %c0_i32_1 = arith.constant 0 : i32
    return %c0_i32, %c0_i32_0 : i32, i32
  }
  func.func @transform_8(%arg0: i32) -> (i32, i32) {
    %c0_i32 = arith.constant 0 : i32
    %c0_i32_0 = arith.constant 0 : i32
    %c0_i32_1 = arith.constant 0 : i32
    return %c0_i32, %c0_i32_0 : i32, i32
  }
  func.func @transform_9(%arg0: i32) -> (i32, i32) {
    %c0_i32 = arith.constant 0 : i32
    %c0_i32_0 = arith.constant 0 : i32
    %c0_i32_1 = arith.constant 0 : i32
    return %c0_i32, %c0_i32_0 : i32, i32
  }
  func.func @transform_10(%arg0: i32) -> (i32, i32) {
    %c0_i32 = arith.constant 0 : i32
    %c0_i32_0 = arith.constant 0 : i32
    %c0_i32_1 = arith.constant 0 : i32
    return %c0_i32, %c0_i32_0 : i32, i32
  }
  func.func @transform_11(%arg0: i32) -> (i32, i32) {
    %c0_i32 = arith.constant 0 : i32
    %c0_i32_0 = arith.constant 0 : i32
    %c0_i32_1 = arith.constant 0 : i32
    return %c0_i32, %c0_i32_0 : i32, i32
  }
  func.func @transform_12(%arg0: i32) -> (i32, i32) {
    %c0_i32 = arith.constant 0 : i32
    %c0_i32_0 = arith.constant 0 : i32
    %c0_i32_1 = arith.constant 0 : i32
    return %c0_i32, %c0_i32_0 : i32, i32
  }
  func.func @transform_13(%arg0: i32) -> (i32, i32) {
    %c0_i32 = arith.constant 0 : i32
    %c0_i32_0 = arith.constant 0 : i32
    %c0_i32_1 = arith.constant 0 : i32
    return %c0_i32, %c0_i32_0 : i32, i32
  }
  func.func @transform_14(%arg0: i32) -> (i32, i32) {
    %c0_i32 = arith.constant 0 : i32
    %c0_i32_0 = arith.constant 0 : i32
    %c0_i32_1 = arith.constant 0 : i32
    return %c0_i32, %c0_i32_0 : i32, i32
  }
  func.func @transform_15(%arg0: i32) -> (i32, i32) {
    %c0_i32 = arith.constant 0 : i32
    %c0_i32_0 = arith.constant 0 : i32
    %c0_i32_1 = arith.constant 0 : i32
    return %c0_i32, %c0_i32_0 : i32, i32
  }
  func.func @transform_16(%arg0: i32) -> (i32, i32) {
    %c0_i32 = arith.constant 0 : i32
    %c0_i32_0 = arith.constant 0 : i32
    %c0_i32_1 = arith.constant 0 : i32
    return %c0_i32, %c0_i32_0 : i32, i32
  }
  func.func @transform_17(%arg0: i32) -> (i32, i32) {
    %c0_i32 = arith.constant 0 : i32
    %c0_i32_0 = arith.constant 0 : i32
    %c0_i32_1 = arith.constant 0 : i32
    return %c0_i32, %c0_i32_0 : i32, i32
  }
  func.func @transform_18(%arg0: i32) -> (i32, i32) {
    %c0_i32 = arith.constant 0 : i32
    %c0_i32_0 = arith.constant 0 : i32
    %c0_i32_1 = arith.constant 0 : i32
    return %c0_i32, %c0_i32_0 : i32, i32
  }
  func.func @transform_19(%arg0: i32) -> (i32, i32, i32) {
    %c0_i32 = arith.constant 0 : i32
    %c0_i32_0 = arith.constant 0 : i32
    %c0_i32_1 = arith.constant 0 : i32
    return %arg0, %c0_i32, %c0_i32_0 : i32, i32, i32
  }
  func.func @transform_20(%arg0: i32) -> (i32, i32, i32) {
    %c0_i32 = arith.constant 0 : i32
    %c0_i32_0 = arith.constant 0 : i32
    %c0_i32_1 = arith.constant 0 : i32
    return %arg0, %c0_i32, %c0_i32_0 : i32, i32, i32
  }
}

</mosaic_0001>

<bundles_post_ra>
// kernel: compress_model_forward.2
= control target key start
LH: loop header
LB: loop body
LE: loop exit
PB: predicated region body
PF: predicated region fallthrough
CT: control target
= control target key end

     0   :  { %s2696_s21 = smov 0   ;;  %s3257_s0 = inlined_call_operand.vmem [shape: bf16[2,9,128], index: 0, kind: input, shape index: {}]   ;;  %s3258_s1 = inlined_call_operand.vmem [shape: s32[2,1,9], index: 1, kind: input, shape index: {}]   ;;  %s3259_s2 = inlined_call_operand.vmem [shape: bf16[1,128], index: 2, kind: input, shape index: {}]   ;;  %s3260_s3 = inlined_call_operand.vmem [shape: bf16[1,128], index: 3, kind: input, shape index: {}]   ;;  %s3261_s4 = inlined_call_operand.vmem [shape: bf16[128,384], index: 4, kind: input, shape index: {}]   ;;  %s3262_s5 = inlined_call_operand.vmem [shape: bf16[1,384], index: 5, kind: input, shape index: {}]   ;;  %s3263_s6 = inlined_call_operand.vmem [shape: bf16[128,128], index: 6, kind: input, shape index: {}]   ;;  %s3264_s7 = inlined_call_operand.vmem [shape: bf16[1,128], index: 7, kind: input, shape index: {}]   ;;  %s3265_s8 = inlined_call_operand.vmem [shape: bf16[1,128], index: 8, kind: input, shape index: {}]   ;;  %s3266_s9 = inlined_call_operand.vmem [shape: bf16[1,128], index: 9, kind: input, shape index: {}]   ;;  %s3267_s10 = inlined_call_operand.vmem [shape: bf16[128,512], index: 10, kind: input, shape index: {}]   ;;  %s3268_s11 = inlined_call_operand.vmem [shape: bf16[1,512], index: 11, kind: input, shape index: {}]   ;;  %s3269_s12 = inlined_call_operand.vmem [shape: bf16[512,128], index: 12, kind: input, shape index: {}]   ;;  %s3270_s13 = inlined_call_operand.vmem [shape: bf16[1,128], index: 13, kind: input, shape index: {}]   ;;  %s3271_s14 = inlined_call_operand.vmem [shape: bf16[1,128], index: 14, kind: input, shape index: {}]   ;;  %s3272_s15 = inlined_call_operand.vmem [shape: bf16[1,128], index: 15, kind: input, shape index: {}]   ;;  %s3273_s16 = inlined_call_operand.vmem [shape: bf16[2,9,128], index: 16, kind: output, shape index: {}]  }
   0x1   :  { %3274 = sst [smem:[#allocation2_spill]] %s3257_s0 }
   0x2 LB: > { %s2163_s22 = sadd.s32 4294967295, %s2603_s21   ;;  %p2167_p0 = scmp.ge.s32.totalorder %s2603_s21, 1  ;;  %s2603_s21 = sphi %s2696_s21, %s26_s21  }
   0x3   : > { %p470_p1 = scmp.lt.s32.totalorder %s2603_s21, 3 }
   0x5   : > { %p471_p2 = pnand %p2167_p0, %p470_p1 }
   0x6   : > { %p523_p3 = scmp.lt.s32.totalorder (!%p471_p2), %s2163_s22, 1  ;;  %s3275_s26 = sld [smem:[#allocation2_spill]] (!%p471_p2) }
   0x7   : > { %474 = sbr.rel (%p471_p2) target bundleno = 3169 (0xc61), region = 84  ;;  %s2610_s25 = smov (!%p471_p2), 64  }
   0xc   : > { %s3277_s22 = smov (!%p523_p3, %s2163_s22), 1  ;;  %vm543_vm0 = vcmask 1040384   ;;  %v2433_v5 = vld [vmem:[%s3261_s4 + $0xac] ss:$12 sps:$4 sm:$0xff]   ;;  %v2435_v6 = vld [vmem:[%s3261_s4 + $0xa8] ss:$12 sps:$4 sm:$0xff]   ;;  %v569_v46 = vlaneseq }
   0xd   : > { %s2276_s23 = sshll.u32 %s3277_s22, 3  ;;  %v2605_v7 = vmov 0.0   ;;  %v2436_v8 = vld [vmem:[%s3261_s4 + $0xb0] ss:$12 sps:$4 sm:$0xff]   ;;  %774 = vmatprep.subr.bf16.mxu0 %v2433_v5  ;;  %v2437_v18 = vld [vmem:[%s3261_s4 + $0x94] ss:$12 sps:$4 sm:$0xff]   ;;  %s530_s24 = scalar_lea.vmem %s3258_s1, %s3277_s22 }
   0xe   : > { %s527_s27 = scalar_lea.vmem %s3275_s26, %s2276_s23  ;;  %2350 = vmatprep.subr.bf16.mxu1 %v2605_v7  ;;  %775 = vmatpush1.bf16.msra.mxu0 %v2435_v6  ;;  %v2439_v19 = vld [vmem:[%s3261_s4 + $0x90] ss:$12 sps:$4 sm:$0xff]   ;;  %v2440_v20 = vld [vmem:[%s3261_s4 + $0x98] ss:$12 sps:$4 sm:$0xff]   ;;  %v2444_v23 = vld [vmem:[%s3261_s4 + $0x80] ss:$12 sps:$4 sm:$0xff]   ;;  %s535_s0 = scalar_lea.vmem %s3273_s16, %s2276_s23 }
   0xf   : > { %v538_v0 = vld [vmem:[%s527_s27 + $0x4] sm:$0x1]  ;;  %v537_v1 = vld [vmem:[%s527_s27] sm:$0xf]  ;;  %2351 = vmatpush3.bf16.msra.mxu1 %v2436_v8  ;;  %776 = vmatprep.subr.bf16.mxu0 %v2437_v18  ;;  %v2441_v21 = vld [vmem:[%s3261_s4 + $0x7c] ss:$12 sps:$4 sm:$0xff]  }
  0x10   : > { %v2712_v2 = vunpack.c.l.bf16 %v538_v0  ;;  %v2716_v4 = vunpack.c.l.bf16 %v537_v1  ;;  %2352 = vmatprep.subr.bf16.mxu1 %v2605_v7  ;;  %v2443_v22 = vld [vmem:[%s3261_s4 + $0x78] ss:$12 sps:$4 sm:$0xff]   ;;  %v2447_v25 = vld [vmem:[%s3261_s4 + $0x60] ss:$12 sps:$4 sm:$0xff]   ;;  %v2448_v26 = vld [vmem:[%s3261_s4 + $0x68] ss:$12 sps:$4 sm:$0xff]  }
  0x11   : > { %v2445_v24 = vld [vmem:[%s3261_s4 + $0x64] ss:$12 sps:$4 sm:$0xff]   ;;  %v2449_v27 = vld [vmem:[%s3261_s4 + $0x4c] ss:$12 sps:$4 sm:$0xff]   ;;  %v2451_v28 = vld [vmem:[%s3261_s4 + $0x48] ss:$12 sps:$4 sm:$0xff]  }
  0x12   : > { %v544_v3 = vsel %vm543_vm0, %v2712_v2, 0.0  ;;  %777 = vmatpush1.bf16.msra.mxu0 %v2439_v19  ;;  %v2452_v29 = vld [vmem:[%s3261_s4 + $0x50] ss:$12 sps:$4 sm:$0xff]   ;;  %v2453_v30 = vld [vmem:[%s3261_s4 + $0x34] ss:$12 sps:$4 sm:$0xff]   ;;  %v2606_v31 = vmov 0  }
  0x13   : > { %545 = vadd.xlane.f32.xlu0 %v544_v3  ;;  %2353 = vmatpush3.bf16.msra.mxu1 %v2440_v20  ;;  %vm2607_vm1 = vmmov 0   ;;  %v2455_v32 = vld [vmem:[%s3261_s4 + $0x30] ss:$12 sps:$4 sm:$0xff]   ;;  %v2456_v33 = vld [vmem:[%s3261_s4 + $0x38] ss:$12 sps:$4 sm:$0xff]   ;;  %v2816_v47 = vshrl.u32 %v569_v46, 7 }
  0x14   : > { %2354 = vmatprep.subr.bf16.mxu1 %v2605_v7  ;;  %778 = vmatprep.subr.bf16.mxu0 %v2441_v21  ;;  %v2457_v34 = vld [vmem:[%s3261_s4 + $0x1c] ss:$12 sps:$4 sm:$0xff]   ;;  %v2459_v35 = vld [vmem:[%s3261_s4 + $0x18] ss:$12 sps:$4 sm:$0xff]   ;;  %v2460_v36 = vld [vmem:[%s3261_s4 + $0x20] ss:$12 sps:$4 sm:$0xff]  }
  0x15   : > { %806 = vmatprep.mubr.bf16.mxu0 %v2606_v31  ;;  %2366 = vmatprep.mubr.msk.bf16.mxu1 %vm2607_vm1, %v2605_v7  ;;  %v2461_v37 = vld [vmem:[%s3261_s4 + $0x4] ss:$12 sps:$4 sm:$0xff]   ;;  %v2463_v38 = vld [vmem:[%s3261_s4] ss:$12 sps:$4 sm:$0xff]   ;;  %v2464_v39 = vld [vmem:[%s3261_s4 + $0x8] ss:$12 sps:$4 sm:$0xff]  }
  0x16   : > { %779 = vmatpush1.bf16.msra.mxu0 %v2443_v22  ;;  %v567_v48 = vld [vmem:[%s3259_s2] sm:$0x1]  ;;  %v2822_v50 = vsub.s32 0, %v2816_v47  ;;  %v625_v1 = vsub.s32 2, %v2816_v47  ;;  %v629_v8 = vsub.s32 4, %v2816_v47  ;;  %vm880_vm2 = vcmask 523264  }
  0x17   : > { %541 = vadd.xlane.f32.xlu0 %v2716_v4  ;;  %2355 = vmatpush3.bf16.msra.mxu1 %v2444_v23  ;;  %v568_v49 = vunpack.c.l.bf16 %v567_v48  ;;  %v575_v51 = vld [vmem:[%s3260_s3] sm:$0x1]  ;;  %vm960_vm3 = vcmask 1043456   ;;  %vm961_vm4 = vcmask 1044480   ;;  %vm932_vm11 = vcmask 72704  }
  0x18   : > { %2356 = vmatprep.subr.bf16.mxu1 %v2605_v7  ;;  %780 = vmatprep.subr.bf16.mxu0 %v2445_v24  ;;  %v576_v55 = vunpack.c.l.bf16 %v575_v51  ;;  %v616_v0 = vld [vmem:[%s3262_s5] sm:$0x7]  ;;  %vm936_vm12 = vcmask 65536   ;;  %vm2094_vm13 = vsmask.f32 256 }
  0x19   : > { %v572_v54 = vrot.slane %v568_v49, %v2822_v50  ;;  %v617_v3 = vunpack.c.l.bf16 %v616_v0  ;;  %vm2095_vm14 = vmand %vm543_vm0, %vm2094_vm13 }
  0x1a   : > { %781 = vmatpush1.bf16.msra.mxu0 %v2447_v25  ;;  %v580_v59 = vrot.slane %v576_v55, %v2822_v50 }
  0x1b   : > { %2357 = vmatpush3.bf16.msra.mxu1 %v2448_v26  ;;  %782 = vmatprep.subr.bf16.mxu0 %v2449_v27  ;;  %v626_v5 = vrot.slane %v617_v3, %v625_v1  ;;  %v622_v18 = vrot.slane %v617_v3, %v2822_v50  ;;  %v2608_v27 = vmov 65535  }
  0x1c   : > { %2358 = vmatprep.subr.bf16.mxu1 %v2605_v7 }
  0x1d   : > { %v637_v24 = vrot.slane %v622_v18, %v2822_v50 }
  0x1e   : > { %783 = vmatpush1.bf16.msra.mxu0 %v2451_v28  ;;  %v962_v28 = vsel %vm960_vm3, 4294967295, %v2608_v27 }
  0x1f   : > { %2359 = vmatpush3.bf16.msra.mxu1 %v2452_v29  ;;  %784 = vmatprep.subr.bf16.mxu0 %v2453_v30 }
  0x20   : > { %2360 = vmatprep.subr.bf16.mxu1 %v2605_v7 }
  0x22   : > { %785 = vmatpush1.bf16.msra.mxu0 %v2455_v32 }
  0x23   : > { %2361 = vmatpush3.bf16.msra.mxu1 %v2456_v33  ;;  %786 = vmatprep.subr.bf16.mxu0 %v2457_v34  ;;  %v2855_v33 = vsel %vm961_vm4, %v962_v28, 0 }
  0x24   : > { %2362 = vmatprep.subr.bf16.mxu1 %v2605_v7 }
  0x26   : > { %787 = vmatpush1.bf16.msra.mxu0 %v2459_v35 }
  0x27   : > { %2363 = vmatpush3.bf16.msra.mxu1 %v2460_v36  ;;  %788 = vmatprep.subr.bf16.mxu0 %v2461_v37  ;;  %v858_v36 = vld [vmem:[%s530_s24] sm:$0x1] }
  0x28   : > { %2364 = vmatprep.subr.bf16.mxu1 %v2605_v7  ;;  %vm859_vm5 = vcmp.gt.s32.totalorder %v858_v36, 0 }
  0x29   : > { %v860_v37 = vsel %vm859_vm5, 1, %v2606_v31 }
  0x2a   : > { %789 = vmatpush1.bf16.msra.mxu0 %v2463_v38  ;;  %v864_v38 = vrot.slane %v860_v37, %v2822_v50 }
  0x2b   : > { %2365 = vmatpush3.bf16.msra.mxu1 %v2464_v39  ;;  %2394 = vmatprep.subr.bf16.mxu0 %v2605_v7  ;;  %v870_v39 = vand.u32 127, %v569_v46 }
  0x2c   : > { %2370 = vmatprep.subr.bf16.mxu1 %v2605_v7  ;;  %vm865_vm6 = vcmp.eq.s32.totalorder %v864_v38, 1 }
  0x2d   : > { %vm871_vm7 = vcmp.le.s32.totalorder %v870_v39, %v2816_v47 }
  0x2e   : > { %vm873_vm8 = vmand %vm865_vm6, %vm871_vm7 }
  0x9c   : > { %v546_v9 = vpop.xlane.xlu0 %545 }
  0x9d   : > { %v549_v10 = vmul.f32 0.0078125, %v546_v9 }
  0x9f   : > { %v2731_v13 = vsub.f32 %v2712_v2, %v549_v10 }
  0xa0   : > { %v542_v11 = vpop.xlane.xlu0 %541 }
  0xa1   : > { %v548_v12 = vmul.f32 0.0078125, %v542_v11  ;;  %v553_v16 = vmul.f32 %v2731_v13, %v2731_v13 }
  0xa3   : > { %v2734_v14 = vsub.f32 %v2716_v4, %v548_v12  ;;  %v556_v17 = vsel %vm543_vm0, %v553_v16, 0.0  ;;  %v641_v12 = vrot.slane %v626_v5, %v2822_v50 }
  0xa5   : > { %v552_v15 = vmul.f32 %v2734_v14, %v2734_v14 }
  0xa7   : > { %554 = vadd.xlane.f32.xlu1 %v552_v15 }
  0xab   : > { %557 = vadd.xlane.f32.xlu1 %v556_v17 }
 0x130   : > { %v555_v40 = vpop.xlane.xlu1 %554 }
 0x131   : > { %v559_v41 = vmul.f32 0.0078125, %v555_v40  ;;  %v868_v40 = vadd.s32 8, %v2816_v47 }
 0x133   : > { %v561_v42 = vadd.f32 1e-05, %v559_v41  ;;  %vm872_vm9 = vcmp.le.s32.totalorder %v870_v39, %v868_v40 }
 0x134   : > { %v558_v43 = vpop.xlane.xlu1 %557  ;;  %vm874_vm10 = vmand %vm865_vm6, %vm872_vm9 }
 0x135   : > { %2553 = vrsqrt.f32 %v561_v42  ;;  %v560_v44 = vmul.f32 0.0078125, %v558_v43  ;;  %v2609_v42 = vmov -1e+09  }
 0x136   : > { %v875_v43 = vsel %vm873_vm8, 0.0, %v2609_v42  ;;  %v876_v51 = vsel %vm874_vm10, 0.0, %v2609_v42 }
 0x137   : > { %v562_v45 = vadd.f32 1e-05, %v560_v44 }
 0x139   : > { %2555 = vrsqrt.f32 %v562_v45 }
 0x142   : > { %v2554_v52 = vpop.eup %2553 }
 0x143   : > { %v565_v53 = vmul.f32 %v2554_v52, %v2734_v14 }
 0x145   : > { %v573_v58 = vmul.f32 %v572_v54, %v565_v53 }
 0x146   : > { %v2556_v56 = vpop.eup %2555 }
 0x147   : > { %v566_v57 = vmul.f32 %v2556_v56, %v2731_v13  ;;  %v581_v61 = vadd.f32 %v580_v59, %v573_v58  ;;  %v630_v13 = vrot.slane %v617_v3, %v629_v8 }
 0x149   : > { %v574_v60 = vmul.f32 %v572_v54, %v566_v57  ;;  %v645_v21 = vrot.slane %v630_v13, %v2822_v50 }
 0x14b   : > { %v582_v62 = vadd.f32 %v580_v59, %v574_v60 }
 0x14d   : > { %v583_v63 = vpack.c.bf16 %v582_v62, %v581_v61 }
 0x14f   : > { %807 = vmatmul.mubr.bf16.vlgmr.msra.gmra.mxu0 %v583_v63  ;;  %2367 = vmatmul.mubr.bf16.vlgmr.msra.gmra.mxu1 %v583_v63 }
 0x150   : > { %2372 = vmatprep.mubr.msk.bf16.mxu1 %vm2607_vm1, %v2605_v7  ;;  %2410 = vmatprep.mubr.msk.bf16.mxu0 %vm2607_vm1, %v2605_v7 }
 0x20f   : > { %v808_v6 = vpop.f32.mrf.mxu0  ;;  %v851_v9 = vpop.f32.mrf.mxu1 }
 0x210   : > { %v852_v26 = vadd.f32 %v851_v9, %v645_v21  ;;  %v809_v32 = vadd.f32 %v808_v6, %v637_v24 }
 0x211   : > { %v810_v10 = vpop.f32.mrf.mxu0  ;;  %v2368_v11 = vpop.f32.mrf.mxu1 }
 0x212   : > { %v811_v19 = vadd.f32 %v810_v10, %v641_v12 }
 0x213   : > { %v812_v14 = vpop.f32.mrf.mxu0  ;;  %v854_v15 = vpop.f32.mrf.mxu1 }
 0x214   : > { %v855_v23 = vadd.f32 %v854_v15, %v645_v21  ;;  %v813_v29 = vadd.f32 %v812_v14, %v637_v24 }
 0x215   : > { %v814_v16 = vpop.f32.mrf.mxu0  ;;  %v2369_v17 = vpop.f32.mrf.mxu1 }
 0x216   : > { %v815_v20 = vadd.f32 %v814_v16, %v641_v12  ;;  %v2853_v30 = vpack.c.bf16 %v855_v23, %v852_v26  ;;  %v877_v34 = vpack.c.bf16 %v813_v29, %v809_v32 }
 0x218   : > { %v2847_v22 = vpack.c.bf16 %v815_v20, %v811_v19  ;;  %v965_v35 = vand.u32 %v2855_v33, %v2853_v30 }
 0x21a   : > { %v885_v25 = vsel %vm880_vm2, %v2847_v22, 0 }
 0x21b   : > { %2371 = vmatpush3.bf16.xpose.msra.mxu1 %v885_v25 }
 0x21c   : > { %2376 = vmatprep.subr.bf16.mxu1 %v2605_v7 }
 0x222   : > { %2373 = vmatmul.mubr.msk.bf16.vlgmr.msra.gmra.mxu1 %vm880_vm2, %v877_v34 }
 0x223   : > { %2377 = vmatpush3.bf16.msra.mxu1 %v965_v35  ;;  %2378 = vmatprep.mubr.msk.bf16.mxu1 %vm2607_vm1, %v2605_v7 }
 0x224   : > { %2382 = vmatprep.subr.bf16.mxu1 %v2605_v7 }
 0x2e2   : > { %v921_v41 = vpop.f32.mrf.mxu1 }
 0x2e3   : > { %v928_v44 = vmul.f32 0.125, %v921_v41 }
 0x2e4   : > { %v2374_v45 = vpop.f32.mrf.mxu1 }
 0x2e5   : > { %v930_v48 = vadd.f32 %v928_v44, %v875_v43 }
 0x2e6   : > { %v924_v49 = vpop.f32.mrf.mxu1 }
 0x2e7   : > { %v929_v52 = vmul.f32 0.125, %v924_v49  ;;  %v933_v46 = vsel %vm932_vm11, %v930_v48, -inf }
 0x2e8   : > { %934 = vmax.xlane.f32.xlu0 %v933_v46  ;;  %v2375_v53 = vpop.f32.mrf.mxu1 }
 0x2e9   : > { %v931_v54 = vadd.f32 %v929_v52, %v876_v51 }
 0x2eb   : > { %v937_v55 = vsel %vm936_vm12, %v931_v54, -inf }
 0x2ec   : > { %938 = vmax.xlane.f32.xlu1 %v937_v55  ;;  %v2466_v55 = vld [vmem:[%s3263_s6 + $0x30] sm:$0xff]  }
 0x371   : > { %v935_v56 = vpop.xlane.xlu0 %934 }
 0x372   : > { %v940_v57 = vsub.f32 %v930_v48, %v935_v56  ;;  %v2468_v56 = vld [vmem:[%s3263_s6 + $0x20] sm:$0xff]  }
 0x374   : > { %v942_v58 = vmul.f32 1.442695, %v940_v57  ;;  %v2469_v57 = vld [vmem:[%s3263_s6 + $0x18] sm:$0xff]  }
 0x375   : > { %v939_v59 = vpop.xlane.xlu1 %938 }
 0x376   : > { %2557 = vpow2.f32 %v942_v58  ;;  %v941_v60 = vsub.f32 %v931_v54, %v939_v59  ;;  %v2470_v58 = vld [vmem:[%s3263_s6 + $0x10] sm:$0xff]   ;;  %v2471_v59 = vld [vmem:[%s3263_s6 + $0x8] sm:$0xff]  }
 0x378   : > { %v944_v61 = vmul.f32 1.442695, %v941_v60  ;;  %v2472_v60 = vld [vmem:[%s3263_s6] sm:$0xff]  }
 0x37a   : > { %2559 = vpow2.f32 %v944_v61 }
 0x383   : > { %v2558_v62 = vpop.eup %2557 }
 0x384   : > { %v946_v63 = vsel %vm932_vm11, %v2558_v62, 0.0 }
 0x385   : > { %947 = vadd.xlane.f32.xlu0 %v946_v63 }
 0x387   : > { %v2560_v0 = vpop.eup %2559 }
 0x388   : > { %v949_v3 = vsel %vm936_vm12, %v2560_v0, 0.0 }
 0x389   : > { %950 = vadd.xlane.f32.xlu1 %v949_v3 }
 0x39a   : > { %1009 = vrot.lane.b32.xlu1 %v877_v34, %s2610_s25 }
 0x39b   : > { %1012 = vrot.lane.b32.xlu0 %v2847_v22, %s2610_s25 }
 0x40e   : > { %v948_v5 = vpop.xlane.xlu0 %947 }
 0x40f   : > { %2561 = vrcp.f32 %v948_v5 }
 0x412   : > { %v951_v6 = vpop.xlane.xlu1 %950  ;;  %v1013_v13 = vpop.permute.xlu0 %1012 }
 0x413   : > { %2563 = vrcp.f32 %v951_v6  ;;  %v1018_v15 = vsel %vm880_vm2, %v1013_v13, 0 }
 0x416   : > { %v1010_v16 = vpop.permute.xlu1 %1009 }
 0x41c   : > { %v2562_v9 = vpop.eup %2561 }
 0x41d   : > { %v954_v11 = vmul.f32 %v2562_v9, %v2558_v62 }
 0x420   : > { %v2564_v10 = vpop.eup %2563 }
 0x421   : > { %v955_v12 = vmul.f32 %v2564_v10, %v2560_v0 }
 0x423   : > { %v956_v14 = vpack.c.bf16 %v955_v12, %v954_v11  ;;  %v1165_v12 = vld [vmem:[%s3264_s7] sm:$0x1] }
 0x424   : > { %v1166_v13 = vunpack.c.l.bf16 %v1165_v12 }
 0x425   : > { %2379 = vmatmul.mubr.msk.bf16.vlgmr.msra.gmra.mxu1 %vm932_vm11, %v956_v14 }
 0x426   : > { %2383 = vmatpush3.bf16.xpose.msra.mxu1 %v1018_v15  ;;  %2384 = vmatprep.mubr.msk.bf16.mxu1 %vm2607_vm1, %v2605_v7  ;;  %v1170_v14 = vrot.slane %v1166_v13, %v2822_v50 }
 0x427   : > { %2388 = vmatprep.subr.bf16.mxu1 %v2605_v7 }
 0x42d   : > { %2385 = vmatmul.mubr.msk.bf16.vlgmr.msra.gmra.mxu1 %vm880_vm2, %v1010_v16 }
 0x42e   : > { %2390 = vmatprep.mubr.msk.bf16.mxu1 %vm2607_vm1, %v2605_v7 }
 0x4e5   : > { %v2887_v17 = vpop.f32.mrf.mxu1 }
 0x4e7   : > { %v2380_v18 = vpop.f32.mrf.mxu1 }
 0x4e9   : > { %v2889_v19 = vpop.f32.mrf.mxu1 }
 0x4eb   : > { %v2381_v20 = vpop.f32.mrf.mxu1 }
 0x4ed   : > { %v1054_v21 = vpop.f32.mrf.mxu1 }
 0x4ee   : > { %v1061_v22 = vmul.f32 0.125, %v1054_v21 }
 0x4ef   : > { %v2386_v23 = vpop.f32.mrf.mxu1 }
 0x4f0   : > { %v1063_v24 = vadd.f32 %v1061_v22, %v875_v43 }
 0x4f1   : > { %v1057_v25 = vpop.f32.mrf.mxu1 }
 0x4f2   : > { %v1062_v26 = vmul.f32 0.125, %v1057_v25  ;;  %v1065_v27 = vsel %vm932_vm11, %v1063_v24, -inf }
 0x4f3   : > { %1066 = vmax.xlane.f32.xlu1 %v1065_v27  ;;  %v2387_v28 = vpop.f32.mrf.mxu1 }
 0x4f4   : > { %v1064_v29 = vadd.f32 %v1062_v26, %v876_v51 }
 0x4f6   : > { %v1068_v32 = vsel %vm936_vm12, %v1064_v29, -inf }
 0x4f7   : > { %1069 = vmax.xlane.f32.xlu0 %v1068_v32  ;;  %v2475_v32 = vld [vmem:[%s3267_s10 + $0xe4] ss:$16 sps:$4 sm:$0xff]  }
 0x57c   : > { %v1067_v34 = vpop.xlane.xlu1 %1066 }
 0x57d   : > { %v1071_v35 = vsub.f32 %v1063_v24, %v1067_v34  ;;  %v2478_v34 = vld [vmem:[%s3267_s10 + $0xec] ss:$16 sps:$4 sm:$0xff]  }
 0x57f   : > { %v1073_v36 = vmul.f32 1.442695, %v1071_v35  ;;  %v2473_v35 = vld [vmem:[%s3267_s10 + $0xe0] ss:$16 sps:$4 sm:$0xff]  }
 0x580   : > { %v1070_v37 = vpop.xlane.xlu0 %1069 }
 0x581   : > { %2565 = vpow2.f32 %v1073_v36  ;;  %v1072_v38 = vsub.f32 %v1064_v29, %v1070_v37  ;;  %v2476_v36 = vld [vmem:[%s3267_s10 + $0xe8] ss:$16 sps:$4 sm:$0xff]   ;;  %v2481_v37 = vld [vmem:[%s3267_s10 + $0xc4] ss:$16 sps:$4 sm:$0xff]  }
 0x583   : > { %v1075_v39 = vmul.f32 1.442695, %v1072_v38  ;;  %v2484_v38 = vld [vmem:[%s3267_s10 + $0xcc] ss:$16 sps:$4 sm:$0xff]  }
 0x585   : > { %2567 = vpow2.f32 %v1075_v39  ;;  %v2479_v39 = vld [vmem:[%s3267_s10 + $0xc0] ss:$16 sps:$4 sm:$0xff]  }
 0x58e   : > { %v2566_v40 = vpop.eup %2565 }
 0x58f   : > { %v1077_v41 = vsel %vm932_vm11, %v2566_v40, 0.0 }
 0x590   : > { %1078 = vadd.xlane.f32.xlu0 %v1077_v41  ;;  %v2487_v41 = vld [vmem:[%s3267_s10 + $0xa4] ss:$16 sps:$4 sm:$0xff]  }
 0x592   : > { %v2568_v42 = vpop.eup %2567 }
 0x593   : > { %v1080_v43 = vsel %vm936_vm12, %v2568_v42, 0.0 }
 0x594   : > { %1081 = vadd.xlane.f32.xlu1 %v1080_v43  ;;  %v2485_v43 = vld [vmem:[%s3267_s10 + $0xa0] ss:$16 sps:$4 sm:$0xff]  }
 0x5a6   : > { %1089 = vrot.lane.b32.xlu0 %v2853_v30, %s2610_s25  ;;  %v2465_v30 = vld [vmem:[%s3263_s6 + $0x38] sm:$0xff]  }
 0x5a7   : > { %2395 = vmatpush3.bf16.msra.mxu0 %v2465_v30  ;;  %v2505_v30 = vld [vmem:[%s3267_s10 + $0x44] ss:$16 sps:$4 sm:$0xff]  }
 0x5a8   : > { %2396 = vmatprep.subr.bf16.mxu0 %v2605_v7 }
 0x5ab   : > { %2397 = vmatpush3.bf16.msra.mxu0 %v2466_v55  ;;  %v2508_v55 = vld [vmem:[%s3267_s10 + $0x4c] ss:$16 sps:$4 sm:$0xff]  }
 0x5ac   : > { %2398 = vmatprep.subr.bf16.mxu0 %v2605_v7 }
 0x619   : > { %v1079_v44 = vpop.xlane.xlu0 %1078 }
 0x61a   : > { %2569 = vrcp.f32 %v1079_v44  ;;  %v2488_v44 = vld [vmem:[%s3267_s10 + $0xa8] ss:$16 sps:$4 sm:$0xff]  }
 0x61d   : > { %v1082_v45 = vpop.xlane.xlu1 %1081  ;;  %v1090_v48 = vpop.permute.xlu0 %1089 }
 0x61e   : > { %2571 = vrcp.f32 %v1082_v45  ;;  %v1095_v49 = vand.u32 %v1090_v48, %v2855_v33  ;;  %v2467_v33 = vld [vmem:[%s3263_s6 + $0x28] sm:$0xff]   ;;  %v2491_v45 = vld [vmem:[%s3267_s10 + $0x80] ss:$16 sps:$4 sm:$0xff]   ;;  %v2493_v48 = vld [vmem:[%s3267_s10 + $0x84] ss:$16 sps:$4 sm:$0xff]  }
 0x61f   : > { %2399 = vmatpush3.bf16.msra.mxu0 %v2467_v33  ;;  %v2503_v33 = vld [vmem:[%s3267_s10 + $0x40] ss:$16 sps:$4 sm:$0xff]  }
 0x620   : > { %2389 = vmatpush3.bf16.msra.mxu1 %v1095_v49  ;;  %2400 = vmatprep.subr.bf16.mxu0 %v2605_v7  ;;  %v2494_v49 = vld [vmem:[%s3267_s10 + $0x88] ss:$16 sps:$4 sm:$0xff]  }
 0x621   : > { %1534 = vmatprep.subr.bf16.mxu1 %v2475_v32  ;;  %v2526_v32 = vld [vmem:[%s3269_s12 + $0xf0] sm:$0xff]  }
 0x623   : > { %2401 = vmatpush3.bf16.msra.mxu0 %v2468_v56  ;;  %v2506_v56 = vld [vmem:[%s3267_s10 + $0x48] ss:$16 sps:$4 sm:$0xff]  }
 0x624   : > { %2402 = vmatprep.subr.bf16.mxu0 %v2605_v7 }
 0x627   : > { %v2570_v51 = vpop.eup %2569  ;;  %2403 = vmatpush3.bf16.msra.mxu0 %v2469_v57  ;;  %v2511_v57 = vld [vmem:[%s3267_s10 + $0x24] ss:$16 sps:$4 sm:$0xff]  }
 0x628   : > { %v1085_v46 = vmul.f32 %v2570_v51, %v2566_v40  ;;  %2404 = vmatprep.subr.bf16.mxu0 %v2605_v7  ;;  %v2482_v40 = vld [vmem:[%s3267_s10 + $0xc8] ss:$16 sps:$4 sm:$0xff]   ;;  %v2496_v51 = vld [vmem:[%s3267_s10 + $0x8c] ss:$16 sps:$4 sm:$0xff]  }
 0x62b   : > { %v2572_v52 = vpop.eup %2571  ;;  %2405 = vmatpush3.bf16.msra.mxu0 %v2470_v58  ;;  %v2514_v58 = vld [vmem:[%s3267_s10 + $0x2c] ss:$16 sps:$4 sm:$0xff]  }
 0x62c   : > { %v1086_v53 = vmul.f32 %v2572_v52, %v2568_v42  ;;  %2406 = vmatprep.subr.bf16.mxu0 %v2605_v7  ;;  %v2490_v42 = vld [vmem:[%s3267_s10 + $0xac] ss:$16 sps:$4 sm:$0xff]   ;;  %v2499_v52 = vld [vmem:[%s3267_s10 + $0x64] ss:$16 sps:$4 sm:$0xff]  }
 0x62e   : > { %v1087_v54 = vpack.c.bf16 %v1086_v53, %v1085_v46  ;;  %v2502_v46 = vld [vmem:[%s3267_s10 + $0x6c] ss:$16 sps:$4 sm:$0xff]   ;;  %v2497_v53 = vld [vmem:[%s3267_s10 + $0x60] ss:$16 sps:$4 sm:$0xff]  }
 0x62f   : > { %2407 = vmatpush3.bf16.msra.mxu0 %v2471_v59  ;;  %v2509_v59 = vld [vmem:[%s3267_s10 + $0x20] ss:$16 sps:$4 sm:$0xff]  }
 0x630   : > { %2391 = vmatmul.mubr.msk.bf16.vlgmr.msra.gmra.mxu1 %vm932_vm11, %v1087_v54  ;;  %2408 = vmatprep.subr.bf16.mxu0 %v2605_v7  ;;  %v2500_v54 = vld [vmem:[%s3267_s10 + $0x68] ss:$16 sps:$4 sm:$0xff]  }
 0x631   : > { %1566 = vmatprep.mubr.bf16.mxu1 %v2606_v31  ;;  %1535 = vmatpush1.bf16.msra.mxu1 %v2473_v35  ;;  %v2528_v35 = vld [vmem:[%s3269_s12 + $0xb0] sm:$0xff]  }
 0x632   : > { %1536 = vmatprep.subr.bf16.mxu1 %v2481_v37  ;;  %v2530_v37 = vld [vmem:[%s3269_s12 + $0xe8] sm:$0xff]  }
 0x633   : > { %2409 = vmatpush3.bf16.msra.mxu0 %v2472_v60  ;;  %v2512_v60 = vld [vmem:[%s3267_s10 + $0x28] ss:$16 sps:$4 sm:$0xff]  }
 0x634   : > { %1577 = vmatprep.subr.bf16.mxu0 %v2478_v34  ;;  %v2527_v34 = vld [vmem:[%s3269_s12 + $0x30] sm:$0xff]  }
 0x635   : > { %1537 = vmatpush1.bf16.msra.mxu1 %v2479_v39  ;;  %v2532_v39 = vld [vmem:[%s3269_s12 + $0xa8] sm:$0xff]  }
 0x636   : > { %1538 = vmatprep.subr.bf16.mxu1 %v2487_v41  ;;  %v2534_v41 = vld [vmem:[%s3269_s12 + $0xe0] sm:$0xff]  }
 0x639   : > { %1539 = vmatpush1.bf16.msra.mxu1 %v2485_v43  ;;  %v2536_v43 = vld [vmem:[%s3269_s12 + $0xa0] sm:$0xff]  }
 0x63a   : > { %1540 = vmatprep.subr.bf16.mxu1 %v2493_v48  ;;  %v2539_v48 = vld [vmem:[%s3269_s12 + $0x18] sm:$0xff]  }
 0x63d   : > { %1541 = vmatpush1.bf16.msra.mxu1 %v2491_v45  ;;  %v2538_v45 = vld [vmem:[%s3269_s12 + $0xd8] sm:$0xff]  }
 0x63e   : > { %1542 = vmatprep.subr.bf16.mxu1 %v2499_v52  ;;  %v2542_v52 = vld [vmem:[%s3269_s12 + $0xd0] sm:$0xff]  }
 0x641   : > { %1543 = vmatpush1.bf16.msra.mxu1 %v2497_v53  ;;  %v2544_v53 = vld [vmem:[%s3269_s12 + $0x90] sm:$0xff]  }
 0x642   : > { %1544 = vmatprep.subr.bf16.mxu1 %v2505_v30  ;;  %v2546_v30 = vld [vmem:[%s3269_s12 + $0xc8] sm:$0xff]  }
 0x645   : > { %1545 = vmatpush1.bf16.msra.mxu1 %v2503_v33  ;;  %v2548_v33 = vld [vmem:[%s3269_s12 + $0x88] sm:$0xff]  }
 0x646   : > { %1546 = vmatprep.subr.bf16.mxu1 %v2511_v57  ;;  %v2550_v57 = vld [vmem:[%s3269_s12 + $0xc0] sm:$0xff]  }
 0x649   : > { %1547 = vmatpush1.bf16.msra.mxu1 %v2509_v59  ;;  %v2552_v59 = vld [vmem:[%s3269_s12 + $0x80] sm:$0xff]  }
 0x6f0   : > { %v1131_v61 = vpop.f32.mrf.mxu1 }
 0x6f2   : > { %v2392_v62 = vpop.f32.mrf.mxu1 }
 0x6f3   : > { %v2520_v62 = vld [vmem:[%s3267_s10 + $0xc] ss:$16 sps:$4 sm:$0xff]  }
 0x6f4   : > { %v1134_v63 = vpop.f32.mrf.mxu1 }
 0x6f5   : > { %v2428_v0 = vpack.i.bf16 %v1134_v63, %v1131_v61  ;;  %v2517_v61 = vld [vmem:[%s3267_s10 + $0x4] ss:$16 sps:$4 sm:$0xff]   ;;  %v2515_v63 = vld [vmem:[%s3267_s10] ss:$16 sps:$4 sm:$0xff]  }
 0x6f6   : > { %v2393_v3 = vpop.f32.mrf.mxu1  ;;  %1548 = vmatprep.subr.bf16.mxu1 %v2517_v61 }
 0x6f7   : > { %2429 = vrot.lane.b32.xlu1 %v2428_v0, %s2610_s25  ;;  %v2518_v0 = vld [vmem:[%s3267_s10 + $0x8] ss:$16 sps:$4 sm:$0xff]   ;;  %1549 = vmatpush1.bf16.msra.mxu1 %v2515_v63 }
 0x769   : > { %v2430_v5 = vpop.permute.xlu1 %2429 }
 0x76a   : > { %v2432_v6 = vunpack.i.h.bf16 %v2430_v5  ;;  %v2431_v9 = vunpack.i.l.bf16 %v2430_v5 }
 0x76c   : > { %v1147_v10 = vsel %vm880_vm2, %v2889_v19, %v2432_v6  ;;  %v1146_v7 = vsel %vm880_vm2, %v2887_v17, %v2431_v9 }
 0x76d   : > { %v1148_v11 = vpack.c.bf16 %v1147_v10, %v1146_v7 }
 0x76f   : > { %2411 = vmatmul.mubr.bf16.vlgmr.msra.gmra.mxu0 %v1148_v11  ;;  %v1286_v11 = vld [vmem:[%s3265_s8] sm:$0x1] }
 0x770   : > { %1609 = vmatprep.mubr.bf16.mxu0 %v2606_v31  ;;  %1578 = vmatpush1.bf16.msra.mxu0 %v2476_v36  ;;  %v1287_v12 = vunpack.c.l.bf16 %v1286_v11  ;;  %v2529_v36 = vld [vmem:[%s3269_s12 + $0x68] sm:$0xff]  }
 0x771   : > { %1579 = vmatprep.subr.bf16.mxu0 %v2484_v38  ;;  %v2531_v38 = vld [vmem:[%s3269_s12 + $0x28] sm:$0xff]  }
 0x774   : > { %1580 = vmatpush1.bf16.msra.mxu0 %v2482_v40  ;;  %v2533_v40 = vld [vmem:[%s3269_s12 + $0x60] sm:$0xff]  }
 0x775   : > { %1581 = vmatprep.subr.bf16.mxu0 %v2490_v42  ;;  %v2535_v42 = vld [vmem:[%s3269_s12 + $0x20] sm:$0xff]  }
 0x778   : > { %1582 = vmatpush1.bf16.msra.mxu0 %v2488_v44  ;;  %v2537_v44 = vld [vmem:[%s3269_s12 + $0x58] sm:$0xff]  }
 0x779   : > { %1583 = vmatprep.subr.bf16.mxu0 %v2496_v51  ;;  %v2541_v51 = vld [vmem:[%s3269_s12 + $0x50] sm:$0xff]  }
 0x77c   : > { %1584 = vmatpush1.bf16.msra.mxu0 %v2494_v49  ;;  %v2540_v49 = vld [vmem:[%s3269_s12 + $0x98] sm:$0xff]  }
 0x77d   : > { %1585 = vmatprep.subr.bf16.mxu0 %v2502_v46  ;;  %v2543_v46 = vld [vmem:[%s3269_s12 + $0x10] sm:$0xff]  }
 0x780   : > { %1586 = vmatpush1.bf16.msra.mxu0 %v2500_v54  ;;  %v2545_v54 = vld [vmem:[%s3269_s12 + $0x48] sm:$0xff]  }
 0x781   : > { %1587 = vmatprep.subr.bf16.mxu0 %v2508_v55  ;;  %v2547_v55 = vld [vmem:[%s3269_s12 + $0x8] sm:$0xff]  }
 0x784   : > { %1588 = vmatpush1.bf16.msra.mxu0 %v2506_v56  ;;  %v2549_v56 = vld [vmem:[%s3269_s12 + $0x40] sm:$0xff]  }
 0x785   : > { %1589 = vmatprep.subr.bf16.mxu0 %v2514_v58  ;;  %v2551_v58 = vld [vmem:[%s3269_s12] sm:$0xff]  }
 0x788   : > { %1590 = vmatpush1.bf16.msra.mxu0 %v2512_v60  ;;  %v1335_v60 = vld [vmem:[%s3268_s11] sm:$0xf] }
 0x789   : > { %1591 = vmatprep.subr.bf16.mxu0 %v2520_v62  ;;  %v1336_v61 = vunpack.c.l.bf16 %v1335_v60  ;;  %v1352_v62 = vsub.s32 6, %v2816_v47 }
 0x78b   : > { %v1341_v63 = vrot.slane %v1336_v61, %v2822_v50 }
 0x78c   : > { %1592 = vmatpush1.bf16.msra.mxu0 %v2518_v0  ;;  %v1349_v0 = vrot.slane %v1336_v61, %v629_v8 }
 0x82f   : > { %v1253_v15 = vpop.f32.mrf.mxu0 }
 0x830   : > { %v1254_v16 = vadd.f32 %v1253_v15, %v1170_v14 }
 0x831   : > { %v2412_v18 = vpop.f32.mrf.mxu0 }
 0x832   : > { %v2942_v20 = vadd.f32 %v1254_v16, %v2716_v4  ;;  %v1291_v16 = vrot.slane %v1287_v12, %v2822_v50 }
 0x833   : > { %v1256_v19 = vpop.f32.mrf.mxu0 }
 0x834   : > { %v1257_v21 = vadd.f32 %v1256_v19, %v1170_v14  ;;  %1262 = vadd.xlane.f32.xlu0 %v2942_v20  ;;  %v1294_v14 = vld [vmem:[%s3266_s9] sm:$0x1] }
 0x835   : > { %v2413_v17 = vpop.f32.mrf.mxu0  ;;  %v1295_v18 = vunpack.c.l.bf16 %v1294_v14 }
 0x836   : > { %v2946_v31 = vadd.f32 %v1257_v21, %v2712_v2 }
 0x838   : > { %v1264_v22 = vsel %vm543_vm0, %v2946_v31, 0.0 }
 0x839   : > { %1265 = vadd.xlane.f32.xlu1 %v1264_v22  ;;  %v1299_v22 = vrot.slane %v1295_v18, %v2822_v50 }
 0x8bd   : > { %v1263_v23 = vpop.xlane.xlu0 %1262 }
 0x8be   : > { %v1267_v24 = vmul.f32 0.0078125, %v1263_v23 }
 0x8c0   : > { %v2951_v25 = vsub.f32 %v2942_v20, %v1267_v24 }
 0x8c2   : > { %v1266_v26 = vpop.xlane.xlu1 %1265  ;;  %v1271_v4 = vmul.f32 %v2951_v25, %v2951_v25 }
 0x8c3   : > { %v1268_v27 = vmul.f32 0.0078125, %v1266_v26 }
 0x8c4   : > { %1273 = vadd.xlane.f32.xlu0 %v1271_v4 }
 0x8c5   : > { %v2956_v28 = vsub.f32 %v2946_v31, %v1268_v27  ;;  %v2521_v27 = vld [vmem:[%s3269_s12 + $0x78] sm:$0xff]  }
 0x8c6   : > { %2306 = vmatprep.subr.bf16.mxu1 %v2521_v27 }
 0x8c7   : > { %v1272_v2 = vmul.f32 %v2956_v28, %v2956_v28 }
 0x8c9   : > { %v1275_v29 = vsel %vm543_vm0, %v1272_v2, 0.0  ;;  %v2524_v2 = vld [vmem:[%s3269_s12 + $0xb8] sm:$0xff]  }
 0x8ca   : > { %1276 = vadd.xlane.f32.xlu1 %v1275_v29  ;;  %v2525_v29 = vld [vmem:[%s3269_s12 + $0x70] sm:$0xff]  }
 0x94d   : > { %v1274_v3 = vpop.xlane.xlu0 %1273 }
 0x94e   : > { %v1278_v5 = vmul.f32 0.0078125, %v1274_v3  ;;  %v1345_v3 = vrot.slane %v1336_v61, %v625_v1 }
 0x950   : > { %v1280_v6 = vadd.f32 1e-05, %v1278_v5  ;;  %v1353_v5 = vrot.slane %v1336_v61, %v1352_v62 }
 0x952   : > { %2573 = vrsqrt.f32 %v1280_v6  ;;  %v1361_v6 = vrot.slane %v1341_v63, %v2822_v50 }
 0x953   : > { %v1277_v9 = vpop.xlane.xlu1 %1276 }
 0x954   : > { %v1279_v10 = vmul.f32 0.0078125, %v1277_v9  ;;  %v1369_v9 = vrot.slane %v1349_v0, %v2822_v50 }
 0x956   : > { %v1281_v7 = vadd.f32 1e-05, %v1279_v10  ;;  %v1365_v10 = vrot.slane %v1345_v3, %v2822_v50 }
 0x958   : > { %2575 = vrsqrt.f32 %v1281_v7  ;;  %v1373_v7 = vrot.slane %v1353_v5, %v2822_v50 }
 0x95f   : > { %v2574_v13 = vpop.eup %2573 }
 0x960   : > { %v1284_v15 = vmul.f32 %v2574_v13, %v2951_v25  ;;  %v2522_v25 = vld [vmem:[%s3269_s12 + $0xf8] sm:$0xff]  }
 0x961   : > { %2328 = vmatprep.subr.bf16.mxu0 %v2522_v25 }
 0x962   : > { %v1292_v17 = vmul.f32 %v1291_v16, %v1284_v15 }
 0x964   : > { %v1300_v24 = vadd.f32 %v1299_v22, %v1292_v17 }
 0x965   : > { %v2576_v19 = vpop.eup %2575 }
 0x966   : > { %v1285_v21 = vmul.f32 %v2576_v19, %v2956_v28  ;;  %v2523_v28 = vld [vmem:[%s3269_s12 + $0x38] sm:$0xff]  }
 0x968   : > { %v1293_v23 = vmul.f32 %v1291_v16, %v1285_v21 }
 0x96a   : > { %v1301_v26 = vadd.f32 %v1299_v22, %v1293_v23 }
 0x96c   : > { %v1302_v4 = vpack.c.bf16 %v1301_v26, %v1300_v24 }
 0x96e   : > { %1567 = vmatmul.mubr.bf16.vlgmr.msra.gmra.mxu1 %v1302_v4  ;;  %1610 = vmatmul.mubr.bf16.vlgmr.msra.gmra.mxu0 %v1302_v4 }
 0x96f   : > { %2307 = vmatpush3.bf16.msra.mxu1 %v2523_v28  ;;  %2329 = vmatpush3.bf16.msra.mxu0 %v2524_v2 }
 0x970   : > { %2308 = vmatprep.subr.bf16.mxu1 %v2525_v29  ;;  %2330 = vmatprep.subr.bf16.mxu0 %v2526_v32 }
 0x973   : > { %2309 = vmatpush3.bf16.msra.mxu1 %v2527_v34  ;;  %2331 = vmatpush3.bf16.msra.mxu0 %v2528_v35 }
 0x974   : > { %2310 = vmatprep.subr.bf16.mxu1 %v2529_v36  ;;  %2332 = vmatprep.subr.bf16.mxu0 %v2530_v37 }
 0x977   : > { %2311 = vmatpush3.bf16.msra.mxu1 %v2531_v38  ;;  %2333 = vmatpush3.bf16.msra.mxu0 %v2532_v39 }
 0x978   : > { %2312 = vmatprep.subr.bf16.mxu1 %v2533_v40  ;;  %2334 = vmatprep.subr.bf16.mxu0 %v2534_v41 }
 0x97b   : > { %2313 = vmatpush3.bf16.msra.mxu1 %v2535_v42  ;;  %2335 = vmatpush3.bf16.msra.mxu0 %v2536_v43 }
 0x97c   : > { %2314 = vmatprep.subr.bf16.mxu1 %v2537_v44  ;;  %2336 = vmatprep.subr.bf16.mxu0 %v2538_v45 }
 0x97f   : > { %2315 = vmatpush3.bf16.msra.mxu1 %v2539_v48  ;;  %2337 = vmatpush3.bf16.msra.mxu0 %v2540_v49 }
 0x980   : > { %2316 = vmatprep.subr.bf16.mxu1 %v2541_v51  ;;  %2338 = vmatprep.subr.bf16.mxu0 %v2542_v52 }
 0x983   : > { %2317 = vmatpush3.bf16.msra.mxu1 %v2543_v46  ;;  %2339 = vmatpush3.bf16.msra.mxu0 %v2544_v53 }
 0x984   : > { %2318 = vmatprep.subr.bf16.mxu1 %v2545_v54  ;;  %2340 = vmatprep.subr.bf16.mxu0 %v2546_v30 }
 0x987   : > { %2319 = vmatpush3.bf16.msra.mxu1 %v2547_v55  ;;  %2341 = vmatpush3.bf16.msra.mxu0 %v2548_v33 }
 0x988   : > { %2320 = vmatprep.subr.bf16.mxu1 %v2549_v56  ;;  %2342 = vmatprep.subr.bf16.mxu0 %v2550_v57 }
 0x98b   : > { %2321 = vmatpush3.bf16.msra.mxu1 %v2551_v58  ;;  %2343 = vmatpush3.bf16.msra.mxu0 %v2552_v59 }
 0xa2e   : > { %v1568_v11 = vpop.f32.mrf.mxu1  ;;  %v1611_v12 = vpop.f32.mrf.mxu0 }
 0xa2f   : > { %v3176_v13 = vadd.f32 %v1568_v11, %v1361_v6  ;;  %v3178_v14 = vadd.f32 %v1611_v12, %v1369_v9 }
 0xa30   : > { %v1570_v15 = vpop.f32.mrf.mxu1  ;;  %v1613_v8 = vpop.f32.mrf.mxu0 }
 0xa31   : > { %v1620_v47 = vmul.f32 %v3176_v13, %v3176_v13  ;;  %v1622_v1 = vmul.f32 %v3178_v14, %v3178_v14  ;;  %v3184_v16 = vadd.f32 %v1570_v15, %v1365_v10  ;;  %v3186_v18 = vadd.f32 %v1613_v8, %v1373_v7 }
 0xa32   : > { %v1572_v19 = vpop.f32.mrf.mxu1  ;;  %v1615_v21 = vpop.f32.mrf.mxu0 }
 0xa33   : > { %v1628_v17 = vmul.f32 %v1620_v47, %v3176_v13  ;;  %v1630_v22 = vmul.f32 %v1622_v1, %v3178_v14  ;;  %v1621_v23 = vmul.f32 %v3184_v16, %v3184_v16  ;;  %v1623_v24 = vmul.f32 %v3186_v18, %v3186_v18 }
 0xa34   : > { %v3194_v26 = vadd.f32 %v1572_v19, %v1361_v6  ;;  %v3196_v4 = vadd.f32 %v1615_v21, %v1369_v9  ;;  %v1574_v27 = vpop.f32.mrf.mxu1  ;;  %v1617_v25 = vpop.f32.mrf.mxu0 }
 0xa35   : > { %v1636_v28 = vmul.f32 0.044715, %v1628_v17  ;;  %v1638_v2 = vmul.f32 0.044715, %v1630_v22  ;;  %v1629_v29 = vmul.f32 %v1621_v23, %v3184_v16  ;;  %v1631_v32 = vmul.f32 %v1623_v24, %v3186_v18 }
 0xa36   : > { %v1624_v34 = vmul.f32 %v3194_v26, %v3194_v26  ;;  %v1626_v35 = vmul.f32 %v3196_v4, %v3196_v4  ;;  %v3204_v36 = vadd.f32 %v1574_v27, %v1365_v10  ;;  %v3206_v37 = vadd.f32 %v1617_v25, %v1373_v7 }
 0xa37   : > { %v1644_v38 = vadd.f32 %v1636_v28, %v3176_v13  ;;  %v1646_v39 = vadd.f32 %v1638_v2, %v3178_v14  ;;  %v1637_v40 = vmul.f32 0.044715, %v1629_v29  ;;  %v1639_v41 = vmul.f32 0.044715, %v1631_v32 }
 0xa38   : > { %v1632_v42 = vmul.f32 %v1624_v34, %v3194_v26  ;;  %v1634_v43 = vmul.f32 %v1626_v35, %v3196_v4  ;;  %v1625_v44 = vmul.f32 %v3204_v36, %v3204_v36  ;;  %v1627_v45 = vmul.f32 %v3206_v37, %v3206_v37 }
 0xa39   : > { %v1652_v48 = vmul.f32 0.7978846, %v1644_v38  ;;  %v1654_v49 = vmul.f32 0.7978846, %v1646_v39  ;;  %v1645_v51 = vadd.f32 %v1637_v40, %v3184_v16  ;;  %v1647_v52 = vadd.f32 %v1639_v41, %v3186_v18 }
 0xa3a   : > { %v1640_v46 = vmul.f32 0.044715, %v1632_v42  ;;  %v1642_v53 = vmul.f32 0.044715, %v1634_v43  ;;  %v1633_v54 = vmul.f32 %v1625_v44, %v3204_v36  ;;  %v1635_v30 = vmul.f32 %v1627_v45, %v3206_v37 }
 0xa3b   : > { %2577 = vtanh.f32 %v1652_v48  ;;  %v1653_v55 = vmul.f32 0.7978846, %v1645_v51  ;;  %v1655_v33 = vmul.f32 0.7978846, %v1647_v52 }
 0xa3c   : > { %2579 = vtanh.f32 %v1654_v49  ;;  %v1648_v56 = vadd.f32 %v1640_v46, %v3194_v26  ;;  %v1650_v57 = vadd.f32 %v1642_v53, %v3196_v4  ;;  %v1641_v58 = vmul.f32 0.044715, %v1633_v54 }
 0xa3d   : > { %2581 = vtanh.f32 %v1653_v55  ;;  %v1643_v59 = vmul.f32 0.044715, %v1635_v30 }
 0xa3e   : > { %2583 = vtanh.f32 %v1655_v33  ;;  %v1656_v60 = vmul.f32 0.7978846, %v1648_v56  ;;  %v1658_v61 = vmul.f32 0.7978846, %v1650_v57  ;;  %v1649_v62 = vadd.f32 %v1641_v58, %v3204_v36 }
 0xa3f   : > { %v1651_v63 = vadd.f32 %v1643_v59, %v3206_v37 }
 0xa40   : > { %2585 = vtanh.f32 %v1656_v60  ;;  %v1657_v0 = vmul.f32 0.7978846, %v1649_v62 }
 0xa41   : > { %2587 = vtanh.f32 %v1658_v61  ;;  %v1659_v3 = vmul.f32 0.7978846, %v1651_v63 }
 0xa42   : > { %2589 = vtanh.f32 %v1657_v0 }
 0xa43   : > { %2591 = vtanh.f32 %v1659_v3 }
 0xa48   : > { %v2578_v5 = vpop.eup %2577 }
 0xa49   : > { %v2580_v6 = vpop.eup %2579  ;;  %v1668_v12 = vadd.f32 1.0, %v2578_v5 }
 0xa4a   : > { %v2582_v9 = vpop.eup %2581  ;;  %v1670_v47 = vadd.f32 1.0, %v2580_v6 }
 0xa4b   : > { %v2584_v10 = vpop.eup %2583  ;;  %v1669_v7 = vadd.f32 1.0, %v2582_v9  ;;  %v1676_v27 = vmul.f32 0.5, %v1668_v12 }
 0xa4c   : > { %v1671_v15 = vadd.f32 1.0, %v2584_v10  ;;  %v1678_v29 = vmul.f32 0.5, %v1670_v47 }
 0xa4d   : > { %v2586_v11 = vpop.eup %2585  ;;  %v1677_v24 = vmul.f32 0.5, %v1669_v7  ;;  %v1684_v41 = vmul.f32 %v1676_v27, %v3176_v13 }
 0xa4e   : > { %v2588_v8 = vpop.eup %2587  ;;  %v1672_v1 = vadd.f32 1.0, %v2586_v11  ;;  %v1679_v2 = vmul.f32 0.5, %v1671_v15  ;;  %v1686_v44 = vmul.f32 %v1678_v29, %v3178_v14 }
 0xa4f   : > { %v2590_v19 = vpop.eup %2589  ;;  %v1674_v21 = vadd.f32 1.0, %v2588_v8  ;;  %v1685_v39 = vmul.f32 %v1677_v24, %v3184_v16  ;;  %v2036_v16 = vld [vmem:[%s3270_s13] sm:$0x1] }
 0xa50   : > { %v2592_v17 = vpop.eup %2591  ;;  %v1680_v22 = vmul.f32 0.5, %v1672_v1  ;;  %v1673_v23 = vadd.f32 1.0, %v2590_v19  ;;  %v1687_v42 = vmul.f32 %v1679_v2, %v3186_v18  ;;  %v2037_v18 = vunpack.c.l.bf16 %v2036_v16  ;;  %v2068_v1 = vld [vmem:[%s3271_s14] sm:$0x1] }
 0xa51   : > { %v1682_v25 = vmul.f32 0.5, %v1674_v21  ;;  %v1675_v28 = vadd.f32 1.0, %v2592_v17  ;;  %v2076_v19 = vld [vmem:[%s3272_s15] sm:$0x1]  ;;  %v2069_v21 = vunpack.c.l.bf16 %v2068_v1 }
 0xa52   : > { %v1681_v32 = vmul.f32 0.5, %v1673_v23  ;;  %v1688_v34 = vmul.f32 %v1680_v22, %v3194_v26  ;;  %v2041_v30 = vrot.slane %v2037_v18, %v2822_v50  ;;  %v2077_v17 = vunpack.c.l.bf16 %v2076_v19 }
 0xa53   : > { %v1683_v35 = vmul.f32 0.5, %v1675_v28  ;;  %v1690_v38 = vmul.f32 %v1682_v25, %v3196_v4  ;;  %v2073_v22 = vrot.slane %v2069_v21, %v2822_v50 }
 0xa54   : > { %v1689_v40 = vmul.f32 %v1681_v32, %v3204_v36  ;;  %v1692_v49 = vpack.c.bf16 %v1688_v34, %v1684_v41  ;;  %v2081_v24 = vrot.slane %v2077_v17, %v2822_v50 }
 0xa55   : > { %v1691_v43 = vmul.f32 %v1683_v35, %v3206_v37  ;;  %v1694_v26 = vpack.c.bf16 %v1690_v38, %v1686_v44  ;;  %v2096_v38 = vld [vmem:[%s535_s0 + $0x4] sm:$0x1] }
 0xa56   : > { %v1693_v45 = vpack.c.bf16 %v1689_v40, %v1685_v39 }
 0xa57   : > { %v1695_v48 = vpack.c.bf16 %v1691_v43, %v1687_v42 }
 0xa58   : > { %1984 = vmatprep.mubr.bf16.mxu1 %v1693_v45 }
 0xa59   : > { %2025 = vmatprep.mubr.bf16.mxu0 %v1695_v48  ;;  %1985 = vmatmul.mubr.bf16.vlgmr.msra.gmra.mxu1 %v1692_v49 }
 0xa5a   : > { %2026 = vmatmul.mubr.bf16.vlgmr.msra.gmra.mxu0 %v1694_v26 }
 0xb19   : > { %v2322_v4 = vpop.f32.mrf.mxu1 }
 0xb1a   : > { %v2344_v13 = vpop.f32.mrf.mxu0 }
 0xb1b   : > { %v2323_v36 = vpop.f32.mrf.mxu1 }
 0xb1c   : > { %v2324_v51 = vadd.f32 %v2323_v36, %v2322_v4  ;;  %v2345_v37 = vpop.f32.mrf.mxu0 }
 0xb1d   : > { %v2346_v52 = vadd.f32 %v2345_v37, %v2344_v13  ;;  %v2325_v14 = vpop.f32.mrf.mxu1 }
 0xb1e   : > { %v2347_v46 = vpop.f32.mrf.mxu0 }
 0xb1f   : > { %v2028_v53 = vadd.f32 %v2346_v52, %v2324_v51  ;;  %v2326_v54 = vpop.f32.mrf.mxu1 }
 0xb20   : > { %v2327_v55 = vadd.f32 %v2326_v54, %v2325_v14  ;;  %v2348_v33 = vpop.f32.mrf.mxu0 }
 0xb21   : > { %v2349_v56 = vadd.f32 %v2348_v33, %v2347_v46  ;;  %v2034_v57 = vadd.f32 %v2028_v53, %v2942_v20 }
 0xb23   : > { %v2031_v58 = vadd.f32 %v2349_v56, %v2327_v55  ;;  %v2042_v59 = vadd.f32 %v2041_v30, %v2034_v57 }
 0xb25   : > { %2044 = vadd.xlane.f32.xlu1 %v2042_v59  ;;  %v2035_v60 = vadd.f32 %v2031_v58, %v2946_v31 }
 0xb27   : > { %v2043_v61 = vadd.f32 %v2041_v30, %v2035_v60 }
 0xb29   : > { %v2046_v62 = vsel %vm543_vm0, %v2043_v61, 0.0 }
 0xb2a   : > { %2047 = vadd.xlane.f32.xlu0 %v2046_v62 }
 0xbae   : > { %v2045_v63 = vpop.xlane.xlu1 %2044 }
 0xbaf   : > { %v2049_v0 = vmul.f32 0.0078125, %v2045_v63 }
 0xbb1   : > { %v2051_v3 = vsub.f32 %v2042_v59, %v2049_v0 }
 0xbb3   : > { %v2048_v5 = vpop.xlane.xlu0 %2047  ;;  %v2053_v6 = vmul.f32 %v2051_v3, %v2051_v3 }
 0xbb4   : > { %v2050_v9 = vmul.f32 0.0078125, %v2048_v5 }
 0xbb5   : > { %2055 = vadd.xlane.f32.xlu1 %v2053_v6 }
 0xbb6   : > { %v2052_v10 = vsub.f32 %v2043_v61, %v2050_v9 }
 0xbb8   : > { %v2054_v7 = vmul.f32 %v2052_v10, %v2052_v10 }
 0xbba   : > { %v2057_v20 = vsel %vm543_vm0, %v2054_v7, 0.0 }
 0xbbb   : > { %2058 = vadd.xlane.f32.xlu0 %v2057_v20 }
 0xc3e   : > { %v2056_v11 = vpop.xlane.xlu1 %2055 }
 0xc3f   : > { %v2060_v12 = vmul.f32 0.0078125, %v2056_v11 }
 0xc41   : > { %v2062_v15 = vadd.f32 1e-05, %v2060_v12 }
 0xc43   : > { %2593 = vrsqrt.f32 %v2062_v15 }
 0xc44   : > { %v2059_v31 = vpop.xlane.xlu0 %2058 }
 0xc45   : > { %v2061_v8 = vmul.f32 0.0078125, %v2059_v31 }
 0xc47   : > { %v2063_v47 = vadd.f32 1e-05, %v2061_v8 }
 0xc49   : > { %2595 = vrsqrt.f32 %v2063_v47 }
 0xc50   : > { %v2594_v23 = vpop.eup %2593 }
 0xc51   : > { %v2066_v27 = vmul.f32 %v2594_v23, %v2051_v3 }
 0xc53   : > { %v2074_v25 = vmul.f32 %v2073_v22, %v2066_v27 }
 0xc55   : > { %v2082_v28 = vadd.f32 %v2081_v24, %v2074_v25 }
 0xc56   : > { %v2596_v2 = vpop.eup %2595 }
 0xc57   : > { %v2278_v29 = vpack.c.bf16 %v2082_v28, %v2082_v28  ;;  %v2067_v32 = vmul.f32 %v2596_v2, %v2052_v10 }
 0xc59   : > { %2092 = vst [vmem:[%s535_s0] sm:$0xf] %v2278_v29  ;;  %v2075_v34 = vmul.f32 %v2073_v22, %v2067_v32 }
 0xc5b   : > { %v2083_v35 = vadd.f32 %v2081_v24, %v2075_v34 }
 0xc5d   : > { %v2279_v39 = vpack.c.bf16 %v2083_v35, %v2083_v35 }
 0xc5f   : > { %v2097_v50 = vsel %vm2095_vm14, %v2279_v39, %v2096_v38 }
 0xc60   : > { %2098 = vst [vmem:[%s535_s0 + $0x4] sm:$0x1] %v2097_v50 }
 0xc61 PF: > { %s26_s21 = sadd.s32 1, %s2603_s21  }
 0xc62   : > { %p23_p4 = scmp.ge.s32.totalorder %s26_s21, 4  }
 0xc64   :  { %25 = sbr.rel (!%p23_p4) target bundleno = 2 (0x2), region = 117 }

// kernel: compress_model_forward.3
= control target key start
LH: loop header
LB: loop body
LE: loop exit
PB: predicated region body
PF: predicated region fallthrough
CT: control target
= control target key end

     0   :  { %s3860_s0 = inlined_call_operand.vmem [shape: bf16[2,9,128], index: 0, kind: input, shape index: {}]   ;;  %s3861_s1 = inlined_call_operand.vmem [shape: s32[2,1,9], index: 1, kind: input, shape index: {}]   ;;  %s3862_s2 = inlined_call_operand.vmem [shape: s32[2,9,1], index: 2, kind: input, shape index: {}]   ;;  %s3863_s3 = inlined_call_operand.vmem [shape: bf16[1,128], index: 3, kind: input, shape index: {}]   ;;  %s3864_s4 = inlined_call_operand.vmem [shape: bf16[1,128], index: 4, kind: input, shape index: {}]   ;;  %s3865_s5 = inlined_call_operand.vmem [shape: bf16[128,384], index: 5, kind: input, shape index: {}]   ;;  %s3866_s6 = inlined_call_operand.vmem [shape: bf16[1,384], index: 6, kind: input, shape index: {}]   ;;  %s3867_s7 = inlined_call_operand.vmem [shape: bf16[128,128], index: 7, kind: input, shape index: {}]   ;;  %s3868_s8 = inlined_call_operand.vmem [shape: bf16[1,128], index: 8, kind: input, shape index: {}]   ;;  %s3869_s9 = inlined_call_operand.vmem [shape: bf16[1,128], index: 9, kind: input, shape index: {}]   ;;  %s3870_s10 = inlined_call_operand.vmem [shape: bf16[1,128], index: 10, kind: input, shape index: {}]   ;;  %s3871_s11 = inlined_call_operand.vmem [shape: bf16[128,512], index: 11, kind: input, shape index: {}]   ;;  %s3872_s12 = inlined_call_operand.vmem [shape: bf16[1,512], index: 12, kind: input, shape index: {}]   ;;  %s3873_s13 = inlined_call_operand.vmem [shape: bf16[512,128], index: 13, kind: input, shape index: {}]   ;;  %s3874_s14 = inlined_call_operand.vmem [shape: bf16[1,128], index: 14, kind: input, shape index: {}]   ;;  %s3875_s15 = inlined_call_operand.vmem [shape: bf16[1,128], index: 15, kind: input, shape index: {}]   ;;  %s3876_s16 = inlined_call_operand.vmem [shape: bf16[1,128], index: 16, kind: input, shape index: {}]   ;;  %s3877_s17 = inlined_call_operand.vmem [shape: bf16[128,256], index: 17, kind: input, shape index: {}]   ;;  %s3878_s18 = inlined_call_operand.vmem [shape: bf16[1,256], index: 18, kind: input, shape index: {}]   ;;  %s3879_s19 = inlined_call_operand.vmem [shape: bf16[2,9,256], index: 19, kind: output, shape index: {0}]   ;;  %s3880_s20 = inlined_call_operand.vmem [shape: f32[2,1,128], index: 20, kind: output, shape index: {1}]  }
   0x1   :  { %3881 = sst [smem:[#allocation2_spill]] %s3860_s0 }
   0x2   :  { %3882 = sst [smem:[#allocation3_spill]] %s3861_s1  ;;  %s3224_s1 = smov 0  }
   0x3   :  { %3883 = sst [smem:[#allocation4_spill]] %s3862_s2 }
   0x4   :  { %3884 = sst [smem:[#allocation5_spill]] %s3863_s3 }
   0x5   :  { %3885 = sst [smem:[#allocation6_spill]] %s3864_s4 }
   0x6 LB: > { %s2608_s22 = sadd.s32 4294967295, %s3111_s1   ;;  %p2612_p0 = scmp.ge.s32.totalorder %s3111_s1, 1  ;;  %s3111_s1 = sphi %s3224_s1, %s31_s1  }
   0x7   : > { %p583_p1 = scmp.lt.s32.totalorder %s3111_s1, 3 }
   0x9   : > { %p584_p2 = pnand %p2612_p0, %p583_p1 }
   0xa   : > { %p652_p3 = scmp.lt.s32.totalorder (!%p584_p2), %s2608_s22, 1  ;;  %s3886_s25 = sld [smem:[#allocation2_spill]] (!%p584_p2) }
   0xb   : > { %587 = sbr.rel (%p584_p2) target bundleno = 3498 (0xdaa), region = 96  ;;  %s3888_s27 = sld [smem:[#allocation6_spill]] (!%p584_p2) }
   0xc   : > { %s3117_s29 = smov (!%p584_p2), 64   ;;  %s3889_s21 = sld [smem:[#allocation3_spill]] (!%p584_p2) }
   0xd   : > { %s3892_s26 = sld [smem:[#allocation4_spill]] (!%p584_p2) }
  0x10   : > { %s3894_s22 = smov (!%p652_p3, %s2608_s22), 1  ;;  %vm680_vm0 = vcmask 1040384   ;;  %v2905_v5 = vld [vmem:[%s3865_s5 + $0xac] ss:$12 sps:$4 sm:$0xff]   ;;  %v2907_v6 = vld [vmem:[%s3865_s5 + $0xa8] ss:$12 sps:$4 sm:$0xff]   ;;  %v706_v46 = vlaneseq }
  0x11   : > { %s2741_s23 = sshll.u32 %s3894_s22, 3  ;;  %v3113_v7 = vmov 0.0   ;;  %v2908_v8 = vld [vmem:[%s3865_s5 + $0xb0] ss:$12 sps:$4 sm:$0xff]   ;;  %911 = vmatprep.subr.bf16.mxu0 %v2905_v5  ;;  %v2909_v18 = vld [vmem:[%s3865_s5 + $0x94] ss:$12 sps:$4 sm:$0xff]   ;;  %s672_s0 = scalar_lea.vmem %s3880_s20, %s3894_s22 }
  0x12   : > { %s656_s3 = scalar_lea.vmem %s3886_s25, %s2741_s23  ;;  %2816 = vmatprep.subr.bf16.mxu1 %v3113_v7  ;;  %912 = vmatpush1.bf16.msra.mxu0 %v2907_v6  ;;  %v2911_v19 = vld [vmem:[%s3865_s5 + $0x90] ss:$12 sps:$4 sm:$0xff]   ;;  %v2912_v20 = vld [vmem:[%s3865_s5 + $0x98] ss:$12 sps:$4 sm:$0xff]   ;;  %v2916_v23 = vld [vmem:[%s3865_s5 + $0x80] ss:$12 sps:$4 sm:$0xff]   ;;  %s659_s23 = scalar_lea.vmem %s3889_s21, %s3894_s22 }
  0x13   : > { %v675_v0 = vld [vmem:[%s656_s3 + $0x4] sm:$0x1]  ;;  %v674_v1 = vld [vmem:[%s656_s3] sm:$0xf]  ;;  %2817 = vmatpush3.bf16.msra.mxu1 %v2908_v8  ;;  %913 = vmatprep.subr.bf16.mxu0 %v2909_v18  ;;  %v2913_v21 = vld [vmem:[%s3865_s5 + $0x7c] ss:$12 sps:$4 sm:$0xff]  }
  0x14   : > { %v3238_v2 = vunpack.c.l.bf16 %v675_v0  ;;  %v3242_v4 = vunpack.c.l.bf16 %v674_v1  ;;  %2818 = vmatprep.subr.bf16.mxu1 %v3113_v7  ;;  %v2915_v22 = vld [vmem:[%s3865_s5 + $0x78] ss:$12 sps:$4 sm:$0xff]   ;;  %v2919_v25 = vld [vmem:[%s3865_s5 + $0x60] ss:$12 sps:$4 sm:$0xff]   ;;  %v2920_v26 = vld [vmem:[%s3865_s5 + $0x68] ss:$12 sps:$4 sm:$0xff]  }
  0x15   : > { %v2917_v24 = vld [vmem:[%s3865_s5 + $0x64] ss:$12 sps:$4 sm:$0xff]   ;;  %v2921_v27 = vld [vmem:[%s3865_s5 + $0x4c] ss:$12 sps:$4 sm:$0xff]   ;;  %v2923_v28 = vld [vmem:[%s3865_s5 + $0x48] ss:$12 sps:$4 sm:$0xff]  }
  0x16   : > { %v681_v3 = vsel %vm680_vm0, %v3238_v2, 0.0  ;;  %914 = vmatpush1.bf16.msra.mxu0 %v2911_v19  ;;  %v2924_v29 = vld [vmem:[%s3865_s5 + $0x50] ss:$12 sps:$4 sm:$0xff]   ;;  %v2925_v30 = vld [vmem:[%s3865_s5 + $0x34] ss:$12 sps:$4 sm:$0xff]   ;;  %v3114_v31 = vmov 0  }
  0x17   : > { %682 = vadd.xlane.f32.xlu0 %v681_v3  ;;  %2819 = vmatpush3.bf16.msra.mxu1 %v2912_v20  ;;  %vm3115_vm1 = vmmov 0   ;;  %v2927_v32 = vld [vmem:[%s3865_s5 + $0x30] ss:$12 sps:$4 sm:$0xff]   ;;  %v2928_v33 = vld [vmem:[%s3865_s5 + $0x38] ss:$12 sps:$4 sm:$0xff]   ;;  %v3344_v47 = vshrl.u32 %v706_v46, 7 }
  0x18   : > { %2820 = vmatprep.subr.bf16.mxu1 %v3113_v7  ;;  %915 = vmatprep.subr.bf16.mxu0 %v2913_v21  ;;  %v2929_v34 = vld [vmem:[%s3865_s5 + $0x1c] ss:$12 sps:$4 sm:$0xff]   ;;  %v2931_v35 = vld [vmem:[%s3865_s5 + $0x18] ss:$12 sps:$4 sm:$0xff]   ;;  %v2932_v36 = vld [vmem:[%s3865_s5 + $0x20] ss:$12 sps:$4 sm:$0xff]  }
  0x19   : > { %943 = vmatprep.mubr.bf16.mxu0 %v3114_v31  ;;  %2832 = vmatprep.mubr.msk.bf16.mxu1 %vm3115_vm1, %v3113_v7  ;;  %v2933_v37 = vld [vmem:[%s3865_s5 + $0x4] ss:$12 sps:$4 sm:$0xff]   ;;  %v2935_v38 = vld [vmem:[%s3865_s5] ss:$12 sps:$4 sm:$0xff]   ;;  %v2936_v39 = vld [vmem:[%s3865_s5 + $0x8] ss:$12 sps:$4 sm:$0xff]  }
  0x1a   : > { %916 = vmatpush1.bf16.msra.mxu0 %v2915_v22  ;;  %2904 = vset.pattern.permute.xlu1 %v3114_v31  ;;  %s3887_s25 = sld [smem:[#allocation5_spill]]  ;;  %v3350_v50 = vsub.s32 0, %v3344_v47  ;;  %v712_v51 = vld [vmem:[%s3888_s27] sm:$0x1]  ;;  %v766_v3 = vsub.s32 4, %v3344_v47  ;;  %v3368_v5 = vsub.s32 2, %v3344_v47 }
  0x1b   : > { %678 = vadd.xlane.f32.xlu0 %v3242_v4  ;;  %2821 = vmatpush3.bf16.msra.mxu1 %v2916_v23  ;;  %v713_v55 = vunpack.c.l.bf16 %v712_v51  ;;  %v753_v0 = vld [vmem:[%s3866_s6] sm:$0x7]  ;;  %vm1097_vm2 = vcmask 1043456   ;;  %vm1098_vm3 = vcmask 1044480   ;;  %vm1017_vm4 = vcmask 523264   ;;  %s2742_s21 = sshll.u32 %s3894_s22, 4 }
  0x1c   : > { %2822 = vmatprep.subr.bf16.mxu1 %v3113_v7  ;;  %917 = vmatprep.subr.bf16.mxu0 %v2917_v24  ;;  %v754_v1 = vunpack.c.l.bf16 %v753_v0  ;;  %vm1069_vm11 = vcmask 72704   ;;  %vm1073_vm12 = vcmask 65536   ;;  %vm2396_vm13 = vsmask.f32 256  ;;  %s669_s2 = scalar_lea.vmem %s3879_s19, %s2742_s21  ;;  %s664_s27 = scalar_lea.vmem %s3892_s26, %s2742_s21 }
  0x1d   : > { %2903 = vset.pattern.permute.xlu0 %v3114_v31  ;;  %v717_v59 = vrot.slane %v713_v55, %v3350_v50  ;;  %vm2398_vm14 = vcmask 1044484   ;;  %vm2399_vm15 = vsmask.f32 4352 }
  0x1e   : > { %918 = vmatpush1.bf16.msra.mxu0 %v2919_v25  ;;  %v759_v6 = vrot.slane %v754_v1, %v3350_v50  ;;  %v767_v8 = vrot.slane %v754_v1, %v766_v3 }
  0x1f   : > { %2823 = vmatpush3.bf16.msra.mxu1 %v2920_v26  ;;  %919 = vmatprep.subr.bf16.mxu0 %v2921_v27 }
  0x20   : > { %2824 = vmatprep.subr.bf16.mxu1 %v3113_v7  ;;  %v704_v48 = vld [vmem:[%s3887_s25] sm:$0x1] }
  0x21   : > { %v705_v49 = vunpack.c.l.bf16 %v704_v48 }
  0x22   : > { %920 = vmatpush1.bf16.msra.mxu0 %v2923_v28 }
  0x23   : > { %2825 = vmatpush3.bf16.msra.mxu1 %v2924_v29  ;;  %921 = vmatprep.subr.bf16.mxu0 %v2925_v30  ;;  %v709_v54 = vrot.slane %v705_v49, %v3350_v50 }
  0x24   : > { %2826 = vmatprep.subr.bf16.mxu1 %v3113_v7 }
  0x26   : > { %922 = vmatpush1.bf16.msra.mxu0 %v2927_v32 }
  0x27   : > { %2827 = vmatpush3.bf16.msra.mxu1 %v2928_v33  ;;  %923 = vmatprep.subr.bf16.mxu0 %v2929_v34 }
  0x28   : > { %2828 = vmatprep.subr.bf16.mxu1 %v3113_v7 }
  0x2a   : > { %924 = vmatpush1.bf16.msra.mxu0 %v2931_v35 }
  0x2b   : > { %2829 = vmatpush3.bf16.msra.mxu1 %v2932_v36  ;;  %925 = vmatprep.subr.bf16.mxu0 %v2933_v37 }
  0x2c   : > { %2830 = vmatprep.subr.bf16.mxu1 %v3113_v7 }
  0x2e   : > { %926 = vmatpush1.bf16.msra.mxu0 %v2935_v38 }
  0x2f   : > { %2831 = vmatpush3.bf16.msra.mxu1 %v2936_v39  ;;  %2836 = vmatprep.subr.bf16.mxu0 %v3113_v7  ;;  %v995_v39 = vld [vmem:[%s659_s23] sm:$0x1] }
  0x30   : > { %2842 = vmatprep.subr.bf16.mxu1 %v3113_v7  ;;  %vm996_vm5 = vcmp.gt.s32.totalorder %v995_v39, 0 }
  0xa0   : > { %v683_v9 = vpop.xlane.xlu0 %682 }
  0xa1   : > { %v686_v10 = vmul.f32 0.0078125, %v683_v9  ;;  %v763_v9 = vrot.slane %v754_v1, %v3368_v5 }
  0xa3   : > { %v3257_v13 = vsub.f32 %v3238_v2, %v686_v10 }
  0xa4   : > { %v679_v11 = vpop.xlane.xlu0 %678 }
  0xa5   : > { %v685_v12 = vmul.f32 0.0078125, %v679_v11  ;;  %v690_v16 = vmul.f32 %v3257_v13, %v3257_v13 }
  0xa7   : > { %v3260_v14 = vsub.f32 %v3242_v4, %v685_v12  ;;  %v693_v17 = vsel %vm680_vm0, %v690_v16, 0.0  ;;  %v774_v12 = vrot.slane %v759_v6, %v3350_v50  ;;  %v778_v16 = vrot.slane %v763_v9, %v3350_v50 }
  0xa9   : > { %v689_v15 = vmul.f32 %v3260_v14, %v3260_v14 }
  0xab   : > { %691 = vadd.xlane.f32.xlu1 %v689_v15 }
  0xaf   : > { %694 = vadd.xlane.f32.xlu1 %v693_v17  ;;  %v3116_v17 = vmov 65535  }
  0xb0   : > { %v1099_v18 = vsel %vm1097_vm2, 4294967295, %v3116_v17  ;;  %vm2400_vm2 = vmand %vm2398_vm14, %vm2399_vm15 }
  0xb1   : > { %v3377_v25 = vsel %vm1098_vm3, %v1099_v18, 0 }
 0x134   : > { %v692_v40 = vpop.xlane.xlu1 %691 }
 0x135   : > { %v696_v41 = vmul.f32 0.0078125, %v692_v40  ;;  %v997_v40 = vsel %vm996_vm5, 1, %v3114_v31 }
 0x137   : > { %v698_v42 = vadd.f32 1e-05, %v696_v41  ;;  %v1001_v41 = vrot.slane %v997_v40, %v3350_v50 }
 0x138   : > { %v695_v43 = vpop.xlane.xlu1 %694 }
 0x139   : > { %3049 = vrsqrt.f32 %v698_v42  ;;  %v697_v44 = vmul.f32 0.0078125, %v695_v43  ;;  %v3403_v42 = vand.u32 127, %v706_v46  ;;  %vm1002_vm6 = vcmp.eq.s32.totalorder %v1001_v41, 1 }
 0x13a   : > { %v1005_v43 = vadd.s32 8, %v3344_v47 }
 0x13b   : > { %v699_v45 = vadd.f32 1e-05, %v697_v44  ;;  %vm1008_vm7 = vcmp.le.s32.totalorder %v3403_v42, %v3344_v47 }
 0x13c   : > { %vm1010_vm8 = vmand %vm1002_vm6, %vm1008_vm7  ;;  %vm1009_vm9 = vcmp.le.s32.totalorder %v3403_v42, %v1005_v43 }
 0x13d   : > { %3051 = vrsqrt.f32 %v699_v45  ;;  %v3118_v45 = vmov -1e+09   ;;  %vm1011_vm10 = vmand %vm1002_vm6, %vm1009_vm9 }
 0x13e   : > { %v1012_v48 = vsel %vm1010_vm8, 0.0, %v3118_v45  ;;  %v1013_v46 = vsel %vm1011_vm10, 0.0, %v3118_v45  ;;  %vm2476_vm10 = vcmask 0  }
 0x146   : > { %v3050_v52 = vpop.eup %3049 }
 0x147   : > { %v702_v53 = vmul.f32 %v3050_v52, %v3260_v14 }
 0x149   : > { %v710_v58 = vmul.f32 %v709_v54, %v702_v53 }
 0x14a   : > { %v3052_v56 = vpop.eup %3051 }
 0x14b   : > { %v703_v57 = vmul.f32 %v3052_v56, %v3257_v13  ;;  %v718_v61 = vadd.f32 %v717_v59, %v710_v58  ;;  %v782_v13 = vrot.slane %v767_v8, %v3350_v50 }
 0x14d   : > { %v711_v60 = vmul.f32 %v709_v54, %v703_v57 }
 0x14f   : > { %v719_v62 = vadd.f32 %v717_v59, %v711_v60 }
 0x151   : > { %v720_v63 = vpack.c.bf16 %v719_v62, %v718_v61 }
 0x153   : > { %944 = vmatmul.mubr.bf16.vlgmr.msra.gmra.mxu0 %v720_v63  ;;  %2833 = vmatmul.mubr.bf16.vlgmr.msra.gmra.mxu1 %v720_v63 }
 0x154   : > { %2838 = vmatprep.mubr.msk.bf16.mxu0 %vm3115_vm1, %v3113_v7  ;;  %2844 = vmatprep.mubr.msk.bf16.mxu1 %vm3115_vm1, %v3113_v7 }
 0x213   : > { %v945_v10 = vpop.f32.mrf.mxu0  ;;  %v988_v11 = vpop.f32.mrf.mxu1 }
 0x214   : > { %v946_v21 = vadd.f32 %v945_v10, %v774_v12  ;;  %v989_v22 = vadd.f32 %v988_v11, %v782_v13 }
 0x215   : > { %v947_v14 = vpop.f32.mrf.mxu0  ;;  %v2834_v15 = vpop.f32.mrf.mxu1 }
 0x216   : > { %v948_v28 = vadd.f32 %v947_v14, %v778_v16 }
 0x217   : > { %v949_v19 = vpop.f32.mrf.mxu0  ;;  %v991_v20 = vpop.f32.mrf.mxu1 }
 0x218   : > { %v950_v23 = vadd.f32 %v949_v19, %v774_v12  ;;  %v992_v24 = vadd.f32 %v991_v20, %v782_v13 }
 0x219   : > { %v951_v26 = vpop.f32.mrf.mxu0  ;;  %v2835_v27 = vpop.f32.mrf.mxu1 }
 0x21a   : > { %v1014_v29 = vpack.c.bf16 %v950_v23, %v946_v21  ;;  %v3379_v30 = vpack.c.bf16 %v992_v24, %v989_v22  ;;  %v952_v32 = vadd.f32 %v951_v26, %v778_v16 }
 0x21c   : > { %v1102_v33 = vand.u32 %v3377_v25, %v3379_v30  ;;  %v1015_v34 = vpack.c.bf16 %v952_v32, %v948_v28  ;;  %1146 = vrot.lane.b32.xlu1 %v1014_v29, %s3117_s29 }
 0x21e   : > { %2843 = vmatpush3.bf16.msra.mxu1 %v1102_v33  ;;  %1149 = vrot.lane.b32.xlu0 %v1015_v34, %s3117_s29  ;;  %v1022_v35 = vsel %vm1017_vm4, %v1015_v34, 0 }
 0x21f   : > { %2837 = vmatpush3.bf16.xpose.msra.mxu0 %v1022_v35  ;;  %2854 = vmatprep.subr.bf16.mxu1 %v3113_v7 }
 0x220   : > { %2848 = vmatprep.subr.bf16.mxu0 %v3113_v7 }
 0x226   : > { %2839 = vmatmul.mubr.msk.bf16.vlgmr.msra.gmra.mxu0 %vm1017_vm4, %v1014_v29 }
 0x227   : > { %2850 = vmatprep.mubr.msk.bf16.mxu0 %vm3115_vm1, %v3113_v7 }
 0x28e   : > { %v1147_v38 = vpop.permute.xlu1 %1146 }
 0x290   : > { %v1150_v36 = vpop.permute.xlu0 %1149 }
 0x291   : > { %v1155_v37 = vsel %vm1017_vm4, %v1150_v36, 0 }
 0x292   : > { %2849 = vmatpush3.bf16.xpose.msra.mxu0 %v1155_v37 }
 0x293   : > { %2860 = vmatprep.subr.bf16.mxu0 %v3113_v7 }
 0x299   : > { %2851 = vmatmul.mubr.msk.bf16.vlgmr.msra.gmra.mxu0 %vm1017_vm4, %v1147_v38 }
 0x29a   : > { %2876 = vmatprep.mubr.msk.bf16.mxu0 %vm3115_vm1, %v3113_v7 }
 0x2e6   : > { %v1058_v44 = vpop.f32.mrf.mxu0 }
 0x2e7   : > { %v1065_v49 = vmul.f32 0.125, %v1058_v44 }
 0x2e8   : > { %v2840_v51 = vpop.f32.mrf.mxu0 }
 0x2e9   : > { %v1067_v52 = vadd.f32 %v1065_v49, %v1012_v48 }
 0x2ea   : > { %v1061_v53 = vpop.f32.mrf.mxu0 }
 0x2eb   : > { %v1066_v54 = vmul.f32 0.125, %v1061_v53  ;;  %v1070_v55 = vsel %vm1069_vm11, %v1067_v52, -inf }
 0x2ec   : > { %1071 = vmax.xlane.f32.xlu1 %v1070_v55  ;;  %v2841_v56 = vpop.f32.mrf.mxu0 }
 0x2ed   : > { %v1068_v57 = vadd.f32 %v1066_v54, %v1013_v46  ;;  %v2940_v56 = vld [vmem:[%s3867_s7 + $0x20] sm:$0xff]  }
 0x2ef   : > { %v1074_v58 = vsel %vm1073_vm12, %v1068_v57, -inf }
 0x2f0   : > { %1075 = vmax.xlane.f32.xlu0 %v1074_v58  ;;  %v2941_v58 = vld [vmem:[%s3867_s7 + $0x18] sm:$0xff]  }
 0x359   : > { %v1191_v59 = vpop.f32.mrf.mxu0 }
 0x35a   : > { %v1198_v60 = vmul.f32 0.125, %v1191_v59  ;;  %v2942_v59 = vld [vmem:[%s3867_s7 + $0x10] sm:$0xff]  }
 0x35b   : > { %v2852_v61 = vpop.f32.mrf.mxu0 }
 0x35c   : > { %v1200_v62 = vadd.f32 %v1198_v60, %v1012_v48  ;;  %v2943_v60 = vld [vmem:[%s3867_s7 + $0x8] sm:$0xff]   ;;  %v2944_v61 = vld [vmem:[%s3867_s7] sm:$0xff]  }
 0x35d   : > { %v1194_v63 = vpop.f32.mrf.mxu0 }
 0x35e   : > { %v1199_v0 = vmul.f32 0.125, %v1194_v63  ;;  %v1202_v1 = vsel %vm1069_vm11, %v1200_v62, -inf }
 0x35f   : > { %1203 = vmax.xlane.f32.xlu0 %v1202_v1  ;;  %v2853_v6 = vpop.f32.mrf.mxu0 }
 0x360   : > { %v1201_v8 = vadd.f32 %v1199_v0, %v1013_v46  ;;  %v2939_v46 = vld [vmem:[%s3867_s7 + $0x28] sm:$0xff]  }
 0x362   : > { %v1205_v9 = vsel %vm1073_vm12, %v1201_v8, -inf }
 0x363   : > { %1206 = vmax.xlane.f32.xlu1 %v1205_v9 }
 0x375   : > { %v1072_v10 = vpop.xlane.xlu1 %1071 }
 0x376   : > { %v1077_v11 = vsub.f32 %v1067_v52, %v1072_v10  ;;  %v2937_v52 = vld [vmem:[%s3867_s7 + $0x38] sm:$0xff]  }
 0x377   : > { %2861 = vmatpush3.bf16.msra.mxu0 %v2937_v52  ;;  %v2965_v52 = vld [vmem:[%s3871_s11 + $0x84] ss:$16 sps:$4 sm:$0xff]  }
 0x378   : > { %v1079_v12 = vmul.f32 1.442695, %v1077_v11  ;;  %2862 = vmatprep.subr.bf16.mxu0 %v3113_v7 }
 0x379   : > { %v1076_v13 = vpop.xlane.xlu0 %1075 }
 0x37a   : > { %3053 = vpow2.f32 %v1079_v12  ;;  %v1078_v14 = vsub.f32 %v1068_v57, %v1076_v13 }
 0x37c   : > { %v1081_v15 = vmul.f32 1.442695, %v1078_v14  ;;  %v1302_v14 = vld [vmem:[%s3868_s8] sm:$0x1] }
 0x37e   : > { %3055 = vpow2.f32 %v1081_v15  ;;  %v1303_v15 = vunpack.c.l.bf16 %v1302_v14 }
 0x387   : > { %v3054_v16 = vpop.eup %3053 }
 0x388   : > { %v1083_v17 = vsel %vm1069_vm11, %v3054_v16, 0.0 }
 0x389   : > { %1084 = vadd.xlane.f32.xlu0 %v1083_v17 }
 0x38b   : > { %v3056_v18 = vpop.eup %3055 }
 0x38c   : > { %v1086_v19 = vsel %vm1073_vm12, %v3056_v18, 0.0 }
 0x38d   : > { %1087 = vadd.xlane.f32.xlu1 %v1086_v19 }
 0x3e8   : > { %v1204_v20 = vpop.xlane.xlu0 %1203 }
 0x3e9   : > { %v1208_v21 = vsub.f32 %v1200_v62, %v1204_v20 }
 0x3eb   : > { %v1210_v22 = vmul.f32 1.442695, %v1208_v21 }
 0x3ec   : > { %v1207_v23 = vpop.xlane.xlu1 %1206 }
 0x3ed   : > { %3057 = vpow2.f32 %v1210_v22  ;;  %v1209_v24 = vsub.f32 %v1201_v8, %v1207_v23 }
 0x3ef   : > { %v1212_v26 = vmul.f32 1.442695, %v1209_v24 }
 0x3f1   : > { %3059 = vpow2.f32 %v1212_v26 }
 0x3fa   : > { %v3058_v27 = vpop.eup %3057 }
 0x3fb   : > { %v1214_v28 = vsel %vm1069_vm11, %v3058_v27, 0.0 }
 0x3fc   : > { %1215 = vadd.xlane.f32.xlu0 %v1214_v28 }
 0x3fe   : > { %v3060_v29 = vpop.eup %3059 }
 0x3ff   : > { %v1217_v32 = vsel %vm1073_vm12, %v3060_v29, 0.0  ;;  %vm2500_vm12 = vcmp.eq.s32.totalorder %v3403_v42, 0 }
 0x400   : > { %1218 = vadd.xlane.f32.xlu1 %v1217_v32 }
 0x412   : > { %1226 = vrot.lane.b32.xlu0 %v3379_v30, %s3117_s29  ;;  %v1085_v33 = vpop.xlane.xlu0 %1084 }
 0x413   : > { %3061 = vrcp.f32 %v1085_v33 }
 0x416   : > { %v1088_v34 = vpop.xlane.xlu1 %1087 }
 0x417   : > { %3063 = vrcp.f32 %v1088_v34 }
 0x420   : > { %v3062_v35 = vpop.eup %3061 }
 0x421   : > { %v1091_v37 = vmul.f32 %v3062_v35, %v3054_v16  ;;  %v1307_v16 = vrot.slane %v1303_v15, %v3350_v50 }
 0x424   : > { %v3064_v36 = vpop.eup %3063 }
 0x425   : > { %v1092_v38 = vmul.f32 %v3064_v36, %v3056_v18  ;;  %v2947_v36 = vld [vmem:[%s3871_s11 + $0xe4] ss:$16 sps:$4 sm:$0xff]  }
 0x427   : > { %v1093_v39 = vpack.c.bf16 %v1092_v38, %v1091_v37  ;;  %v2950_v37 = vld [vmem:[%s3871_s11 + $0xec] ss:$16 sps:$4 sm:$0xff]   ;;  %v2945_v38 = vld [vmem:[%s3871_s11 + $0xe0] ss:$16 sps:$4 sm:$0xff]  }
 0x429   : > { %2845 = vmatmul.mubr.msk.bf16.vlgmr.msra.gmra.mxu1 %vm1069_vm11, %v1093_v39  ;;  %v2948_v39 = vld [vmem:[%s3871_s11 + $0xe8] ss:$16 sps:$4 sm:$0xff]  }
 0x42a   : > { %2856 = vmatprep.mubr.msk.bf16.mxu1 %vm3115_vm1, %v3113_v7  ;;  %vm3831_vm1 = vmand %vm680_vm0, %vm2396_vm13 }
 0x42b   : > { %vm2401_vm3 = vmor %vm2400_vm2, %vm3831_vm1 }
 0x485   : > { %v1216_v40 = vpop.xlane.xlu0 %1215 }
 0x486   : > { %3065 = vrcp.f32 %v1216_v40  ;;  %v2953_v40 = vld [vmem:[%s3871_s11 + $0xc4] ss:$16 sps:$4 sm:$0xff]  }
 0x489   : > { %v1227_v41 = vpop.permute.xlu0 %1226  ;;  %v1219_v43 = vpop.xlane.xlu1 %1218 }
 0x48a   : > { %v1232_v30 = vand.u32 %v1227_v41, %v3377_v25  ;;  %3067 = vrcp.f32 %v1219_v43  ;;  %v2938_v25 = vld [vmem:[%s3867_s7 + $0x30] sm:$0xff]   ;;  %v2956_v41 = vld [vmem:[%s3871_s11 + $0xcc] ss:$16 sps:$4 sm:$0xff]  }
 0x48b   : > { %2863 = vmatpush3.bf16.msra.mxu0 %v2938_v25  ;;  %v2951_v43 = vld [vmem:[%s3871_s11 + $0xc0] ss:$16 sps:$4 sm:$0xff]   ;;  %v2966_v25 = vld [vmem:[%s3871_s11 + $0x88] ss:$16 sps:$4 sm:$0xff]  }
 0x48c   : > { %2855 = vmatpush3.bf16.msra.mxu1 %v1232_v30  ;;  %2864 = vmatprep.subr.bf16.mxu0 %v3113_v7  ;;  %v2954_v30 = vld [vmem:[%s3871_s11 + $0xc8] ss:$16 sps:$4 sm:$0xff]  }
 0x48d   : > { %1671 = vmatprep.subr.bf16.mxu1 %v2947_v36  ;;  %v2993_v36 = vld [vmem:[%s3873_s13 + $0x78] sm:$0xff]  }
 0x48f   : > { %2865 = vmatpush3.bf16.msra.mxu0 %v2939_v46  ;;  %v2971_v46 = vld [vmem:[%s3871_s11 + $0x64] ss:$16 sps:$4 sm:$0xff]  }
 0x490   : > { %2866 = vmatprep.subr.bf16.mxu0 %v3113_v7 }
 0x493   : > { %v3066_v44 = vpop.eup %3065  ;;  %2867 = vmatpush3.bf16.msra.mxu0 %v2940_v56  ;;  %v2972_v56 = vld [vmem:[%s3871_s11 + $0x68] ss:$16 sps:$4 sm:$0xff]  }
 0x494   : > { %v1222_v48 = vmul.f32 %v3066_v44, %v3058_v27  ;;  %2868 = vmatprep.subr.bf16.mxu0 %v3113_v7  ;;  %v2959_v44 = vld [vmem:[%s3871_s11 + $0xa4] ss:$16 sps:$4 sm:$0xff]  }
 0x497   : > { %v3068_v45 = vpop.eup %3067  ;;  %2869 = vmatpush3.bf16.msra.mxu0 %v2941_v58  ;;  %v2980_v58 = vld [vmem:[%s3871_s11 + $0x4c] ss:$16 sps:$4 sm:$0xff]  }
 0x498   : > { %v1223_v49 = vmul.f32 %v3068_v45, %v3060_v29  ;;  %2870 = vmatprep.subr.bf16.mxu0 %v3113_v7  ;;  %v2962_v45 = vld [vmem:[%s3871_s11 + $0xac] ss:$16 sps:$4 sm:$0xff]  }
 0x49a   : > { %v1224_v51 = vpack.c.bf16 %v1223_v49, %v1222_v48  ;;  %v2957_v48 = vld [vmem:[%s3871_s11 + $0xa0] ss:$16 sps:$4 sm:$0xff]   ;;  %v2960_v49 = vld [vmem:[%s3871_s11 + $0xa8] ss:$16 sps:$4 sm:$0xff]  }
 0x49b   : > { %2871 = vmatpush3.bf16.msra.mxu0 %v2942_v59  ;;  %v2975_v59 = vld [vmem:[%s3871_s11 + $0x40] ss:$16 sps:$4 sm:$0xff]  }
 0x49c   : > { %2857 = vmatmul.mubr.msk.bf16.vlgmr.msra.gmra.mxu1 %vm1069_vm11, %v1224_v51  ;;  %2872 = vmatprep.subr.bf16.mxu0 %v3113_v7  ;;  %v2963_v51 = vld [vmem:[%s3871_s11 + $0x80] ss:$16 sps:$4 sm:$0xff]   ;;  %vm2501_vm11 = vcmp.eq.s32.totalorder %v3403_v42, 1 }
 0x49d   : > { %1703 = vmatprep.mubr.bf16.mxu1 %v3114_v31  ;;  %1672 = vmatpush1.bf16.msra.mxu1 %v2945_v38  ;;  %v2997_v38 = vld [vmem:[%s3873_s13 + $0x70] sm:$0xff]  }
 0x49e   : > { %1673 = vmatprep.subr.bf16.mxu1 %v2953_v40  ;;  %v2999_v40 = vld [vmem:[%s3873_s13 + $0x30] sm:$0xff]  }
 0x49f   : > { %2873 = vmatpush3.bf16.msra.mxu0 %v2943_v60  ;;  %v2978_v60 = vld [vmem:[%s3871_s11 + $0x48] ss:$16 sps:$4 sm:$0xff]  }
 0x4a0   : > { %2874 = vmatprep.subr.bf16.mxu0 %v3113_v7 }
 0x4a1   : > { %1674 = vmatpush1.bf16.msra.mxu1 %v2951_v43  ;;  %v3001_v43 = vld [vmem:[%s3873_s13 + $0x68] sm:$0xff]  }
 0x4a2   : > { %1675 = vmatprep.subr.bf16.mxu1 %v2959_v44  ;;  %v3003_v44 = vld [vmem:[%s3873_s13 + $0x28] sm:$0xff]  }
 0x4a3   : > { %2875 = vmatpush3.bf16.msra.mxu0 %v2944_v61  ;;  %v2983_v61 = vld [vmem:[%s3871_s11 + $0x24] ss:$16 sps:$4 sm:$0xff]  }
 0x4a4   : > { %1714 = vmatprep.subr.bf16.mxu0 %v2950_v37  ;;  %v2996_v37 = vld [vmem:[%s3873_s13 + $0xb8] sm:$0xff]  }
 0x4a5   : > { %1676 = vmatpush1.bf16.msra.mxu1 %v2957_v48  ;;  %v3005_v48 = vld [vmem:[%s3873_s13 + $0x60] sm:$0xff]  }
 0x4a6   : > { %1677 = vmatprep.subr.bf16.mxu1 %v2965_v52  ;;  %v3008_v52 = vld [vmem:[%s3873_s13 + $0xa0] sm:$0xff]  }
 0x4a9   : > { %1678 = vmatpush1.bf16.msra.mxu1 %v2963_v51  ;;  %v3007_v51 = vld [vmem:[%s3873_s13 + $0x20] sm:$0xff]  }
 0x4aa   : > { %1679 = vmatprep.subr.bf16.mxu1 %v2971_v46  ;;  %v3011_v46 = vld [vmem:[%s3873_s13 + $0x18] sm:$0xff]  }
 0x4e9   : > { %v1138_v53 = vpop.f32.mrf.mxu1 }
 0x4eb   : > { %v2846_v54 = vpop.f32.mrf.mxu1 }
 0x4ec   : > { %v2974_v54 = vld [vmem:[%s3871_s11 + $0x6c] ss:$16 sps:$4 sm:$0xff]  }
 0x4ed   : > { %v1141_v55 = vpop.f32.mrf.mxu1 }
 0x4ef   : > { %v2847_v57 = vpop.f32.mrf.mxu1 }
 0x4f0   : > { %v2977_v57 = vld [vmem:[%s3871_s11 + $0x44] ss:$16 sps:$4 sm:$0xff]  }
 0x55c   : > { %v1268_v62 = vpop.f32.mrf.mxu1 }
 0x55e   : > { %v2858_v63 = vpop.f32.mrf.mxu1 }
 0x55f   : > { %v2981_v63 = vld [vmem:[%s3871_s11 + $0x20] ss:$16 sps:$4 sm:$0xff]  }
 0x560   : > { %v1271_v0 = vpop.f32.mrf.mxu1 }
 0x561   : > { %v2898_v1 = vpack.i.bf16 %v1271_v0, %v1268_v62  ;;  %v2986_v62 = vld [vmem:[%s3871_s11 + $0x2c] ss:$16 sps:$4 sm:$0xff]   ;;  %v2984_v0 = vld [vmem:[%s3871_s11 + $0x28] ss:$16 sps:$4 sm:$0xff]  }
 0x562   : > { %v2859_v6 = vpop.f32.mrf.mxu1 }
 0x563   : > { %2899 = vrot.lane.b32.xlu1 %v2898_v1, %s3117_s29  ;;  %v2989_v1 = vld [vmem:[%s3871_s11 + $0x4] ss:$16 sps:$4 sm:$0xff]   ;;  %v2992_v6 = vld [vmem:[%s3871_s11 + $0xc] ss:$16 sps:$4 sm:$0xff]  }
 0x5d5   : > { %v2900_v8 = vpop.permute.xlu1 %2899 }
 0x5d6   : > { %v2902_v9 = vunpack.i.h.bf16 %v2900_v8  ;;  %v2901_v10 = vunpack.i.l.bf16 %v2900_v8  ;;  %v2987_v8 = vld [vmem:[%s3871_s11] ss:$16 sps:$4 sm:$0xff]  }
 0x5d8   : > { %v1284_v11 = vsel %vm1017_vm4, %v1141_v55, %v2902_v9  ;;  %v1283_v12 = vsel %vm1017_vm4, %v1138_v53, %v2901_v10  ;;  %v2968_v53 = vld [vmem:[%s3871_s11 + $0x8c] ss:$16 sps:$4 sm:$0xff]   ;;  %v2969_v55 = vld [vmem:[%s3871_s11 + $0x60] ss:$16 sps:$4 sm:$0xff]   ;;  %v2990_v9 = vld [vmem:[%s3871_s11 + $0x8] ss:$16 sps:$4 sm:$0xff]  }
 0x5d9   : > { %v1285_v13 = vpack.c.bf16 %v1284_v11, %v1283_v12  ;;  %1680 = vmatpush1.bf16.msra.mxu1 %v2969_v55  ;;  %v3013_v55 = vld [vmem:[%s3873_s13 + $0x50] sm:$0xff]  }
 0x5da   : > { %1681 = vmatprep.subr.bf16.mxu1 %v2977_v57  ;;  %v3015_v57 = vld [vmem:[%s3873_s13 + $0x10] sm:$0xff]  }
 0x5db   : > { %2877 = vmatmul.mubr.bf16.vlgmr.msra.gmra.mxu0 %v1285_v13 }
 0x5dc   : > { %1746 = vmatprep.mubr.bf16.mxu0 %v3114_v31  ;;  %1715 = vmatpush1.bf16.msra.mxu0 %v2948_v39  ;;  %v2998_v39 = vld [vmem:[%s3873_s13 + $0xf0] sm:$0xff]  }
 0x5dd   : > { %1716 = vmatprep.subr.bf16.mxu0 %v2956_v41  ;;  %1682 = vmatpush1.bf16.msra.mxu1 %v2975_v59  ;;  %v3000_v41 = vld [vmem:[%s3873_s13 + $0xb0] sm:$0xff]   ;;  %v3017_v59 = vld [vmem:[%s3873_s13 + $0x48] sm:$0xff]  }
 0x5de   : > { %1683 = vmatprep.subr.bf16.mxu1 %v2983_v61  ;;  %v3019_v61 = vld [vmem:[%s3873_s13 + $0x8] sm:$0xff]  }
 0x5e0   : > { %1717 = vmatpush1.bf16.msra.mxu0 %v2954_v30  ;;  %v3002_v30 = vld [vmem:[%s3873_s13 + $0xe8] sm:$0xff]  }
 0x5e1   : > { %1718 = vmatprep.subr.bf16.mxu0 %v2962_v45  ;;  %1684 = vmatpush1.bf16.msra.mxu1 %v2981_v63  ;;  %v3004_v45 = vld [vmem:[%s3873_s13 + $0xa8] sm:$0xff]   ;;  %v3021_v63 = vld [vmem:[%s3873_s13 + $0x40] sm:$0xff]  }
 0x5e2   : > { %1685 = vmatprep.subr.bf16.mxu1 %v2989_v1  ;;  %v3023_v1 = vld [vmem:[%s3873_s13] sm:$0xff]  }
 0x5e4   : > { %1719 = vmatpush1.bf16.msra.mxu0 %v2960_v49  ;;  %v3006_v49 = vld [vmem:[%s3873_s13 + $0xe0] sm:$0xff]  }
 0x5e5   : > { %1720 = vmatprep.subr.bf16.mxu0 %v2968_v53  ;;  %1686 = vmatpush1.bf16.msra.mxu1 %v2987_v8  ;;  %v3010_v53 = vld [vmem:[%s3873_s13 + $0xd8] sm:$0xff]   ;;  %v1472_v8 = vld [vmem:[%s3872_s12] sm:$0xf] }
 0x5e6   : > { %2772 = vmatprep.subr.bf16.mxu1 %v2993_v36 }
 0x5e8   : > { %1721 = vmatpush1.bf16.msra.mxu0 %v2966_v25  ;;  %v3009_v25 = vld [vmem:[%s3873_s13 + $0x58] sm:$0xff]  }
 0x5e9   : > { %1722 = vmatprep.subr.bf16.mxu0 %v2974_v54  ;;  %v3012_v54 = vld [vmem:[%s3873_s13 + $0x98] sm:$0xff]  }
 0x5ec   : > { %1723 = vmatpush1.bf16.msra.mxu0 %v2972_v56  ;;  %v3014_v56 = vld [vmem:[%s3873_s13 + $0xd0] sm:$0xff]  }
 0x5ed   : > { %1724 = vmatprep.subr.bf16.mxu0 %v2980_v58  ;;  %v3016_v58 = vld [vmem:[%s3873_s13 + $0x90] sm:$0xff]  }
 0x5f0   : > { %1725 = vmatpush1.bf16.msra.mxu0 %v2978_v60  ;;  %v3018_v60 = vld [vmem:[%s3873_s13 + $0xc8] sm:$0xff]  }
 0x5f1   : > { %1726 = vmatprep.subr.bf16.mxu0 %v2986_v62  ;;  %v3020_v62 = vld [vmem:[%s3873_s13 + $0x88] sm:$0xff]  }
 0x5f4   : > { %1727 = vmatpush1.bf16.msra.mxu0 %v2984_v0  ;;  %v3022_v0 = vld [vmem:[%s3873_s13 + $0xc0] sm:$0xff]  }
 0x5f5   : > { %1728 = vmatprep.subr.bf16.mxu0 %v2992_v6  ;;  %v3024_v6 = vld [vmem:[%s3873_s13 + $0x80] sm:$0xff]  }
 0x5f8   : > { %1729 = vmatpush1.bf16.msra.mxu0 %v2990_v9  ;;  %v1473_v9 = vunpack.c.l.bf16 %v1472_v8 }
 0x69b   : > { %v1390_v17 = vpop.f32.mrf.mxu0 }
 0x69c   : > { %v1391_v18 = vadd.f32 %v1390_v17, %v1307_v16 }
 0x69d   : > { %v2878_v19 = vpop.f32.mrf.mxu0 }
 0x69e   : > { %v3465_v20 = vadd.f32 %v1391_v18, %v3242_v4  ;;  %v1431_v19 = vld [vmem:[%s3870_s10] sm:$0x1] }
 0x69f   : > { %v1393_v21 = vpop.f32.mrf.mxu0 }
 0x6a0   : > { %v1394_v22 = vadd.f32 %v1393_v21, %v1307_v16  ;;  %1399 = vadd.xlane.f32.xlu0 %v3465_v20  ;;  %v1423_v16 = vld [vmem:[%s3869_s9] sm:$0x1] }
 0x6a1   : > { %v2879_v23 = vpop.f32.mrf.mxu0  ;;  %v1424_v17 = vunpack.c.l.bf16 %v1423_v16 }
 0x6a2   : > { %v3469_v24 = vadd.f32 %v1394_v22, %v3238_v2  ;;  %v1432_v23 = vunpack.c.l.bf16 %v1431_v19 }
 0x6a3   : > { %v1428_v22 = vrot.slane %v1424_v17, %v3350_v50 }
 0x6a4   : > { %v1401_v26 = vsel %vm680_vm0, %v3469_v24, 0.0 }
 0x6a5   : > { %1402 = vadd.xlane.f32.xlu1 %v1401_v26 }
 0x729   : > { %v1400_v27 = vpop.xlane.xlu0 %1399 }
 0x72a   : > { %v1404_v28 = vmul.f32 0.0078125, %v1400_v27 }
 0x72c   : > { %v3474_v29 = vsub.f32 %v3465_v20, %v1404_v28 }
 0x72e   : > { %v1403_v32 = vpop.xlane.xlu1 %1402  ;;  %v1408_v4 = vmul.f32 %v3474_v29, %v3474_v29 }
 0x72f   : > { %v1405_v33 = vmul.f32 0.0078125, %v1403_v32  ;;  %v1436_v32 = vrot.slane %v1432_v23, %v3350_v50 }
 0x730   : > { %1410 = vadd.xlane.f32.xlu0 %v1408_v4 }
 0x731   : > { %v3479_v34 = vsub.f32 %v3469_v24, %v1405_v33 }
 0x733   : > { %v1409_v2 = vmul.f32 %v3479_v34, %v3479_v34 }
 0x735   : > { %v1412_v35 = vsel %vm680_vm0, %v1409_v2, 0.0 }
 0x736   : > { %1413 = vadd.xlane.f32.xlu1 %v1412_v35 }
 0x7b9   : > { %v1411_v10 = vpop.xlane.xlu0 %1410 }
 0x7ba   : > { %v1415_v11 = vmul.f32 0.0078125, %v1411_v10  ;;  %v1489_v10 = vsub.s32 6, %v3344_v47 }
 0x7bc   : > { %v1417_v12 = vadd.f32 1e-05, %v1415_v11  ;;  %v1478_v11 = vrot.slane %v1473_v9, %v3350_v50 }
 0x7be   : > { %3069 = vrsqrt.f32 %v1417_v12  ;;  %v1486_v12 = vrot.slane %v1473_v9, %v766_v3 }
 0x7bf   : > { %v1414_v13 = vpop.xlane.xlu1 %1413 }
 0x7c0   : > { %v1416_v14 = vmul.f32 0.0078125, %v1414_v13  ;;  %v1482_v13 = vrot.slane %v1473_v9, %v3368_v5  ;;  %v1506_v16 = vrot.slane %v1486_v12, %v3350_v50 }
 0x7c2   : > { %v1418_v15 = vadd.f32 1e-05, %v1416_v14  ;;  %v1490_v14 = vrot.slane %v1473_v9, %v1489_v10  ;;  %v1502_v17 = vrot.slane %v1482_v13, %v3350_v50 }
 0x7c4   : > { %3071 = vrsqrt.f32 %v1418_v15  ;;  %v1498_v15 = vrot.slane %v1478_v11, %v3350_v50 }
 0x7cb   : > { %v3070_v18 = vpop.eup %3069 }
 0x7cc   : > { %v1421_v21 = vmul.f32 %v3070_v18, %v3474_v29  ;;  %v2994_v29 = vld [vmem:[%s3873_s13 + $0xf8] sm:$0xff]   ;;  %v1510_v18 = vrot.slane %v1490_v14, %v3350_v50 }
 0x7cd   : > { %2794 = vmatprep.subr.bf16.mxu0 %v2994_v29 }
 0x7ce   : > { %v1429_v28 = vmul.f32 %v1428_v22, %v1421_v21 }
 0x7d0   : > { %v1437_v33 = vadd.f32 %v1436_v32, %v1429_v28 }
 0x7d1   : > { %v3072_v26 = vpop.eup %3071 }
 0x7d2   : > { %v1422_v27 = vmul.f32 %v3072_v26, %v3479_v34  ;;  %v2995_v34 = vld [vmem:[%s3873_s13 + $0x38] sm:$0xff]  }
 0x7d4   : > { %v1430_v4 = vmul.f32 %v1428_v22, %v1422_v27 }
 0x7d6   : > { %v1438_v2 = vadd.f32 %v1436_v32, %v1430_v4 }
 0x7d8   : > { %v1439_v35 = vpack.c.bf16 %v1438_v2, %v1437_v33 }
 0x7da   : > { %1704 = vmatmul.mubr.bf16.vlgmr.msra.gmra.mxu1 %v1439_v35  ;;  %1747 = vmatmul.mubr.bf16.vlgmr.msra.gmra.mxu0 %v1439_v35 }
 0x7db   : > { %2773 = vmatpush3.bf16.msra.mxu1 %v2995_v34  ;;  %2795 = vmatpush3.bf16.msra.mxu0 %v2996_v37 }
 0x7dc   : > { %2774 = vmatprep.subr.bf16.mxu1 %v2997_v38  ;;  %2796 = vmatprep.subr.bf16.mxu0 %v2998_v39 }
 0x7df   : > { %2775 = vmatpush3.bf16.msra.mxu1 %v2999_v40  ;;  %2797 = vmatpush3.bf16.msra.mxu0 %v3000_v41 }
 0x7e0   : > { %2776 = vmatprep.subr.bf16.mxu1 %v3001_v43  ;;  %2798 = vmatprep.subr.bf16.mxu0 %v3002_v30 }
 0x7e3   : > { %2777 = vmatpush3.bf16.msra.mxu1 %v3003_v44  ;;  %2799 = vmatpush3.bf16.msra.mxu0 %v3004_v45 }
 0x7e4   : > { %2778 = vmatprep.subr.bf16.mxu1 %v3005_v48  ;;  %2800 = vmatprep.subr.bf16.mxu0 %v3006_v49 }
 0x7e7   : > { %2779 = vmatpush3.bf16.msra.mxu1 %v3007_v51  ;;  %2801 = vmatpush3.bf16.msra.mxu0 %v3008_v52 }
 0x7e8   : > { %2780 = vmatprep.subr.bf16.mxu1 %v3009_v25  ;;  %2802 = vmatprep.subr.bf16.mxu0 %v3010_v53 }
 0x7eb   : > { %2781 = vmatpush3.bf16.msra.mxu1 %v3011_v46  ;;  %2803 = vmatpush3.bf16.msra.mxu0 %v3012_v54 }
 0x7ec   : > { %2782 = vmatprep.subr.bf16.mxu1 %v3013_v55  ;;  %2804 = vmatprep.subr.bf16.mxu0 %v3014_v56 }
 0x7ef   : > { %2783 = vmatpush3.bf16.msra.mxu1 %v3015_v57  ;;  %2805 = vmatpush3.bf16.msra.mxu0 %v3016_v58 }
 0x7f0   : > { %2784 = vmatprep.subr.bf16.mxu1 %v3017_v59  ;;  %2806 = vmatprep.subr.bf16.mxu0 %v3018_v60 }
 0x7f3   : > { %2785 = vmatpush3.bf16.msra.mxu1 %v3019_v61  ;;  %2807 = vmatpush3.bf16.msra.mxu0 %v3020_v62 }
 0x7f4   : > { %2786 = vmatprep.subr.bf16.mxu1 %v3021_v63  ;;  %2808 = vmatprep.subr.bf16.mxu0 %v3022_v0 }
 0x7f7   : > { %2787 = vmatpush3.bf16.msra.mxu1 %v3023_v1  ;;  %2809 = vmatpush3.bf16.msra.mxu0 %v3024_v6 }
 0x89a   : > { %v1705_v19 = vpop.f32.mrf.mxu1  ;;  %v1748_v21 = vpop.f32.mrf.mxu0 }
 0x89b   : > { %v3698_v22 = vadd.f32 %v1705_v19, %v1498_v15  ;;  %v3700_v23 = vadd.f32 %v1748_v21, %v1506_v16 }
 0x89c   : > { %v1707_v26 = vpop.f32.mrf.mxu1  ;;  %v1750_v47 = vpop.f32.mrf.mxu0 }
 0x89d   : > { %v1757_v3 = vmul.f32 %v3698_v22, %v3698_v22  ;;  %v1759_v27 = vmul.f32 %v3700_v23, %v3700_v23  ;;  %v3706_v28 = vadd.f32 %v1707_v26, %v1502_v17  ;;  %v3708_v32 = vadd.f32 %v1750_v47, %v1510_v18 }
 0x89e   : > { %v1709_v4 = vpop.f32.mrf.mxu1  ;;  %v1752_v33 = vpop.f32.mrf.mxu0 }
 0x89f   : > { %v1765_v2 = vmul.f32 %v1757_v3, %v3698_v22  ;;  %v1767_v35 = vmul.f32 %v1759_v27, %v3700_v23  ;;  %v1758_v36 = vmul.f32 %v3706_v28, %v3706_v28  ;;  %v1760_v29 = vmul.f32 %v3708_v32, %v3708_v32 }
 0x8a0   : > { %v3716_v34 = vadd.f32 %v1709_v4, %v1498_v15  ;;  %v3718_v37 = vadd.f32 %v1752_v33, %v1506_v16  ;;  %v1711_v38 = vpop.f32.mrf.mxu1  ;;  %v1754_v39 = vpop.f32.mrf.mxu0 }
 0x8a1   : > { %v1773_v40 = vmul.f32 0.044715, %v1765_v2  ;;  %v1775_v41 = vmul.f32 0.044715, %v1767_v35  ;;  %v1766_v43 = vmul.f32 %v1758_v36, %v3706_v28  ;;  %v1768_v30 = vmul.f32 %v1760_v29, %v3708_v32 }
 0x8a2   : > { %v1761_v44 = vmul.f32 %v3716_v34, %v3716_v34  ;;  %v1763_v45 = vmul.f32 %v3718_v37, %v3718_v37  ;;  %v3726_v48 = vadd.f32 %v1711_v38, %v1502_v17  ;;  %v3728_v49 = vadd.f32 %v1754_v39, %v1510_v18 }
 0x8a3   : > { %v1781_v51 = vadd.f32 %v1773_v40, %v3698_v22  ;;  %v1783_v52 = vadd.f32 %v1775_v41, %v3700_v23  ;;  %v1774_v25 = vmul.f32 0.044715, %v1766_v43  ;;  %v1776_v53 = vmul.f32 0.044715, %v1768_v30 }
 0x8a4   : > { %v1769_v46 = vmul.f32 %v1761_v44, %v3716_v34  ;;  %v1771_v54 = vmul.f32 %v1763_v45, %v3718_v37  ;;  %v1762_v55 = vmul.f32 %v3726_v48, %v3726_v48  ;;  %v1764_v56 = vmul.f32 %v3728_v49, %v3728_v49 }
 0x8a5   : > { %v1789_v57 = vmul.f32 0.7978846, %v1781_v51  ;;  %v1791_v58 = vmul.f32 0.7978846, %v1783_v52  ;;  %v1782_v59 = vadd.f32 %v1774_v25, %v3706_v28  ;;  %v1784_v60 = vadd.f32 %v1776_v53, %v3708_v32 }
 0x8a6   : > { %v1777_v61 = vmul.f32 0.044715, %v1769_v46  ;;  %v1779_v62 = vmul.f32 0.044715, %v1771_v54  ;;  %v1770_v63 = vmul.f32 %v1762_v55, %v3726_v48  ;;  %v1772_v0 = vmul.f32 %v1764_v56, %v3728_v49 }
 0x8a7   : > { %3073 = vtanh.f32 %v1789_v57  ;;  %v1790_v1 = vmul.f32 0.7978846, %v1782_v59  ;;  %v1792_v6 = vmul.f32 0.7978846, %v1784_v60 }
 0x8a8   : > { %3075 = vtanh.f32 %v1791_v58  ;;  %v1785_v8 = vadd.f32 %v1777_v61, %v3716_v34  ;;  %v1787_v9 = vadd.f32 %v1779_v62, %v3718_v37  ;;  %v1778_v10 = vmul.f32 0.044715, %v1770_v63 }
 0x8a9   : > { %3077 = vtanh.f32 %v1790_v1  ;;  %v1780_v11 = vmul.f32 0.044715, %v1772_v0 }
 0x8aa   : > { %3079 = vtanh.f32 %v1792_v6  ;;  %v1793_v12 = vmul.f32 0.7978846, %v1785_v8  ;;  %v1795_v13 = vmul.f32 0.7978846, %v1787_v9  ;;  %v1786_v14 = vadd.f32 %v1778_v10, %v3726_v48 }
 0x8ab   : > { %v1788_v15 = vadd.f32 %v1780_v11, %v3728_v49 }
 0x8ac   : > { %3081 = vtanh.f32 %v1793_v12  ;;  %v1794_v16 = vmul.f32 0.7978846, %v1786_v14 }
 0x8ad   : > { %3083 = vtanh.f32 %v1795_v13  ;;  %v1796_v17 = vmul.f32 0.7978846, %v1788_v15 }
 0x8ae   : > { %3085 = vtanh.f32 %v1794_v16 }
 0x8af   : > { %3087 = vtanh.f32 %v1796_v17 }
 0x8b4   : > { %v3074_v18 = vpop.eup %3073 }
 0x8b5   : > { %v3076_v19 = vpop.eup %3075  ;;  %v1805_v27 = vadd.f32 1.0, %v3074_v18 }
 0x8b6   : > { %v3078_v21 = vpop.eup %3077  ;;  %v1807_v2 = vadd.f32 1.0, %v3076_v19 }
 0x8b7   : > { %v3080_v26 = vpop.eup %3079  ;;  %v1806_v47 = vadd.f32 1.0, %v3078_v21  ;;  %v1813_v43 = vmul.f32 0.5, %v1805_v27 }
 0x8b8   : > { %v1808_v4 = vadd.f32 1.0, %v3080_v26  ;;  %v1815_v51 = vmul.f32 0.5, %v1807_v2  ;;  %v3030_v2 = vld [vmem:[%s3877_s17 + $0x64] ss:$8 sps:$4 sm:$0xff]  }
 0x8b9   : > { %v3082_v3 = vpop.eup %3081  ;;  %v1814_v41 = vmul.f32 0.5, %v1806_v47  ;;  %v1821_v56 = vmul.f32 %v1813_v43, %v3698_v22  ;;  %v2173_v22 = vld [vmem:[%s3874_s14] sm:$0x1]  ;;  %v3042_v43 = vld [vmem:[%s3877_s17 + $0x24] ss:$8 sps:$4 sm:$0xff]  }
 0x8ba   : > { %v3084_v33 = vpop.eup %3083  ;;  %v1809_v35 = vadd.f32 1.0, %v3082_v3  ;;  %v1816_v45 = vmul.f32 0.5, %v1808_v4  ;;  %v1823_v59 = vmul.f32 %v1815_v51, %v3700_v23  ;;  %v3048_v51 = vld [vmem:[%s3877_s17 + $0x4] ss:$8 sps:$4 sm:$0xff]  }
 0x8bb   : > { %v3086_v36 = vpop.eup %3085  ;;  %v1811_v29 = vadd.f32 1.0, %v3084_v33  ;;  %v1822_v54 = vmul.f32 %v1814_v41, %v3706_v28  ;;  %v3025_v33 = vld [vmem:[%s3877_s17 + $0x70] ss:$8 sps:$4 sm:$0xff]  }
 0x8bc   : > { %v3088_v38 = vpop.eup %3087  ;;  %v1817_v39 = vmul.f32 0.5, %v1809_v35  ;;  %v1810_v40 = vadd.f32 1.0, %v3086_v36  ;;  %v1824_v57 = vmul.f32 %v1816_v45, %v3708_v32  ;;  %v3028_v35 = vld [vmem:[%s3877_s17 + $0x60] ss:$8 sps:$4 sm:$0xff]   ;;  %v3033_v36 = vld [vmem:[%s3877_s17 + $0x54] ss:$8 sps:$4 sm:$0xff]  }
 0x8bd   : > { %v1819_v30 = vmul.f32 0.5, %v1811_v29  ;;  %v1812_v44 = vadd.f32 1.0, %v3088_v38  ;;  %v3031_v29 = vld [vmem:[%s3877_s17 + $0x50] ss:$8 sps:$4 sm:$0xff]   ;;  %v3034_v38 = vld [vmem:[%s3877_s17 + $0x40] ss:$8 sps:$4 sm:$0xff]  }
 0x8be   : > { %v1818_v52 = vmul.f32 0.5, %v1810_v40  ;;  %v1825_v25 = vmul.f32 %v1817_v39, %v3716_v34  ;;  %v3036_v39 = vld [vmem:[%s3877_s17 + $0x44] ss:$8 sps:$4 sm:$0xff]   ;;  %v3039_v40 = vld [vmem:[%s3877_s17 + $0x34] ss:$8 sps:$4 sm:$0xff]  }
 0x8bf   : > { %v1820_v53 = vmul.f32 0.5, %v1812_v44  ;;  %v1827_v46 = vmul.f32 %v1819_v30, %v3718_v37  ;;  %v3037_v41 = vld [vmem:[%s3877_s17 + $0x30] ss:$8 sps:$4 sm:$0xff]   ;;  %v3040_v30 = vld [vmem:[%s3877_s17 + $0x20] ss:$8 sps:$4 sm:$0xff]  }
 0x8c0   : > { %v1826_v55 = vmul.f32 %v1818_v52, %v3726_v48  ;;  %v1829_v62 = vpack.c.bf16 %v1825_v25, %v1821_v56  ;;  %v2174_v48 = vunpack.c.l.bf16 %v2173_v22  ;;  %v3045_v44 = vld [vmem:[%s3877_s17 + $0x14] ss:$8 sps:$4 sm:$0xff]   ;;  %v3043_v45 = vld [vmem:[%s3877_s17 + $0x10] ss:$8 sps:$4 sm:$0xff]   ;;  %v3046_v52 = vld [vmem:[%s3877_s17] ss:$8 sps:$4 sm:$0xff]  }
 0x8c1   : > { %v1828_v58 = vmul.f32 %v1820_v53, %v3728_v49  ;;  %v1831_v34 = vpack.c.bf16 %v1827_v46, %v1823_v59 }
 0x8c2   : > { %v1830_v60 = vpack.c.bf16 %v1826_v55, %v1822_v54  ;;  %v2178_v9 = vrot.slane %v2174_v48, %v3350_v50 }
 0x8c3   : > { %v1832_v61 = vpack.c.bf16 %v1828_v58, %v1824_v57  ;;  %v2205_v57 = vld [vmem:[%s3875_s15] sm:$0x1] }
 0x8c4   : > { %2121 = vmatprep.mubr.bf16.mxu1 %v1830_v60  ;;  %v2206_v58 = vunpack.c.l.bf16 %v2205_v57  ;;  %v2213_v60 = vld [vmem:[%s3876_s16] sm:$0x1] }
 0x8c5   : > { %2162 = vmatprep.mubr.bf16.mxu0 %v1832_v61  ;;  %2122 = vmatmul.mubr.bf16.vlgmr.msra.gmra.mxu1 %v1829_v62 }
 0x8c6   : > { %2163 = vmatmul.mubr.bf16.vlgmr.msra.gmra.mxu0 %v1831_v34  ;;  %2371 = vmatprep.mubr.bf16.mxu1 %v3114_v31  ;;  %v2210_v62 = vrot.slane %v2206_v58, %v3350_v50  ;;  %v2214_v34 = vunpack.c.l.bf16 %v2213_v60 }
 0x985   : > { %v2788_v28 = vpop.f32.mrf.mxu1 }
 0x986   : > { %v2810_v32 = vpop.f32.mrf.mxu0 }
 0x987   : > { %v2789_v37 = vpop.f32.mrf.mxu1 }
 0x988   : > { %v2790_v49 = vadd.f32 %v2789_v37, %v2788_v28  ;;  %v2811_v23 = vpop.f32.mrf.mxu0  ;;  %v2218_v37 = vrot.slane %v2214_v34, %v3350_v50 }
 0x989   : > { %v2812_v63 = vadd.f32 %v2811_v23, %v2810_v32  ;;  %v2791_v0 = vpop.f32.mrf.mxu1 }
 0x98a   : > { %v2813_v1 = vpop.f32.mrf.mxu0 }
 0x98b   : > { %v2165_v6 = vadd.f32 %v2812_v63, %v2790_v49  ;;  %v2792_v8 = vpop.f32.mrf.mxu1 }
 0x98c   : > { %v2793_v10 = vadd.f32 %v2792_v8, %v2791_v0  ;;  %v2814_v11 = vpop.f32.mrf.mxu0  ;;  %v2238_v0 = vld [vmem:[%s3878_s18] sm:$0x3] }
 0x98d   : > { %v2815_v31 = vadd.f32 %v2814_v11, %v2813_v1  ;;  %v2171_v12 = vadd.f32 %v2165_v6, %v3465_v20  ;;  %v2239_v1 = vunpack.c.l.bf16 %v2238_v0 }
 0x98f   : > { %v2168_v13 = vadd.f32 %v2815_v31, %v2793_v10  ;;  %v2179_v14 = vadd.f32 %v2178_v9, %v2171_v12  ;;  %v2244_v6 = vrot.slane %v2239_v1, %v3350_v50  ;;  %v2248_v8 = vrot.slane %v2239_v1, %v3368_v5 }
 0x991   : > { %2181 = vadd.xlane.f32.xlu1 %v2179_v14  ;;  %v2172_v15 = vadd.f32 %v2168_v13, %v3469_v24  ;;  %v3027_v24 = vld [vmem:[%s3877_s17 + $0x74] ss:$8 sps:$4 sm:$0xff]   ;;  %v2258_v10 = vrot.slane %v2248_v8, %v3350_v50 }
 0x992   : > { %2339 = vmatprep.subr.bf16.mxu1 %v3027_v24 }
 0x993   : > { %v2180_v16 = vadd.f32 %v2178_v9, %v2172_v15  ;;  %2340 = vmatpush1.bf16.msra.mxu1 %v3025_v33  ;;  %v2254_v9 = vrot.slane %v2244_v6, %v3350_v50 }
 0x994   : > { %2341 = vmatprep.subr.bf16.mxu1 %v3030_v2 }
 0x995   : > { %v2183_v17 = vsel %vm680_vm0, %v2180_v16, 0.0 }
 0x996   : > { %2184 = vadd.xlane.f32.xlu0 %v2183_v17 }
 0x997   : > { %2342 = vmatpush1.bf16.msra.mxu1 %v3028_v35 }
 0x998   : > { %2343 = vmatprep.subr.bf16.mxu1 %v3033_v36 }
 0x99b   : > { %2344 = vmatpush1.bf16.msra.mxu1 %v3031_v29 }
 0x99c   : > { %2345 = vmatprep.subr.bf16.mxu1 %v3036_v39 }
 0x99f   : > { %2346 = vmatpush1.bf16.msra.mxu1 %v3034_v38 }
 0x9a0   : > { %2347 = vmatprep.subr.bf16.mxu1 %v3039_v40 }
 0x9a3   : > { %2348 = vmatpush1.bf16.msra.mxu1 %v3037_v41 }
 0x9a4   : > { %2349 = vmatprep.subr.bf16.mxu1 %v3042_v43  ;;  %v2441_v43 = vadd.s32 128, %v3403_v42 }
 0x9a7   : > { %2350 = vmatpush1.bf16.msra.mxu1 %v3040_v30 }
 0x9a8   : > { %2351 = vmatprep.subr.bf16.mxu1 %v3045_v44 }
 0x9ab   : > { %2352 = vmatpush1.bf16.msra.mxu1 %v3043_v45 }
 0x9ac   : > { %2353 = vmatprep.subr.bf16.mxu1 %v3048_v51 }
 0x9af   : > { %2354 = vmatpush1.bf16.msra.mxu1 %v3046_v52 }
 0xa1a   : > { %v2182_v18 = vpop.xlane.xlu1 %2181 }
 0xa1b   : > { %v2186_v19 = vmul.f32 0.0078125, %v2182_v18 }
 0xa1d   : > { %v2188_v21 = vsub.f32 %v2179_v14, %v2186_v19  ;;  %v2402_v19 = vld [vmem:[%s669_s2 + $0x8] sm:$0x11] }
 0xa1f   : > { %v2185_v26 = vpop.xlane.xlu0 %2184  ;;  %v2190_v47 = vmul.f32 %v2188_v21, %v2188_v21 }
 0xa20   : > { %v2187_v3 = vmul.f32 0.0078125, %v2185_v26 }
 0xa21   : > { %2192 = vadd.xlane.f32.xlu0 %v2190_v47 }
 0xa22   : > { %v2189_v27 = vsub.f32 %v2180_v16, %v2187_v3 }
 0xa24   : > { %v2191_v4 = vmul.f32 %v2189_v27, %v2189_v27 }
 0xa26   : > { %v2194_v20 = vsel %vm680_vm0, %v2191_v4, 0.0  ;;  %v2405_v4 = vld [vmem:[%s664_s27] sm:$0xff] }
 0xa27   : > { %2195 = vadd.xlane.f32.xlu1 %v2194_v20  ;;  %v2406_v20 = vld [vmem:[%s664_s27 + $0x8] sm:$0x1]  ;;  %vm2464_vm8 = vcmp.ne.s32.totalorder %v2405_v4, 4294967196 }
 0xa28   : > { %vm2465_vm9 = vcmp.ne.s32.totalorder %v2406_v20, 4294967196  ;;  %v2737_v1 = vsel %vm2464_vm8, 1.0, %v3113_v7 }
 0xa29   : > { %v2738_v8 = vsel %vm2465_vm9, 1.0, %v3113_v7 }
 0xa2a   : > { %v2489_v5 = vsel %vm2476_vm10, %v2738_v8, 0.0 }
 0xaaa   : > { %v2193_v25 = vpop.xlane.xlu0 %2192 }
 0xaab   : > { %v2197_v53 = vmul.f32 0.0078125, %v2193_v25 }
 0xaad   : > { %v2199_v46 = vadd.f32 1e-05, %v2197_v53 }
 0xaaf   : > { %3089 = vrsqrt.f32 %v2199_v46 }
 0xab0   : > { %v2196_v54 = vpop.xlane.xlu1 %2195 }
 0xab1   : > { %v2198_v55 = vmul.f32 0.0078125, %v2196_v54 }
 0xab3   : > { %v2200_v56 = vadd.f32 1e-05, %v2198_v55 }
 0xab5   : > { %3091 = vrsqrt.f32 %v2200_v56 }
 0xabc   : > { %v3090_v59 = vpop.eup %3089 }
 0xabd   : > { %v2203_v61 = vmul.f32 %v3090_v59, %v2188_v21 }
 0xabf   : > { %v2211_v32 = vmul.f32 %v2210_v62, %v2203_v61 }
 0xac1   : > { %v2219_v49 = vadd.f32 %v2218_v37, %v2211_v32 }
 0xac2   : > { %v3092_v22 = vpop.eup %3091 }
 0xac3   : > { %v2204_v28 = vmul.f32 %v3092_v22, %v2189_v27 }
 0xac5   : > { %v2212_v48 = vmul.f32 %v2210_v62, %v2204_v28 }
 0xac7   : > { %v2220_v23 = vadd.f32 %v2218_v37, %v2212_v48 }
 0xac9   : > { %v2221_v63 = vpack.c.bf16 %v2220_v23, %v2219_v49 }
 0xacb   : > { %2372 = vmatmul.mubr.bf16.vlgmr.msra.gmra.mxu1 %v2221_v63 }
 0xb8b   : > { %v2373_v11 = vpop.f32.mrf.mxu1 }
 0xb8c   : > { %v2374_v12 = vadd.f32 %v2373_v11, %v2254_v9 }
 0xb8d   : > { %v2375_v31 = vpop.f32.mrf.mxu1 }
 0xb8e   : > { %v2376_v13 = vadd.f32 %v2375_v31, %v2258_v10 }
 0xb8f   : > { %v2377_v14 = vpop.f32.mrf.mxu1 }
 0xb90   : > { %v2744_v15 = vpack.c.bf16 %v2376_v13, %v2374_v12  ;;  %v2378_v50 = vadd.f32 %v2377_v14, %v2254_v9  ;;  %v2407_v16 = vmax.f32 %v2374_v12, %v2376_v13 }
 0xb91   : > { %v2379_v17 = vpop.f32.mrf.mxu1 }
 0xb92   : > { %v2380_v18 = vadd.f32 %v2379_v17, %v2258_v10  ;;  %2408 = vmax.xlane.f32.xlu1 %v2407_v16  ;;  %2394 = vst [vmem:[%s669_s2] sm:$0xff] %v2744_v15  ;;  %v2410_v26 = vsel %vm680_vm0, %v2378_v50, -inf }
 0xb94   : > { %v2745_v21 = vpack.c.bf16 %v2380_v18, %v2378_v50  ;;  %v2411_v47 = vsel %vm680_vm0, %v2380_v18, -inf }
 0xb95   : > { %v2412_v3 = vmax.f32 %v2410_v26, %v2411_v47 }
 0xb96   : > { %v2403_v27 = vsel %vm2401_vm3, %v2745_v21, %v2402_v19 }
 0xb97   : > { %2413 = vmax.xlane.f32.xlu0 %v2412_v3  ;;  %2404 = vst [vmem:[%s669_s2 + $0x8] sm:$0x11] %v2403_v27 }
 0xba3   : > { %2443 = vperm.xlu1 %2904, %v2405_v4  }
 0xbad   : > { %2446 = vperm.xlu0 %2903, %v2406_v20  }
 0xc1b   : > { %v2409_v24 = vpop.xlane.xlu1 %2408 }
 0xc1c   : > { %v2415_v33 = vsub.f32 %v2374_v12, %v2409_v24  ;;  %v2416_v2 = vsub.f32 %v2376_v13, %v2409_v24 }
 0xc1e   : > { %v2419_v35 = vmul.f32 1.442695, %v2415_v33  ;;  %v2421_v36 = vmul.f32 1.442695, %v2416_v2 }
 0xc1f   : > { %v2444_v30 = vpop.permute.xlu1 %2443 }
 0xc20   : > { %3093 = vpow2.f32 %v2419_v35  ;;  %v2414_v29 = vpop.xlane.xlu0 %2413  ;;  %vm2448_vm4 = vcmp.eq.s32.totalorder %v3403_v42, %v2444_v30  ;;  %vm2449_vm5 = vcmp.eq.s32.totalorder %v2441_v43, %v2444_v30 }
 0xc21   : > { %3095 = vpow2.f32 %v2421_v36  ;;  %v2417_v38 = vsub.f32 %v2378_v50, %v2414_v29  ;;  %v2418_v39 = vsub.f32 %v2380_v18, %v2414_v29  ;;  %v2452_v25 = vsel %vm2448_vm4, %v2374_v12, 0.0 }
 0xc22   : > { %v2453_v53 = vsel %vm2449_vm5, %v2376_v13, 0.0 }
 0xc23   : > { %v2423_v40 = vmul.f32 1.442695, %v2417_v38  ;;  %v2425_v41 = vmul.f32 1.442695, %v2418_v39  ;;  %v2456_v57 = vadd.f32 %v2453_v53, %v2452_v25 }
 0xc25   : > { %3097 = vpow2.f32 %v2423_v40 }
 0xc26   : > { %3099 = vpow2.f32 %v2425_v41 }
 0xc28   : > { %v2447_v44 = vpop.permute.xlu0 %2446 }
 0xc29   : > { %vm2450_vm6 = vcmp.eq.s32.totalorder %v3403_v42, %v2447_v44  ;;  %vm2451_vm7 = vcmp.eq.s32.totalorder %v2441_v43, %v2447_v44 }
 0xc2a   : > { %v2454_v46 = vsel %vm2450_vm6, %v2378_v50, 0.0  ;;  %v2455_v54 = vsel %vm2451_vm7, %v2380_v18, 0.0 }
 0xc2b   : > { %v2459_v60 = vsel %vm680_vm0, %v2454_v46, 0.0  ;;  %v2460_v61 = vsel %vm680_vm0, %v2455_v54, 0.0 }
 0xc2c   : > { %v2461_v34 = vadd.f32 %v2460_v61, %v2459_v60 }
 0xc2d   : > { %v3094_v45 = vpop.eup %3093 }
 0xc2e   : > { %v3096_v51 = vpop.eup %3095 }
 0xc2f   : > { %v2427_v52 = vadd.f32 %v3096_v51, %v3094_v45 }
 0xc31   : > { %2428 = vadd.xlane.f32.xlu1 %v2427_v52 }
 0xc32   : > { %v3098_v55 = vpop.eup %3097 }
 0xc33   : > { %v3100_v56 = vpop.eup %3099  ;;  %v2430_v58 = vsel %vm680_vm0, %v3098_v55, 0.0 }
 0xc34   : > { %v2431_v59 = vsel %vm680_vm0, %v3100_v56, 0.0  ;;  %vm2474_vm0 = vcmask 7168  }
 0xc35   : > { %2457 = vadd.xlane.f32.xlu1 %v2456_v57  ;;  %v2432_v62 = vadd.f32 %v2431_v59, %v2430_v58  ;;  %v2488_v14 = vsel %vm2474_vm0, %v2737_v1, 0.0 }
 0xc36   : > { %v2490_v50 = vadd.f32 %v2489_v5, %v2488_v14 }
 0xc37   : > { %2433 = vadd.xlane.f32.xlu0 %v2432_v62 }
 0xc39   : > { %2462 = vadd.xlane.f32.xlu1 %v2461_v34 }
 0xcba   : > { %v2429_v22 = vpop.xlane.xlu1 %2428 }
 0xcbb   : > { %3101 = vlog2.f32 %v2429_v22 }
 0xcbe   : > { %v2458_v49 = vpop.xlane.xlu1 %2457 }
 0xcc0   : > { %v2434_v28 = vpop.xlane.xlu0 %2433 }
 0xcc1   : > { %3103 = vlog2.f32 %v2434_v28 }
 0xcc2   : > { %v2463_v9 = vpop.xlane.xlu1 %2462 }
 0xcc8   : > { %v3102_v32 = vpop.eup %3101 }
 0xcc9   : > { %v2436_v37 = vmul.f32 0.6931472, %v3102_v32 }
 0xccb   : > { %v2439_v48 = vadd.f32 %v2436_v37, %v2409_v24 }
 0xccd   : > { %v2470_v63 = vsub.f32 %v2439_v48, %v2458_v49 }
 0xcce   : > { %v3104_v23 = vpop.eup %3103 }
 0xccf   : > { %v2438_v0 = vmul.f32 0.6931472, %v3104_v23  ;;  %v2472_v10 = vmul.f32 %v2737_v1, %v2470_v63 }
 0xcd1   : > { %v2440_v6 = vadd.f32 %v2438_v0, %v2414_v29  ;;  %v2475_v12 = vsel %vm2474_vm0, %v2472_v10, 0.0 }
 0xcd3   : > { %v2471_v11 = vsub.f32 %v2440_v6, %v2463_v9 }
 0xcd5   : > { %v2473_v31 = vmul.f32 %v2738_v8, %v2471_v11 }
 0xcd7   : > { %v2477_v13 = vsel %vm2476_vm10, %v2473_v31, 0.0 }
 0xcd8   : > { %v2478_v15 = vadd.f32 %v2477_v13, %v2475_v12 }
 0xcda   : > { %2479 = vadd.xlane.f32.xlu1 %v2478_v15 }
 0xcde   : > { %2491 = vadd.xlane.f32.xlu1 %v2490_v50 }
 0xd63   : > { %v2480_v16 = vpop.xlane.xlu1 %2479 }
 0xd64   : > { %v2481_v17 = vrot.slane %v2480_v16, 4 }
 0xd66   : > { %v2482_v18 = vadd.f32 %v2481_v17, %v2480_v16 }
 0xd67   : > { %v2492_v19 = vpop.xlane.xlu1 %2491 }
 0xd68   : > { %v2483_v21 = vrot.slane %v2482_v18, 2  ;;  %v2493_v7 = vrot.slane %v2492_v19, 4 }
 0xd6a   : > { %v2494_v26 = vadd.f32 %v2493_v7, %v2492_v19  ;;  %v2484_v47 = vadd.f32 %v2483_v21, %v2482_v18 }
 0xd6c   : > { %v2495_v3 = vrot.slane %v2494_v26, 2  ;;  %v2485_v27 = vrot.slane %v2484_v47, 1 }
 0xd6e   : > { %v2496_v4 = vadd.f32 %v2495_v3, %v2494_v26  ;;  %v2486_v20 = vadd.f32 %v2485_v27, %v2484_v47 }
 0xd70   : > { %2880 = vpush %v2486_v20  ;;  %v2497_v24 = vrot.slane %v2496_v4, 1 }
 0xd72   : > { %v2498_v33 = vadd.f32 %v2497_v24, %v2496_v4 }
 0xd74   : > { %2882 = vpush %v2498_v33 }
 0xda1   : > { %s2881_s29 = spop %2880 }
 0xda2   : > { %v2504_v35 = vstv %s2881_s29 }
 0xda5   : > { %s2883_s28 = spop %2882 }
 0xda6   : > { %v2502_v2 = vstv %s2883_s28 }
 0xda7   : > { %v2503_v36 = vsel %vm2501_vm11, %v2502_v2, 0.0 }
 0xda8   : > { %v2505_v29 = vsel %vm2500_vm12, %v2504_v35, %v2503_v36 }
 0xda9   : > { %2506 = vst [vmem:[%s672_s0] sm:$0x1] %v2505_v29 }
 0xdaa PF: > { %s31_s1 = sadd.s32 1, %s3111_s1  }
 0xdab   : > { %p28_p4 = scmp.ge.s32.totalorder %s31_s1, 4  }
 0xdad   :  { %30 = sbr.rel (!%p28_p4) target bundleno = 6 (0x6), region = 144 }

</bundles_post_ra>
